<compile_context>
chip_gen: v5e
topology: v5e:2x2
jax: 0.10.0
libtpu: 0.0.40
codegen_flags: <defaults>
</compile_context>

<pallas_src>
import functools

import jax
import jax.numpy as jnp
from jax.experimental import pallas as pl
from jax.experimental.pallas import tpu as pltpu


# --------------------------------------------------------------------------
# Plain-JAX glue: sampling / grouping (data-dependent, not the compute hot path)
# --------------------------------------------------------------------------
def furthest_point_sampling(xyz, n_samples):
    """xyz: [B, N, 3] -> indices [B, n_samples] (deterministic start at index 0)."""
    B, N, _ = xyz.shape

    def body(i, state):
        idx, dists, farthest = state
        idx = idx.at[:, i].set(farthest)
        centroid = jnp.take_along_axis(xyz, farthest[:, None, None], axis=1)  # [B,1,3]
        d = jnp.sum((xyz - centroid) ** 2, axis=-1)                           # [B,N]
        dists = jnp.minimum(dists, d)
        farthest = jnp.argmax(dists, axis=-1).astype(jnp.int32)
        return idx, dists, farthest

    init = (jnp.zeros((B, n_samples), jnp.int32),
            jnp.full((B, N), 1e10, xyz.dtype),
            jnp.zeros((B,), jnp.int32))
    idx, _, _ = jax.lax.fori_loop(0, n_samples, body, init)
    return idx


def ball_query(xyz, centroids, radius, K):
    """query_ball_point: first K indices (original order) with squared distance
    <= radius^2, padded with the first valid index."""
    B, N, _ = xyz.shape
    d2 = jnp.sum((centroids[:, :, None, :] - xyz[:, None, :, :]) ** 2, axis=-1)  # [B,S,N]
    within = d2 <= radius ** 2
    point_idx = jnp.broadcast_to(jnp.arange(N, dtype=jnp.int32), d2.shape)
    masked = jnp.where(within, point_idx, N)
    firstK = jnp.sort(masked, axis=-1)[:, :, :K]
    first = firstK[:, :, :1]
    out = jnp.where(firstK == N, first, firstK)
    out = jnp.where(out == N, 0, out)   # safeguard (centroid itself is always in radius)
    return out.astype(jnp.int32)


def batch_indexing(data, idx):
    """data: [B, N, C], idx: [B, ...] -> data gathered along dim 1."""
    return jax.vmap(lambda d, i: d[i])(data, idx)


# --------------------------------------------------------------------------
# Pallas kernels
# --------------------------------------------------------------------------
def _sa_mlp_kernel(n_layers, *refs):
    """refs = (g_ref, w_0, b_0, ..., w_{L-1}, b_{L-1}, out_ref).

    g_ref  : [1, K, C_in, TILE_S] bf16  channels-first; TILE_S is the lane dim
    w_l    : [C_out_l, C_in_l]    bf16  (BN scale pre-folded into rows)
    b_l    : [C_out_l, 1]         f32   (folded conv-bias / BN shift)
    out_ref: [1, TILE_S, C_out]   f32   channels-last (lane-dense when C_out >= 128)
    """
    g_ref, out_ref = refs[0], refs[-1]
    _, K, _, tile_s = g_ref.shape

    ws = [refs[1 + 2 * l][...] for l in range(n_layers)]
    # Hoist the lane-broadcast of the per-channel shift out of the K loop
    # (JAX does not CSE broadcast_in_dim).
    bs = [jnp.broadcast_to(refs[2 + 2 * l][...], (refs[2 + 2 * l].shape[0], tile_s))
          for l in range(n_layers)]

    acc = None
    for k in range(K):                        # static unroll: K is 16-64 for SSG layers
        x = g_ref[0, k]                       # [C_in, TILE_S] bf16
        for l in range(n_layers):
            y = jnp.dot(ws[l], x, preferred_element_type=jnp.float32)   # MXU, f32 acc
            y = jnp.maximum(y + bs[l], 0.0)                             # bias + ReLU
            x = y.astype(jnp.bfloat16) if l < n_layers - 1 else y       # bf16 feed next MXU
        acc = x if k == 0 else jnp.maximum(acc, x)                      # running max over K
    # One [C_out, TILE_S] -> [TILE_S, C_out] transpose per step (XLU; otherwise idle)
    # so the output block is written channels-last and lane-dense.
    out_ref[0] = jnp.transpose(acc).astype(out_ref.dtype)


def _sa_mlp_group_all_kernel(n_layers, *refs):
    """group_all (n_samples == 1) path.

    refs = (x_ref, w_0, b_0, ..., out_ref)
    x_ref  : [1, C_in, TILE_N] bf16   (channels-first, lane-dense point tile)
    out_ref: [1, C_out, 1]     f32    resident accumulator across the reduction axis
    """
    x_ref, out_ref = refs[0], refs[-1]
    x = x_ref[0]
    for l in range(n_layers):
        w = refs[1 + 2 * l][...]
        b = refs[2 + 2 * l][...]
        y = jnp.dot(w, x, preferred_element_type=jnp.float32)
        y = jnp.maximum(y + b, 0.0)
        x = y.astype(jnp.bfloat16) if l < n_layers - 1 else y
    m = jnp.max(x, axis=-1, keepdims=True)          # [C_out, 1] lane reduce (XLU)

    t = pl.program_id(1)

    @pl.when(t == 0)
    def _():
        out_ref[0] = m

    @pl.when(t > 0)
    def _():
        out_ref[0] = jnp.maximum(out_ref[0], m)


# --------------------------------------------------------------------------
# Tiling heuristics
# --------------------------------------------------------------------------
def _choose_tile_s(S, K, B):
    """Largest multiple-of-128 divisor of S with K*tile_s <= 8192 rows per step,
    shrunk while the grid would be too small to feed the pipeline / both v7x
    TensorCores.  Falls back to the full extent when S has no such divisor."""
    cands = [t for t in range(128, S + 1, 128) if S % t == 0]
    if not cands:
        return S        # block last dim must be a multiple of 128 or the full extent
    ok = [t for t in cands if K * t <= 8192]
    t = max(ok) if ok else min(cands)
    for c in sorted((c for c in cands if c < t), reverse=True):
        if B * (S // t) >= 8 or K * c < 1024:
            break
        t = c
    return t


def _choose_tile_n(N):
    cands = [t for t in range(128, N + 1, 128) if N % t == 0]
    if not cands:
        return N
    ok = [t for t in cands if t <= 256]
    return max(ok) if ok else min(cands)


# --------------------------------------------------------------------------
# Pallas wrappers
# --------------------------------------------------------------------------
def sa_mlp_pallas(grouped_cf, params):
    """grouped_cf: [B, K, C_in, S] bf16 (channels-first).
    params: [(W [C_out,C_in] bf16 with BN scale folded, shift [C_out,1] f32), ...].
    Returns [B, S, C_out] f32."""
    B, K, C_in, S = grouped_cf.shape
    tile_s = _choose_tile_s(S, K, B)
    n_s_tiles = S // tile_s
    C_out = params[-1][0].shape[0]

    in_block_bytes = K * C_in * tile_s * 2
    if in_block_bytes > 16 * 1024 * 1024:
        raise ValueError(f"grouped tile ({in_block_bytes} bytes) too large for VMEM")

    in_specs = [pl.BlockSpec((1, K, C_in, tile_s), lambda b, st: (b, 0, 0, st))]
    flat = [grouped_cf]
    for (w, sh) in params:
        flat += [w, sh]
        in_specs += [pl.BlockSpec(w.shape, lambda b, st: (0, 0)),    # resident weights
                     pl.BlockSpec(sh.shape, lambda b, st: (0, 0))]

    flops = 2 * B * S * K * sum(int(w.shape[0]) * int(w.shape[1]) for w, _ in params)
    bytes_accessed = (int(grouped_cf.size) * 2 + B * S * C_out * 4
                      + sum(int(w.size) * 2 + int(sh.size) * 4 for w, sh in params))

    kernel = functools.partial(_sa_mlp_kernel, len(params))
    return pl.pallas_call(
        kernel,
        out_shape=jax.ShapeDtypeStruct((B, S, C_out), jnp.float32),
        grid=(B, n_s_tiles),
        in_specs=in_specs,
        out_specs=pl.BlockSpec((1, tile_s, C_out), lambda b, st: (b, st, 0)),
        compiler_params=pltpu.CompilerParams(
            dimension_semantics=("parallel", "parallel"),
            vmem_limit_bytes=32 * 1024 * 1024,   # per-step footprint is a few MiB
        ),
        cost_estimate=pl.CostEstimate(flops=flops, transcendentals=0,
                                      bytes_accessed=int(bytes_accessed)),
    )(*flat)


def sa_mlp_group_all_pallas(g_cf, params):
    """g_cf: [B, C_in, N] bf16 (channels-first).  Returns [B, 1, C_out] f32."""
    B, C_in, N = g_cf.shape
    tile_n = _choose_tile_n(N)
    n_tiles = N // tile_n
    C_out = params[-1][0].shape[0]

    in_specs = [pl.BlockSpec((1, C_in, tile_n), lambda b, t: (b, 0, t))]
    flat = [g_cf]
    for (w, sh) in params:
        flat += [w, sh]
        in_specs += [pl.BlockSpec(w.shape, lambda b, t: (0, 0)),
                     pl.BlockSpec(sh.shape, lambda b, t: (0, 0))]

    kernel = functools.partial(_sa_mlp_group_all_kernel, len(params))
    out_cf = pl.pallas_call(
        kernel,
        out_shape=jax.ShapeDtypeStruct((B, C_out, 1), jnp.float32),
        grid=(B, n_tiles),
        in_specs=in_specs,
        out_specs=pl.BlockSpec((1, C_out, 1), lambda b, t: (b, 0, 0)),
        compiler_params=pltpu.CompilerParams(
            dimension_semantics=("parallel", "arbitrary"),
            vmem_limit_bytes=32 * 1024 * 1024),
    )(*flat)
    return jnp.swapaxes(out_cf, 1, 2)   # [B, 1, C_out]


# --------------------------------------------------------------------------
# Module
# --------------------------------------------------------------------------
class PointNet2SetAbstractionSSG:
    def __init__(self, n_samples, radius, n_points_per_group, in_channels,
                 mlp_out_channels, key):
        self.n_samples = n_samples
        self.radius = radius
        self.n_points_per_group = n_points_per_group
        self.mlp_out_channels = list(mlp_out_channels)
        eps = 1e-5
        self.params = []   # [(W*scale [C_out,C_in] bf16, shift [C_out,1] f32), ...]
        c_in = in_channels
        for c_out in mlp_out_channels:
            key, k_w, k_b, k_g, k_be, k_m, k_v = jax.random.split(key, 7)
            w = jax.random.normal(k_w, (c_out, c_in), jnp.float32) / jnp.sqrt(c_in)
            b_conv = 0.1 * jax.random.normal(k_b, (c_out,), jnp.float32)
            gamma = 1.0 + 0.1 * jax.random.normal(k_g, (c_out,), jnp.float32)
            beta = 0.1 * jax.random.normal(k_be, (c_out,), jnp.float32)
            mean = 0.05 * jax.random.normal(k_m, (c_out,), jnp.float32)
            var = jax.random.uniform(k_v, (c_out,), jnp.float32, 0.5, 1.5)
            scale = gamma / jnp.sqrt(var + eps)                # BatchNorm2d (eval) fold
            shift = (b_conv - mean) * scale + beta
            w_folded = (w * scale[:, None]).astype(jnp.bfloat16)   # fold scale into W
            self.params.append((w_folded, shift[:, None].astype(jnp.float32)))
            c_in = c_out

    def _group(self, points_xyz, features):
        """FPS + ball-query grouping -> centroids [B,S,3], grouped [B,K,C,S] bf16."""
        centroid_indices = furthest_point_sampling(points_xyz, self.n_samples)
        centroids = batch_indexing(points_xyz, centroid_indices)                 # [B,S,3]
        grouped_indices = ball_query(points_xyz, centroids, self.radius,
                                     self.n_points_per_group)                    # [B,S,K]
        idx_t = jnp.transpose(grouped_indices, (0, 2, 1))                        # [B,K,S]
        g_xyz = batch_indexing(points_xyz, idx_t)                                # [B,K,S,3]
        g_feat = batch_indexing(features, idx_t)                                 # [B,K,S,F]
        g_xyz = g_xyz - centroids[:, None, :, :]
        grouped = jnp.concatenate([g_xyz, g_feat], axis=-1)                      # [B,K,S,C]
        # Channels-first + bf16 cast happens inside the same jit region as the gathers
        # so XLA fuses it into the gather/concat fusion (no standalone transpose+cast
        # HBM pass in the Pallas wrapper, which streams this layout directly).
        grouped_cf = jnp.swapaxes(grouped, 2, 3).astype(jnp.bfloat16)            # [B,K,C,S]
        return centroids, grouped_cf

    def __call__(self, points_xyz, features=None):
        B, N, _ = points_xyz.shape
        if features is None:
            features = jnp.zeros((B, N, 0), points_xyz.dtype)
        if self.n_samples > 1:
            # TODO(synk): the gather that materializes the grouped tensor stays in XLA;
            # folding it into the kernel needs per-row data-dependent DMA gathers.
            centroids, grouped_cf = self._group(points_xyz, features)
            out = sa_mlp_pallas(grouped_cf, self.params)            # [B, S, C_out]
        else:
            centroids = jnp.zeros((B, 1, 3), points_xyz.dtype)
            g_cf = jnp.swapaxes(jnp.concatenate([points_xyz, features], axis=-1),
                                1, 2).astype(jnp.bfloat16)          # [B, C, N]
            out = sa_mlp_group_all_pallas(g_cf, self.params)        # [B, 1, C_out]
        return centroids, out

    # ---- pure-JAX references of the kernel hot paths (same mixed precision) ----
    def reference_mlp(self, grouped_cf):
        x = grouped_cf                                   # [B, K, C, S] bf16
        n = len(self.params)
        for l, (w, sh) in enumerate(self.params):
            y = jnp.einsum('dc,bkcs->bkds', w, x, preferred_element_type=jnp.float32)
            y = jnp.maximum(y + sh[None, None, :, :], 0.0)
            x = y.astype(jnp.bfloat16) if l < n - 1 else y
        return jnp.swapaxes(jnp.max(x, axis=1), 1, 2)    # [B, S, C_out]

    def reference_mlp_group_all(self, g_cf):
        x = g_cf                                         # [B, C, N] bf16
        n = len(self.params)
        for l, (w, sh) in enumerate(self.params):
            y = jnp.einsum('dc,bcn->bdn', w, x, preferred_element_type=jnp.float32)
            y = jnp.maximum(y + sh[None, :, :], 0.0)
            x = y.astype(jnp.bfloat16) if l < n - 1 else y
        return jnp.swapaxes(jnp.max(x, axis=-1, keepdims=True), 1, 2)   # [B, 1, C_out]


# --------------------------------------------------------------------------
if __name__ == "__main__":
    key = jax.random.PRNGKey(0)
    key, k_xyz, k_feat, k_p1, k_p2 = jax.random.split(key, 5)

    # Small but TPU-shaped: C_in = 16, last C_out = 128 (lane-dense output),
    # S = 256 -> TILE_S = 128 -> grid (B, 2), K*TILE_S = 2048 rows per step.
    B, N, F = 2, 512, 13
    n_samples, radius, K = 256, 0.3, 16
    mlp_out_channels = [64, 128]
    in_channels = 3 + F

    points_xyz = jax.random.uniform(k_xyz, (B, N, 3), jnp.float32)
    features = jax.random.normal(k_feat, (B, N, F), jnp.float32)

    layer = PointNet2SetAbstractionSSG(n_samples, radius, K, in_channels,
                                       mlp_out_channels, k_p1)
    centroids, out = jax.block_until_ready(jax.jit(layer.__call__)(points_xyz, features))
    assert centroids.shape == (B, n_samples, 3)
    assert out.shape == (B, n_samples, mlp_out_channels[-1])

    # Validate the kernel hot path against a pure-JAX reference (same precision recipe).
    c_ref, grouped_cf = jax.block_until_ready(jax.jit(layer._group)(points_xyz, features))
    ref = jax.block_until_ready(jax.jit(layer.reference_mlp)(grouped_cf))
    assert jnp.allclose(centroids, c_ref)
    err = float(jnp.max(jnp.abs(out - ref)))
    assert jnp.allclose(out, ref, rtol=1e-2, atol=1e-2), f"kernel/reference mismatch {err}"

    # group_all path (n_samples == 1) — exercises the reduction-grid kernel.
    layer_ga = PointNet2SetAbstractionSSG(1, radius, K, in_channels,
                                          mlp_out_channels, k_p2)
    c_ga, out_ga = jax.block_until_ready(jax.jit(layer_ga.__call__)(points_xyz, features))
    g_cf = jnp.swapaxes(jnp.concatenate([points_xyz, features], axis=-1),
                        1, 2).astype(jnp.bfloat16)
    ref_ga = jax.block_until_ready(jax.jit(layer_ga.reference_mlp_group_all)(g_cf))
    assert c_ga.shape == (B, 1, 3) and out_ga.shape == (B, 1, mlp_out_channels[-1])
    err_ga = float(jnp.max(jnp.abs(out_ga - ref_ga)))
    assert jnp.allclose(out_ga, ref_ga, rtol=1e-2, atol=1e-2), f"group_all mismatch {err_ga}"

    # TODO(synk): PyTorch FPS typically starts from a random point; the start index is
    # deterministic (0) here to keep the script self-contained.
    print("KERNEL_OK")
</pallas_src>

<mosaic_0001>
module attributes {stable_mosaic.version = 11 : i64} {
  func.func @_sa_mlp_kernel(%arg0: i32, %arg1: i32, %arg2: memref<1x16x16x128xbf16, #tpu.memory_space<vmem>>, %arg3: memref<64x16xbf16, #tpu.memory_space<vmem>>, %arg4: memref<64x1xf32, #tpu.memory_space<vmem>>, %arg5: memref<128x64xbf16, #tpu.memory_space<vmem>>, %arg6: memref<128x1xf32, #tpu.memory_space<vmem>>, %arg7: memref<1x128x128xf32, #tpu.memory_space<vmem>>) attributes {dimension_semantics = [#tpu.dimension_semantics<parallel>, #tpu.dimension_semantics<parallel>], iteration_bounds = array<i64: 2, 2>, scalar_prefetch = 0 : i64, scratch_operands = 0 : i64, tpu.core_type = #tpu.core_type<tc>, window_params = [{transform_indices = @transform_0, window_bounds = array<i64: 1, 16, 16, 128>}, {pipeline_mode = #tpu.pipeline_mode<synchronous>, transform_indices = @transform_1, window_bounds = array<i64: 64, 16>}, {pipeline_mode = #tpu.pipeline_mode<synchronous>, transform_indices = @transform_2, window_bounds = array<i64: 64, 1>}, {pipeline_mode = #tpu.pipeline_mode<synchronous>, transform_indices = @transform_3, window_bounds = array<i64: 128, 64>}, {pipeline_mode = #tpu.pipeline_mode<synchronous>, transform_indices = @transform_4, window_bounds = array<i64: 128, 1>}, {transform_indices = @transform_5, window_bounds = array<i64: 1, 128, 128>}]} {
    %c0 = arith.constant 0 : index
    %c0_0 = arith.constant 0 : index
    %0 = vector.load %arg3[%c0, %c0_0] : memref<64x16xbf16, #tpu.memory_space<vmem>>, vector<64x16xbf16>
    %c0_1 = arith.constant 0 : index
    %c0_2 = arith.constant 0 : index
    %1 = vector.load %arg5[%c0_1, %c0_2] : memref<128x64xbf16, #tpu.memory_space<vmem>>, vector<128x64xbf16>
    %c0_3 = arith.constant 0 : index
    %c0_4 = arith.constant 0 : index
    %2 = vector.load %arg4[%c0_3, %c0_4] : memref<64x1xf32, #tpu.memory_space<vmem>>, vector<64x1xf32>
    %3 = vector.shape_cast %2 : vector<64x1xf32> to vector<64x1xf32>
    %4 = vector.broadcast %3 : vector<64x1xf32> to vector<64x128xf32>
    %c0_5 = arith.constant 0 : index
    %c0_6 = arith.constant 0 : index
    %5 = vector.load %arg6[%c0_5, %c0_6] : memref<128x1xf32, #tpu.memory_space<vmem>>, vector<128x1xf32>
    %6 = vector.shape_cast %5 : vector<128x1xf32> to vector<128x1xf32>
    %7 = vector.broadcast %6 : vector<128x1xf32> to vector<128x128xf32>
    %c0_7 = arith.constant 0 : index
    %c0_8 = arith.constant 0 : index
    %c0_9 = arith.constant 0 : index
    %c0_10 = arith.constant 0 : index
    %8 = vector.load %arg2[%c0_7, %c0_8, %c0_9, %c0_10] : memref<1x16x16x128xbf16, #tpu.memory_space<vmem>>, vector<1x1x16x128xbf16>
    %9 = vector.shape_cast %8 : vector<1x1x16x128xbf16> to vector<16x128xbf16>
    %cst = arith.constant dense<0.000000e+00> : vector<64x128xf32>
    %10 = tpu.matmul %0, %9, %cst {dimension_numbers = #tpu.dot_dimension_numbers<[1], [0], [0], [1], [0, 0, 1, 1], [], []>} : vector<64x16xbf16>, vector<16x128xbf16>, vector<64x128xf32> -> vector<64x128xf32>
    %11 = arith.addf %10, %4 : vector<64x128xf32>
    %cst_11 = arith.constant 0.000000e+00 : f32
    %12 = vector.broadcast %cst_11 : f32 to vector<64x128xf32>
    %13 = arith.maximumf %11, %12 : vector<64x128xf32>
    %14 = arith.truncf %13 : vector<64x128xf32> to vector<64x128xbf16>
    %cst_12 = arith.constant dense<0.000000e+00> : vector<128x128xf32>
    %15 = tpu.matmul %1, %14, %cst_12 {dimension_numbers = #tpu.dot_dimension_numbers<[1], [0], [0], [1], [0, 0, 1, 1], [], []>} : vector<128x64xbf16>, vector<64x128xbf16>, vector<128x128xf32> -> vector<128x128xf32>
    %16 = arith.addf %15, %7 : vector<128x128xf32>
    %cst_13 = arith.constant 0.000000e+00 : f32
    %17 = vector.broadcast %cst_13 : f32 to vector<128x128xf32>
    %18 = arith.maximumf %16, %17 : vector<128x128xf32>
    %c0_14 = arith.constant 0 : index
    %c1 = arith.constant 1 : index
    %c0_15 = arith.constant 0 : index
    %c0_16 = arith.constant 0 : index
    %19 = vector.load %arg2[%c0_14, %c1, %c0_15, %c0_16] : memref<1x16x16x128xbf16, #tpu.memory_space<vmem>>, vector<1x1x16x128xbf16>
    %20 = vector.shape_cast %19 : vector<1x1x16x128xbf16> to vector<16x128xbf16>
    %cst_17 = arith.constant dense<0.000000e+00> : vector<64x128xf32>
    %21 = tpu.matmul %0, %20, %cst_17 {dimension_numbers = #tpu.dot_dimension_numbers<[1], [0], [0], [1], [0, 0, 1, 1], [], []>} : vector<64x16xbf16>, vector<16x128xbf16>, vector<64x128xf32> -> vector<64x128xf32>
    %22 = arith.addf %21, %4 : vector<64x128xf32>
    %cst_18 = arith.constant 0.000000e+00 : f32
    %23 = vector.broadcast %cst_18 : f32 to vector<64x128xf32>
    %24 = arith.maximumf %22, %23 : vector<64x128xf32>
    %25 = arith.truncf %24 : vector<64x128xf32> to vector<64x128xbf16>
    %cst_19 = arith.constant dense<0.000000e+00> : vector<128x128xf32>
    %26 = tpu.matmul %1, %25, %cst_19 {dimension_numbers = #tpu.dot_dimension_numbers<[1], [0], [0], [1], [0, 0, 1, 1], [], []>} : vector<128x64xbf16>, vector<64x128xbf16>, vector<128x128xf32> -> vector<128x128xf32>
    %27 = arith.addf %26, %7 : vector<128x128xf32>
    %cst_20 = arith.constant 0.000000e+00 : f32
    %28 = vector.broadcast %cst_20 : f32 to vector<128x128xf32>
    %29 = arith.maximumf %27, %28 : vector<128x128xf32>
    %30 = arith.maximumf %18, %29 : vector<128x128xf32>
    %c0_21 = arith.constant 0 : index
    %c2 = arith.constant 2 : index
    %c0_22 = arith.constant 0 : index
    %c0_23 = arith.constant 0 : index
    %31 = vector.load %arg2[%c0_21, %c2, %c0_22, %c0_23] : memref<1x16x16x128xbf16, #tpu.memory_space<vmem>>, vector<1x1x16x128xbf16>
    %32 = vector.shape_cast %31 : vector<1x1x16x128xbf16> to vector<16x128xbf16>
    %cst_24 = arith.constant dense<0.000000e+00> : vector<64x128xf32>
    %33 = tpu.matmul %0, %32, %cst_24 {dimension_numbers = #tpu.dot_dimension_numbers<[1], [0], [0], [1], [0, 0, 1, 1], [], []>} : vector<64x16xbf16>, vector<16x128xbf16>, vector<64x128xf32> -> vector<64x128xf32>
    %34 = arith.addf %33, %4 : vector<64x128xf32>
    %cst_25 = arith.constant 0.000000e+00 : f32
    %35 = vector.broadcast %cst_25 : f32 to vector<64x128xf32>
    %36 = arith.maximumf %34, %35 : vector<64x128xf32>
    %37 = arith.truncf %36 : vector<64x128xf32> to vector<64x128xbf16>
    %cst_26 = arith.constant dense<0.000000e+00> : vector<128x128xf32>
    %38 = tpu.matmul %1, %37, %cst_26 {dimension_numbers = #tpu.dot_dimension_numbers<[1], [0], [0], [1], [0, 0, 1, 1], [], []>} : vector<128x64xbf16>, vector<64x128xbf16>, vector<128x128xf32> -> vector<128x128xf32>
    %39 = arith.addf %38, %7 : vector<128x128xf32>
    %cst_27 = arith.constant 0.000000e+00 : f32
    %40 = vector.broadcast %cst_27 : f32 to vector<128x128xf32>
    %41 = arith.maximumf %39, %40 : vector<128x128xf32>
    %42 = arith.maximumf %30, %41 : vector<128x128xf32>
    %c0_28 = arith.constant 0 : index
    %c3 = arith.constant 3 : index
    %c0_29 = arith.constant 0 : index
    %c0_30 = arith.constant 0 : index
    %43 = vector.load %arg2[%c0_28, %c3, %c0_29, %c0_30] : memref<1x16x16x128xbf16, #tpu.memory_space<vmem>>, vector<1x1x16x128xbf16>
    %44 = vector.shape_cast %43 : vector<1x1x16x128xbf16> to vector<16x128xbf16>
    %cst_31 = arith.constant dense<0.000000e+00> : vector<64x128xf32>
    %45 = tpu.matmul %0, %44, %cst_31 {dimension_numbers = #tpu.dot_dimension_numbers<[1], [0], [0], [1], [0, 0, 1, 1], [], []>} : vector<64x16xbf16>, vector<16x128xbf16>, vector<64x128xf32> -> vector<64x128xf32>
    %46 = arith.addf %45, %4 : vector<64x128xf32>
    %cst_32 = arith.constant 0.000000e+00 : f32
    %47 = vector.broadcast %cst_32 : f32 to vector<64x128xf32>
    %48 = arith.maximumf %46, %47 : vector<64x128xf32>
    %49 = arith.truncf %48 : vector<64x128xf32> to vector<64x128xbf16>
    %cst_33 = arith.constant dense<0.000000e+00> : vector<128x128xf32>
    %50 = tpu.matmul %1, %49, %cst_33 {dimension_numbers = #tpu.dot_dimension_numbers<[1], [0], [0], [1], [0, 0, 1, 1], [], []>} : vector<128x64xbf16>, vector<64x128xbf16>, vector<128x128xf32> -> vector<128x128xf32>
    %51 = arith.addf %50, %7 : vector<128x128xf32>
    %cst_34 = arith.constant 0.000000e+00 : f32
    %52 = vector.broadcast %cst_34 : f32 to vector<128x128xf32>
    %53 = arith.maximumf %51, %52 : vector<128x128xf32>
    %54 = arith.maximumf %42, %53 : vector<128x128xf32>
    %c0_35 = arith.constant 0 : index
    %c4 = arith.constant 4 : index
    %c0_36 = arith.constant 0 : index
    %c0_37 = arith.constant 0 : index
    %55 = vector.load %arg2[%c0_35, %c4, %c0_36, %c0_37] : memref<1x16x16x128xbf16, #tpu.memory_space<vmem>>, vector<1x1x16x128xbf16>
    %56 = vector.shape_cast %55 : vector<1x1x16x128xbf16> to vector<16x128xbf16>
    %cst_38 = arith.constant dense<0.000000e+00> : vector<64x128xf32>
    %57 = tpu.matmul %0, %56, %cst_38 {dimension_numbers = #tpu.dot_dimension_numbers<[1], [0], [0], [1], [0, 0, 1, 1], [], []>} : vector<64x16xbf16>, vector<16x128xbf16>, vector<64x128xf32> -> vector<64x128xf32>
    %58 = arith.addf %57, %4 : vector<64x128xf32>
    %cst_39 = arith.constant 0.000000e+00 : f32
    %59 = vector.broadcast %cst_39 : f32 to vector<64x128xf32>
    %60 = arith.maximumf %58, %59 : vector<64x128xf32>
    %61 = arith.truncf %60 : vector<64x128xf32> to vector<64x128xbf16>
    %cst_40 = arith.constant dense<0.000000e+00> : vector<128x128xf32>
    %62 = tpu.matmul %1, %61, %cst_40 {dimension_numbers = #tpu.dot_dimension_numbers<[1], [0], [0], [1], [0, 0, 1, 1], [], []>} : vector<128x64xbf16>, vector<64x128xbf16>, vector<128x128xf32> -> vector<128x128xf32>
    %63 = arith.addf %62, %7 : vector<128x128xf32>
    %cst_41 = arith.constant 0.000000e+00 : f32
    %64 = vector.broadcast %cst_41 : f32 to vector<128x128xf32>
    %65 = arith.maximumf %63, %64 : vector<128x128xf32>
    %66 = arith.maximumf %54, %65 : vector<128x128xf32>
    %c0_42 = arith.constant 0 : index
    %c5 = arith.constant 5 : index
    %c0_43 = arith.constant 0 : index
    %c0_44 = arith.constant 0 : index
    %67 = vector.load %arg2[%c0_42, %c5, %c0_43, %c0_44] : memref<1x16x16x128xbf16, #tpu.memory_space<vmem>>, vector<1x1x16x128xbf16>
    %68 = vector.shape_cast %67 : vector<1x1x16x128xbf16> to vector<16x128xbf16>
    %cst_45 = arith.constant dense<0.000000e+00> : vector<64x128xf32>
    %69 = tpu.matmul %0, %68, %cst_45 {dimension_numbers = #tpu.dot_dimension_numbers<[1], [0], [0], [1], [0, 0, 1, 1], [], []>} : vector<64x16xbf16>, vector<16x128xbf16>, vector<64x128xf32> -> vector<64x128xf32>
    %70 = arith.addf %69, %4 : vector<64x128xf32>
    %cst_46 = arith.constant 0.000000e+00 : f32
    %71 = vector.broadcast %cst_46 : f32 to vector<64x128xf32>
    %72 = arith.maximumf %70, %71 : vector<64x128xf32>
    %73 = arith.truncf %72 : vector<64x128xf32> to vector<64x128xbf16>
    %cst_47 = arith.constant dense<0.000000e+00> : vector<128x128xf32>
    %74 = tpu.matmul %1, %73, %cst_47 {dimension_numbers = #tpu.dot_dimension_numbers<[1], [0], [0], [1], [0, 0, 1, 1], [], []>} : vector<128x64xbf16>, vector<64x128xbf16>, vector<128x128xf32> -> vector<128x128xf32>
    %75 = arith.addf %74, %7 : vector<128x128xf32>
    %cst_48 = arith.constant 0.000000e+00 : f32
    %76 = vector.broadcast %cst_48 : f32 to vector<128x128xf32>
    %77 = arith.maximumf %75, %76 : vector<128x128xf32>
    %78 = arith.maximumf %66, %77 : vector<128x128xf32>
    %c0_49 = arith.constant 0 : index
    %c6 = arith.constant 6 : index
    %c0_50 = arith.constant 0 : index
    %c0_51 = arith.constant 0 : index
    %79 = vector.load %arg2[%c0_49, %c6, %c0_50, %c0_51] : memref<1x16x16x128xbf16, #tpu.memory_space<vmem>>, vector<1x1x16x128xbf16>
    %80 = vector.shape_cast %79 : vector<1x1x16x128xbf16> to vector<16x128xbf16>
    %cst_52 = arith.constant dense<0.000000e+00> : vector<64x128xf32>
    %81 = tpu.matmul %0, %80, %cst_52 {dimension_numbers = #tpu.dot_dimension_numbers<[1], [0], [0], [1], [0, 0, 1, 1], [], []>} : vector<64x16xbf16>, vector<16x128xbf16>, vector<64x128xf32> -> vector<64x128xf32>
    %82 = arith.addf %81, %4 : vector<64x128xf32>
    %cst_53 = arith.constant 0.000000e+00 : f32
    %83 = vector.broadcast %cst_53 : f32 to vector<64x128xf32>
    %84 = arith.maximumf %82, %83 : vector<64x128xf32>
    %85 = arith.truncf %84 : vector<64x128xf32> to vector<64x128xbf16>
    %cst_54 = arith.constant dense<0.000000e+00> : vector<128x128xf32>
    %86 = tpu.matmul %1, %85, %cst_54 {dimension_numbers = #tpu.dot_dimension_numbers<[1], [0], [0], [1], [0, 0, 1, 1], [], []>} : vector<128x64xbf16>, vector<64x128xbf16>, vector<128x128xf32> -> vector<128x128xf32>
    %87 = arith.addf %86, %7 : vector<128x128xf32>
    %cst_55 = arith.constant 0.000000e+00 : f32
    %88 = vector.broadcast %cst_55 : f32 to vector<128x128xf32>
    %89 = arith.maximumf %87, %88 : vector<128x128xf32>
    %90 = arith.maximumf %78, %89 : vector<128x128xf32>
    %c0_56 = arith.constant 0 : index
    %c7 = arith.constant 7 : index
    %c0_57 = arith.constant 0 : index
    %c0_58 = arith.constant 0 : index
    %91 = vector.load %arg2[%c0_56, %c7, %c0_57, %c0_58] : memref<1x16x16x128xbf16, #tpu.memory_space<vmem>>, vector<1x1x16x128xbf16>
    %92 = vector.shape_cast %91 : vector<1x1x16x128xbf16> to vector<16x128xbf16>
    %cst_59 = arith.constant dense<0.000000e+00> : vector<64x128xf32>
    %93 = tpu.matmul %0, %92, %cst_59 {dimension_numbers = #tpu.dot_dimension_numbers<[1], [0], [0], [1], [0, 0, 1, 1], [], []>} : vector<64x16xbf16>, vector<16x128xbf16>, vector<64x128xf32> -> vector<64x128xf32>
    %94 = arith.addf %93, %4 : vector<64x128xf32>
    %cst_60 = arith.constant 0.000000e+00 : f32
    %95 = vector.broadcast %cst_60 : f32 to vector<64x128xf32>
    %96 = arith.maximumf %94, %95 : vector<64x128xf32>
    %97 = arith.truncf %96 : vector<64x128xf32> to vector<64x128xbf16>
    %cst_61 = arith.constant dense<0.000000e+00> : vector<128x128xf32>
    %98 = tpu.matmul %1, %97, %cst_61 {dimension_numbers = #tpu.dot_dimension_numbers<[1], [0], [0], [1], [0, 0, 1, 1], [], []>} : vector<128x64xbf16>, vector<64x128xbf16>, vector<128x128xf32> -> vector<128x128xf32>
    %99 = arith.addf %98, %7 : vector<128x128xf32>
    %cst_62 = arith.constant 0.000000e+00 : f32
    %100 = vector.broadcast %cst_62 : f32 to vector<128x128xf32>
    %101 = arith.maximumf %99, %100 : vector<128x128xf32>
    %102 = arith.maximumf %90, %101 : vector<128x128xf32>
    %c0_63 = arith.constant 0 : index
    %c8 = arith.constant 8 : index
    %c0_64 = arith.constant 0 : index
    %c0_65 = arith.constant 0 : index
    %103 = vector.load %arg2[%c0_63, %c8, %c0_64, %c0_65] : memref<1x16x16x128xbf16, #tpu.memory_space<vmem>>, vector<1x1x16x128xbf16>
    %104 = vector.shape_cast %103 : vector<1x1x16x128xbf16> to vector<16x128xbf16>
    %cst_66 = arith.constant dense<0.000000e+00> : vector<64x128xf32>
    %105 = tpu.matmul %0, %104, %cst_66 {dimension_numbers = #tpu.dot_dimension_numbers<[1], [0], [0], [1], [0, 0, 1, 1], [], []>} : vector<64x16xbf16>, vector<16x128xbf16>, vector<64x128xf32> -> vector<64x128xf32>
    %106 = arith.addf %105, %4 : vector<64x128xf32>
    %cst_67 = arith.constant 0.000000e+00 : f32
    %107 = vector.broadcast %cst_67 : f32 to vector<64x128xf32>
    %108 = arith.maximumf %106, %107 : vector<64x128xf32>
    %109 = arith.truncf %108 : vector<64x128xf32> to vector<64x128xbf16>
    %cst_68 = arith.constant dense<0.000000e+00> : vector<128x128xf32>
    %110 = tpu.matmul %1, %109, %cst_68 {dimension_numbers = #tpu.dot_dimension_numbers<[1], [0], [0], [1], [0, 0, 1, 1], [], []>} : vector<128x64xbf16>, vector<64x128xbf16>, vector<128x128xf32> -> vector<128x128xf32>
    %111 = arith.addf %110, %7 : vector<128x128xf32>
    %cst_69 = arith.constant 0.000000e+00 : f32
    %112 = vector.broadcast %cst_69 : f32 to vector<128x128xf32>
    %113 = arith.maximumf %111, %112 : vector<128x128xf32>
    %114 = arith.maximumf %102, %113 : vector<128x128xf32>
    %c0_70 = arith.constant 0 : index
    %c9 = arith.constant 9 : index
    %c0_71 = arith.constant 0 : index
    %c0_72 = arith.constant 0 : index
    %115 = vector.load %arg2[%c0_70, %c9, %c0_71, %c0_72] : memref<1x16x16x128xbf16, #tpu.memory_space<vmem>>, vector<1x1x16x128xbf16>
    %116 = vector.shape_cast %115 : vector<1x1x16x128xbf16> to vector<16x128xbf16>
    %cst_73 = arith.constant dense<0.000000e+00> : vector<64x128xf32>
    %117 = tpu.matmul %0, %116, %cst_73 {dimension_numbers = #tpu.dot_dimension_numbers<[1], [0], [0], [1], [0, 0, 1, 1], [], []>} : vector<64x16xbf16>, vector<16x128xbf16>, vector<64x128xf32> -> vector<64x128xf32>
    %118 = arith.addf %117, %4 : vector<64x128xf32>
    %cst_74 = arith.constant 0.000000e+00 : f32
    %119 = vector.broadcast %cst_74 : f32 to vector<64x128xf32>
    %120 = arith.maximumf %118, %119 : vector<64x128xf32>
    %121 = arith.truncf %120 : vector<64x128xf32> to vector<64x128xbf16>
    %cst_75 = arith.constant dense<0.000000e+00> : vector<128x128xf32>
    %122 = tpu.matmul %1, %121, %cst_75 {dimension_numbers = #tpu.dot_dimension_numbers<[1], [0], [0], [1], [0, 0, 1, 1], [], []>} : vector<128x64xbf16>, vector<64x128xbf16>, vector<128x128xf32> -> vector<128x128xf32>
    %123 = arith.addf %122, %7 : vector<128x128xf32>
    %cst_76 = arith.constant 0.000000e+00 : f32
    %124 = vector.broadcast %cst_76 : f32 to vector<128x128xf32>
    %125 = arith.maximumf %123, %124 : vector<128x128xf32>
    %126 = arith.maximumf %114, %125 : vector<128x128xf32>
    %c0_77 = arith.constant 0 : index
    %c10 = arith.constant 10 : index
    %c0_78 = arith.constant 0 : index
    %c0_79 = arith.constant 0 : index
    %127 = vector.load %arg2[%c0_77, %c10, %c0_78, %c0_79] : memref<1x16x16x128xbf16, #tpu.memory_space<vmem>>, vector<1x1x16x128xbf16>
    %128 = vector.shape_cast %127 : vector<1x1x16x128xbf16> to vector<16x128xbf16>
    %cst_80 = arith.constant dense<0.000000e+00> : vector<64x128xf32>
    %129 = tpu.matmul %0, %128, %cst_80 {dimension_numbers = #tpu.dot_dimension_numbers<[1], [0], [0], [1], [0, 0, 1, 1], [], []>} : vector<64x16xbf16>, vector<16x128xbf16>, vector<64x128xf32> -> vector<64x128xf32>
    %130 = arith.addf %129, %4 : vector<64x128xf32>
    %cst_81 = arith.constant 0.000000e+00 : f32
    %131 = vector.broadcast %cst_81 : f32 to vector<64x128xf32>
    %132 = arith.maximumf %130, %131 : vector<64x128xf32>
    %133 = arith.truncf %132 : vector<64x128xf32> to vector<64x128xbf16>
    %cst_82 = arith.constant dense<0.000000e+00> : vector<128x128xf32>
    %134 = tpu.matmul %1, %133, %cst_82 {dimension_numbers = #tpu.dot_dimension_numbers<[1], [0], [0], [1], [0, 0, 1, 1], [], []>} : vector<128x64xbf16>, vector<64x128xbf16>, vector<128x128xf32> -> vector<128x128xf32>
    %135 = arith.addf %134, %7 : vector<128x128xf32>
    %cst_83 = arith.constant 0.000000e+00 : f32
    %136 = vector.broadcast %cst_83 : f32 to vector<128x128xf32>
    %137 = arith.maximumf %135, %136 : vector<128x128xf32>
    %138 = arith.maximumf %126, %137 : vector<128x128xf32>
    %c0_84 = arith.constant 0 : index
    %c11 = arith.constant 11 : index
    %c0_85 = arith.constant 0 : index
    %c0_86 = arith.constant 0 : index
    %139 = vector.load %arg2[%c0_84, %c11, %c0_85, %c0_86] : memref<1x16x16x128xbf16, #tpu.memory_space<vmem>>, vector<1x1x16x128xbf16>
    %140 = vector.shape_cast %139 : vector<1x1x16x128xbf16> to vector<16x128xbf16>
    %cst_87 = arith.constant dense<0.000000e+00> : vector<64x128xf32>
    %141 = tpu.matmul %0, %140, %cst_87 {dimension_numbers = #tpu.dot_dimension_numbers<[1], [0], [0], [1], [0, 0, 1, 1], [], []>} : vector<64x16xbf16>, vector<16x128xbf16>, vector<64x128xf32> -> vector<64x128xf32>
    %142 = arith.addf %141, %4 : vector<64x128xf32>
    %cst_88 = arith.constant 0.000000e+00 : f32
    %143 = vector.broadcast %cst_88 : f32 to vector<64x128xf32>
    %144 = arith.maximumf %142, %143 : vector<64x128xf32>
    %145 = arith.truncf %144 : vector<64x128xf32> to vector<64x128xbf16>
    %cst_89 = arith.constant dense<0.000000e+00> : vector<128x128xf32>
    %146 = tpu.matmul %1, %145, %cst_89 {dimension_numbers = #tpu.dot_dimension_numbers<[1], [0], [0], [1], [0, 0, 1, 1], [], []>} : vector<128x64xbf16>, vector<64x128xbf16>, vector<128x128xf32> -> vector<128x128xf32>
    %147 = arith.addf %146, %7 : vector<128x128xf32>
    %cst_90 = arith.constant 0.000000e+00 : f32
    %148 = vector.broadcast %cst_90 : f32 to vector<128x128xf32>
    %149 = arith.maximumf %147, %148 : vector<128x128xf32>
    %150 = arith.maximumf %138, %149 : vector<128x128xf32>
    %c0_91 = arith.constant 0 : index
    %c12 = arith.constant 12 : index
    %c0_92 = arith.constant 0 : index
    %c0_93 = arith.constant 0 : index
    %151 = vector.load %arg2[%c0_91, %c12, %c0_92, %c0_93] : memref<1x16x16x128xbf16, #tpu.memory_space<vmem>>, vector<1x1x16x128xbf16>
    %152 = vector.shape_cast %151 : vector<1x1x16x128xbf16> to vector<16x128xbf16>
    %cst_94 = arith.constant dense<0.000000e+00> : vector<64x128xf32>
    %153 = tpu.matmul %0, %152, %cst_94 {dimension_numbers = #tpu.dot_dimension_numbers<[1], [0], [0], [1], [0, 0, 1, 1], [], []>} : vector<64x16xbf16>, vector<16x128xbf16>, vector<64x128xf32> -> vector<64x128xf32>
    %154 = arith.addf %153, %4 : vector<64x128xf32>
    %cst_95 = arith.constant 0.000000e+00 : f32
    %155 = vector.broadcast %cst_95 : f32 to vector<64x128xf32>
    %156 = arith.maximumf %154, %155 : vector<64x128xf32>
    %157 = arith.truncf %156 : vector<64x128xf32> to vector<64x128xbf16>
    %cst_96 = arith.constant dense<0.000000e+00> : vector<128x128xf32>
    %158 = tpu.matmul %1, %157, %cst_96 {dimension_numbers = #tpu.dot_dimension_numbers<[1], [0], [0], [1], [0, 0, 1, 1], [], []>} : vector<128x64xbf16>, vector<64x128xbf16>, vector<128x128xf32> -> vector<128x128xf32>
    %159 = arith.addf %158, %7 : vector<128x128xf32>
    %cst_97 = arith.constant 0.000000e+00 : f32
    %160 = vector.broadcast %cst_97 : f32 to vector<128x128xf32>
    %161 = arith.maximumf %159, %160 : vector<128x128xf32>
    %162 = arith.maximumf %150, %161 : vector<128x128xf32>
    %c0_98 = arith.constant 0 : index
    %c13 = arith.constant 13 : index
    %c0_99 = arith.constant 0 : index
    %c0_100 = arith.constant 0 : index
    %163 = vector.load %arg2[%c0_98, %c13, %c0_99, %c0_100] : memref<1x16x16x128xbf16, #tpu.memory_space<vmem>>, vector<1x1x16x128xbf16>
    %164 = vector.shape_cast %163 : vector<1x1x16x128xbf16> to vector<16x128xbf16>
    %cst_101 = arith.constant dense<0.000000e+00> : vector<64x128xf32>
    %165 = tpu.matmul %0, %164, %cst_101 {dimension_numbers = #tpu.dot_dimension_numbers<[1], [0], [0], [1], [0, 0, 1, 1], [], []>} : vector<64x16xbf16>, vector<16x128xbf16>, vector<64x128xf32> -> vector<64x128xf32>
    %166 = arith.addf %165, %4 : vector<64x128xf32>
    %cst_102 = arith.constant 0.000000e+00 : f32
    %167 = vector.broadcast %cst_102 : f32 to vector<64x128xf32>
    %168 = arith.maximumf %166, %167 : vector<64x128xf32>
    %169 = arith.truncf %168 : vector<64x128xf32> to vector<64x128xbf16>
    %cst_103 = arith.constant dense<0.000000e+00> : vector<128x128xf32>
    %170 = tpu.matmul %1, %169, %cst_103 {dimension_numbers = #tpu.dot_dimension_numbers<[1], [0], [0], [1], [0, 0, 1, 1], [], []>} : vector<128x64xbf16>, vector<64x128xbf16>, vector<128x128xf32> -> vector<128x128xf32>
    %171 = arith.addf %170, %7 : vector<128x128xf32>
    %cst_104 = arith.constant 0.000000e+00 : f32
    %172 = vector.broadcast %cst_104 : f32 to vector<128x128xf32>
    %173 = arith.maximumf %171, %172 : vector<128x128xf32>
    %174 = arith.maximumf %162, %173 : vector<128x128xf32>
    %c0_105 = arith.constant 0 : index
    %c14 = arith.constant 14 : index
    %c0_106 = arith.constant 0 : index
    %c0_107 = arith.constant 0 : index
    %175 = vector.load %arg2[%c0_105, %c14, %c0_106, %c0_107] : memref<1x16x16x128xbf16, #tpu.memory_space<vmem>>, vector<1x1x16x128xbf16>
    %176 = vector.shape_cast %175 : vector<1x1x16x128xbf16> to vector<16x128xbf16>
    %cst_108 = arith.constant dense<0.000000e+00> : vector<64x128xf32>
    %177 = tpu.matmul %0, %176, %cst_108 {dimension_numbers = #tpu.dot_dimension_numbers<[1], [0], [0], [1], [0, 0, 1, 1], [], []>} : vector<64x16xbf16>, vector<16x128xbf16>, vector<64x128xf32> -> vector<64x128xf32>
    %178 = arith.addf %177, %4 : vector<64x128xf32>
    %cst_109 = arith.constant 0.000000e+00 : f32
    %179 = vector.broadcast %cst_109 : f32 to vector<64x128xf32>
    %180 = arith.maximumf %178, %179 : vector<64x128xf32>
    %181 = arith.truncf %180 : vector<64x128xf32> to vector<64x128xbf16>
    %cst_110 = arith.constant dense<0.000000e+00> : vector<128x128xf32>
    %182 = tpu.matmul %1, %181, %cst_110 {dimension_numbers = #tpu.dot_dimension_numbers<[1], [0], [0], [1], [0, 0, 1, 1], [], []>} : vector<128x64xbf16>, vector<64x128xbf16>, vector<128x128xf32> -> vector<128x128xf32>
    %183 = arith.addf %182, %7 : vector<128x128xf32>
    %cst_111 = arith.constant 0.000000e+00 : f32
    %184 = vector.broadcast %cst_111 : f32 to vector<128x128xf32>
    %185 = arith.maximumf %183, %184 : vector<128x128xf32>
    %186 = arith.maximumf %174, %185 : vector<128x128xf32>
    %c0_112 = arith.constant 0 : index
    %c15 = arith.constant 15 : index
    %c0_113 = arith.constant 0 : index
    %c0_114 = arith.constant 0 : index
    %187 = vector.load %arg2[%c0_112, %c15, %c0_113, %c0_114] : memref<1x16x16x128xbf16, #tpu.memory_space<vmem>>, vector<1x1x16x128xbf16>
    %188 = vector.shape_cast %187 : vector<1x1x16x128xbf16> to vector<16x128xbf16>
    %cst_115 = arith.constant dense<0.000000e+00> : vector<64x128xf32>
    %189 = tpu.matmul %0, %188, %cst_115 {dimension_numbers = #tpu.dot_dimension_numbers<[1], [0], [0], [1], [0, 0, 1, 1], [], []>} : vector<64x16xbf16>, vector<16x128xbf16>, vector<64x128xf32> -> vector<64x128xf32>
    %190 = arith.addf %189, %4 : vector<64x128xf32>
    %cst_116 = arith.constant 0.000000e+00 : f32
    %191 = vector.broadcast %cst_116 : f32 to vector<64x128xf32>
    %192 = arith.maximumf %190, %191 : vector<64x128xf32>
    %193 = arith.truncf %192 : vector<64x128xf32> to vector<64x128xbf16>
    %cst_117 = arith.constant dense<0.000000e+00> : vector<128x128xf32>
    %194 = tpu.matmul %1, %193, %cst_117 {dimension_numbers = #tpu.dot_dimension_numbers<[1], [0], [0], [1], [0, 0, 1, 1], [], []>} : vector<128x64xbf16>, vector<64x128xbf16>, vector<128x128xf32> -> vector<128x128xf32>
    %195 = arith.addf %194, %7 : vector<128x128xf32>
    %cst_118 = arith.constant 0.000000e+00 : f32
    %196 = vector.broadcast %cst_118 : f32 to vector<128x128xf32>
    %197 = arith.maximumf %195, %196 : vector<128x128xf32>
    %198 = arith.maximumf %186, %197 : vector<128x128xf32>
    %199 = tpu.transpose %198, [1, 0] : vector<128x128xf32> -> vector<128x128xf32>
    %c0_119 = arith.constant 0 : index
    %c0_120 = arith.constant 0 : index
    %c0_121 = arith.constant 0 : index
    %200 = vector.load %arg7[%c0_119, %c0_120, %c0_121] : memref<1x128x128xf32, #tpu.memory_space<vmem>>, vector<1x128x128xf32>
    %201 = vector.shape_cast %200 : vector<1x128x128xf32> to vector<128x128xf32>
    %202 = vector.shape_cast %199 : vector<128x128xf32> to vector<1x128x128xf32>
    tpu.vector_store %arg7[%c0_119, %c0_120, %c0_121], %202 {strides = array<i32>} : memref<1x128x128xf32, #tpu.memory_space<vmem>>, vector<1x128x128xf32>,
    return
  }
  func.func @transform_0(%arg0: i32, %arg1: i32) -> (i32, i32, i32, i32) {
    %c0_i32 = arith.constant 0 : i32
    %c0_i32_0 = arith.constant 0 : i32
    %c0_i32_1 = arith.constant 0 : i32
    return %arg0, %c0_i32, %c0_i32_0, %arg1 : i32, i32, i32, i32
  }
  func.func @transform_1(%arg0: i32, %arg1: i32) -> (i32, i32) {
    %c0_i32 = arith.constant 0 : i32
    %c0_i32_0 = arith.constant 0 : i32
    %c0_i32_1 = arith.constant 0 : i32
    return %c0_i32, %c0_i32_0 : i32, i32
  }
  func.func @transform_2(%arg0: i32, %arg1: i32) -> (i32, i32) {
    %c0_i32 = arith.constant 0 : i32
    %c0_i32_0 = arith.constant 0 : i32
    %c0_i32_1 = arith.constant 0 : i32
    return %c0_i32, %c0_i32_0 : i32, i32
  }
  func.func @transform_3(%arg0: i32, %arg1: i32) -> (i32, i32) {
    %c0_i32 = arith.constant 0 : i32
    %c0_i32_0 = arith.constant 0 : i32
    %c0_i32_1 = arith.constant 0 : i32
    return %c0_i32, %c0_i32_0 : i32, i32
  }
  func.func @transform_4(%arg0: i32, %arg1: i32) -> (i32, i32) {
    %c0_i32 = arith.constant 0 : i32
    %c0_i32_0 = arith.constant 0 : i32
    %c0_i32_1 = arith.constant 0 : i32
    return %c0_i32, %c0_i32_0 : i32, i32
  }
  func.func @transform_5(%arg0: i32, %arg1: i32) -> (i32, i32, i32) {
    %c0_i32 = arith.constant 0 : i32
    %c0_i32_0 = arith.constant 0 : i32
    return %arg0, %arg1, %c0_i32 : i32, i32, i32
  }
}

</mosaic_0001>

<bundles_post_ra>
// kernel: custom-call.8
= control target key start
LH: loop header
LB: loop body
LE: loop exit
PB: predicated region body
PF: predicated region fallthrough
CT: control target
= control target key end

     0   :  { %s6_s0 = inlined_call_operand.vmem [shape: f32[2,512], index: 0, kind: output, shape index: {}]  }

// kernel: a_call__.1
= control target key start
LH: loop header
LB: loop body
LE: loop exit
PB: predicated region body
PF: predicated region fallthrough
CT: control target
= control target key end

     0   :  { %10 = vsyncpa [#allocation4], 0  ;;  %s5301_s0 = inlined_call_operand.vmem [shape: bf16[2,16,16,256], index: 0, kind: input, shape index: {}]   ;;  %s5302_s1 = inlined_call_operand.vmem [shape: bf16[64,16], index: 1, kind: input, shape index: {}]   ;;  %s5303_s2 = inlined_call_operand.vmem [shape: f32[64,1], index: 2, kind: input, shape index: {}]   ;;  %s5304_s3 = inlined_call_operand.vmem [shape: bf16[128,64], index: 3, kind: input, shape index: {}]   ;;  %s5305_s4 = inlined_call_operand.vmem [shape: f32[128,1], index: 4, kind: input, shape index: {}]   ;;  %s5306_s5 = inlined_call_operand.hbm [shape: f32[2,256,128], index: 5, kind: output, shape index: {}]  }
   0x1   :  { %12 = vsyncpa [#allocation4 + $0x1], 0  ;;  %s3513_s18 = smov 0   ;;  %s3515_s19 = smov 0  }
   0x2   :  { %s3517_s20 = smov 0   ;;  %s3519_s21 = smov 0  }
   0x3   :  { %s3521_s22 = smov 0   ;;  %s3523_s23 = smov 0  }
   0x4   :  { %s3525_s24 = smov 0   ;;  %s3527_s25 = smov 0  }
   0x5 LB: > { %s2905_s26 = sadd.s32 4294967295, %s3478_s25   ;;  %s2906_s27 = sadd.s32 4294967294, %s3478_s25   ;;  %s3478_s25 = sphi %s3527_s25, %s18_s25   ;;  %s3474_s24 = sphi %s3525_s24, %s5480_s24   ;;  %s3470_s23 = sphi %s3523_s23, %s5479_s23   ;;  %s3466_s22 = sphi %s3521_s22, %s5478_s22   ;;  %s3462_s21 = sphi %s3519_s21, %s5477_s21   ;;  %s3458_s20 = sphi %s3517_s20, %s5476_s20   ;;  %s3454_s19 = sphi %s3515_s19, %s5475_s19   ;;  %s3450_s18 = sphi %s3513_s18, %s5474_s18  }
   0x6   : > { %s27_s28 = sadd.s32 1, %s3470_s23  ;;  %s30_s29 = sadd.s32 1, %s3474_s24 }
   0x7   : > { %p28_p0 = scmp.ge.s32.totalorder %s27_s28, 2  ;;  %p46_p1 = scmp.ne.s32.totalorder %s3458_s20, %s3454_s19 }
   0x8   : > { %p47_p2 = scmp.eq.s32.totalorder %s3478_s25, 0  ;;  %p162_p5 = scmp.eq.s32.totalorder %s2905_s26, 3 }
   0x9   : > { %s5482_s28 = smov (%p28_p0, %s27_s28), 0  ;;  %s5484_s29 = smov (!%p28_p0, %s30_s29), %s3474_s24 }
   0xa   : > { %s35_s30 = ssub.s32 %s3470_s23, %s5482_s28  ;;  %p3565_p3 = por %p47_p2, %p46_p1 }
   0xb   : > { %p32_p4 = scmp.ge.s32.totalorder %s5484_s29, 2  ;;  %p167_p6 = scmp.ne.s32.totalorder %s3454_s19, %s3450_s18 }
   0xc   : > { %p168_p7 = scmp.eq.s32.totalorder %s2906_s27, 3  ;;  %p3573_p8 = por %p162_p5, %p46_p1 }
   0xd   : > { %s5486_s29 = smov (%p32_p4, %s5484_s29), 0  ;;  %s39_s11 = sadd.s32 1, %s3458_s20 }
   0xe   : > { %p3577_p9 = por %p168_p7, %p167_p6  ;;  %s34_s9 = ssub.s32 %s3474_s24, %s5486_s29 }
   0xf   : > { %s36_s10 = sor.u32 %s35_s30, %s34_s9  ;;  %p2908_p11 = scmp.ge.s32.totalorder %s3478_s25, 4 }
  0x10   : > { %p37_p10 = scmp.eq.s32.totalorder %s36_s10, 0 }
  0x11   : > { %196 = sbr.rel (%p2908_p11) target bundleno = 60 (0x3c), region = 32 }
  0x12   : > { %s3585_s12 = scalar_select %p37_p10, %s3458_s20, %s39_s11  }
  0x16   : > { %199 = sbr.rel (!%p3565_p3) target bundleno = 60 (0x3c), region = 36  ;;  %s201_s13 = sand.u32 (%p3565_p3), 1, %s3458_s20  }
  0x17   : > { %s2910_s14 = sshll.u32 (%p3565_p3), %s3474_s24, 6  ;;  %s2909_s15 = sshll.u32 (%p3565_p3), %s201_s13, 7 }
  0x18   : > { %s205_s16 = sadd.s32 (%p3565_p3), %s3470_s23, %s2910_s14  ;;  %s3601_s6 = scalar_lea.vmem (%p3565_p3), [#allocation2], %s2909_s15 }
  0x19   : > { %s2911_s17 = sshll.u32 (%p3565_p3), %s205_s16, 2 }
  0x1a   : > { %s3596_s30 = scalar_lea.vmem (%p3565_p3), %s5301_s0, %s2911_s17 }
  0x1b   : > { %v224_v0 = vld [vmem:[%s3596_s30] sm:$0xf]  ;;  %v226_v1 = vld [vmem:[%s3596_s30 + $0x8] sm:$0xf]  ;;  %v228_v2 = vld [vmem:[%s3596_s30 + $0x10] sm:$0xf] }
  0x1c   : > { %225 = vst [vmem:[%s3601_s6] sm:$0xf] %v224_v0  ;;  %v230_v3 = vld [vmem:[%s3596_s30 + $0x18] sm:$0xf]  ;;  %v232_v4 = vld [vmem:[%s3596_s30 + $0x20] sm:$0xf] }
  0x1d   : > { %227 = vst [vmem:[%s3601_s6 + $0x4] sm:$0xf] %v226_v1  ;;  %v234_v5 = vld [vmem:[%s3596_s30 + $0x28] sm:$0xf]  ;;  %v236_v6 = vld [vmem:[%s3596_s30 + $0x30] sm:$0xf] }
  0x1e   : > { %229 = vst [vmem:[%s3601_s6 + $0x8] sm:$0xf] %v228_v2  ;;  %v238_v7 = vld [vmem:[%s3596_s30 + $0x38] sm:$0xf]  ;;  %v240_v8 = vld [vmem:[%s3596_s30 + $0x40] sm:$0xf] }
  0x1f   : > { %231 = vst [vmem:[%s3601_s6 + $0xc] sm:$0xf] %v230_v3  ;;  %v242_v9 = vld [vmem:[%s3596_s30 + $0x48] sm:$0xf]  ;;  %v244_v10 = vld [vmem:[%s3596_s30 + $0x50] sm:$0xf] }
  0x20   : > { %233 = vst [vmem:[%s3601_s6 + $0x10] sm:$0xf] %v232_v4  ;;  %v246_v11 = vld [vmem:[%s3596_s30 + $0x58] sm:$0xf]  ;;  %v248_v12 = vld [vmem:[%s3596_s30 + $0x60] sm:$0xf] }
  0x21   : > { %235 = vst [vmem:[%s3601_s6 + $0x14] sm:$0xf] %v234_v5  ;;  %v250_v13 = vld [vmem:[%s3596_s30 + $0x68] sm:$0xf]  ;;  %v252_v14 = vld [vmem:[%s3596_s30 + $0x70] sm:$0xf] }
  0x22   : > { %237 = vst [vmem:[%s3601_s6 + $0x18] sm:$0xf] %v236_v6  ;;  %v254_v15 = vld [vmem:[%s3596_s30 + $0x78] sm:$0xf]  ;;  %v256_v16 = vld [vmem:[%s3596_s30 + $0x80] sm:$0xf] }
  0x23   : > { %239 = vst [vmem:[%s3601_s6 + $0x1c] sm:$0xf] %v238_v7  ;;  %v258_v17 = vld [vmem:[%s3596_s30 + $0x88] sm:$0xf]  ;;  %v260_v18 = vld [vmem:[%s3596_s30 + $0x90] sm:$0xf] }
  0x24   : > { %241 = vst [vmem:[%s3601_s6 + $0x20] sm:$0xf] %v240_v8  ;;  %v262_v19 = vld [vmem:[%s3596_s30 + $0x98] sm:$0xf]  ;;  %v264_v20 = vld [vmem:[%s3596_s30 + $0xa0] sm:$0xf] }
  0x25   : > { %243 = vst [vmem:[%s3601_s6 + $0x24] sm:$0xf] %v242_v9  ;;  %v266_v21 = vld [vmem:[%s3596_s30 + $0xa8] sm:$0xf]  ;;  %v268_v22 = vld [vmem:[%s3596_s30 + $0xb0] sm:$0xf] }
  0x26   : > { %245 = vst [vmem:[%s3601_s6 + $0x28] sm:$0xf] %v244_v10  ;;  %v270_v23 = vld [vmem:[%s3596_s30 + $0xb8] sm:$0xf]  ;;  %v272_v24 = vld [vmem:[%s3596_s30 + $0xc0] sm:$0xf] }
  0x27   : > { %247 = vst [vmem:[%s3601_s6 + $0x2c] sm:$0xf] %v246_v11  ;;  %v274_v25 = vld [vmem:[%s3596_s30 + $0xc8] sm:$0xf]  ;;  %v276_v26 = vld [vmem:[%s3596_s30 + $0xd0] sm:$0xf] }
  0x28   : > { %249 = vst [vmem:[%s3601_s6 + $0x30] sm:$0xf] %v248_v12  ;;  %v278_v27 = vld [vmem:[%s3596_s30 + $0xd8] sm:$0xf]  ;;  %v280_v28 = vld [vmem:[%s3596_s30 + $0xe0] sm:$0xf] }
  0x29   : > { %251 = vst [vmem:[%s3601_s6 + $0x34] sm:$0xf] %v250_v13  ;;  %v282_v29 = vld [vmem:[%s3596_s30 + $0xe8] sm:$0xf]  ;;  %v284_v30 = vld [vmem:[%s3596_s30 + $0xf0] sm:$0xf] }
  0x2a   : > { %253 = vst [vmem:[%s3601_s6 + $0x38] sm:$0xf] %v252_v14  ;;  %v286_v31 = vld [vmem:[%s3596_s30 + $0xf8] sm:$0xf] }
  0x2b   : > { %255 = vst [vmem:[%s3601_s6 + $0x3c] sm:$0xf] %v254_v15 }
  0x2c   : > { %257 = vst [vmem:[%s3601_s6 + $0x40] sm:$0xf] %v256_v16 }
  0x2d   : > { %259 = vst [vmem:[%s3601_s6 + $0x44] sm:$0xf] %v258_v17 }
  0x2e   : > { %261 = vst [vmem:[%s3601_s6 + $0x48] sm:$0xf] %v260_v18 }
  0x2f   : > { %263 = vst [vmem:[%s3601_s6 + $0x4c] sm:$0xf] %v262_v19 }
  0x30   : > { %265 = vst [vmem:[%s3601_s6 + $0x50] sm:$0xf] %v264_v20 }
  0x31   : > { %267 = vst [vmem:[%s3601_s6 + $0x54] sm:$0xf] %v266_v21 }
  0x32   : > { %269 = vst [vmem:[%s3601_s6 + $0x58] sm:$0xf] %v268_v22 }
  0x33   : > { %271 = vst [vmem:[%s3601_s6 + $0x5c] sm:$0xf] %v270_v23 }
  0x34   : > { %273 = vst [vmem:[%s3601_s6 + $0x60] sm:$0xf] %v272_v24 }
  0x35   : > { %275 = vst [vmem:[%s3601_s6 + $0x64] sm:$0xf] %v274_v25 }
  0x36   : > { %277 = vst [vmem:[%s3601_s6 + $0x68] sm:$0xf] %v276_v26 }
  0x37   : > { %279 = vst [vmem:[%s3601_s6 + $0x6c] sm:$0xf] %v278_v27 }
  0x38   : > { %281 = vst [vmem:[%s3601_s6 + $0x70] sm:$0xf] %v280_v28 }
  0x39   : > { %283 = vst [vmem:[%s3601_s6 + $0x74] sm:$0xf] %v282_v29 }
  0x3a   : > { %285 = vst [vmem:[%s3601_s6 + $0x78] sm:$0xf] %v284_v30 }
  0x3b   : > { %287 = vst [vmem:[%s3601_s6 + $0x7c] sm:$0xf] %v286_v31 }
  0x3c PF: > { %p2912_p12 = scmp.ge.s32.totalorder %s3478_s25, 1  ;;  %p374_p13 = scmp.lt.s32.totalorder %s3478_s25, 5 }
  0x3e   : > { %p375_p0 = pnand %p2912_p12, %p374_p13 }
  0x40   : > { %378 = sbr.rel (%p375_p0) target bundleno = 2170 (0x87a), region = 77 }
  0x45   : > { %v440_v32 = vld [vmem:[%s5303_s2 + $0x30] sm:$0xff]  ;;  %s5307_s11 = sand.u32 1, %s3454_s19   ;;  %v3480_v33 = vmov 0   ;;  %v438_v34 = vld [vmem:[%s5303_s2 + $0x20] sm:$0xff]  ;;  %vm606_vm0 = vcmask 130048   ;;  %v441_v38 = vld [vmem:[%s5303_s2 + $0x38] sm:$0xff] }
  0x46   : > { %3357 = vset.pattern.permute.xlu0 %v3480_v33  ;;  %s3672_s13 = sshll.u32 %s5307_s11, 7  ;;  %3358 = vset.pattern.permute.xlu1 %v3480_v33  ;;  %v3685_v37 = vld [vmem:[%s5302_s1] sm:$0xff]  ;;  %v439_v39 = vld [vmem:[%s5303_s2 + $0x28] sm:$0xff]  ;;  %v436_v43 = vld [vmem:[%s5303_s2 + $0x10] sm:$0xff]  ;;  %vm700_vm1 = vcmask 523264   ;;  %s3251_s15 = sshll.u32 %s3466_s22, 5 }
  0x47   : > { %474 = vperm.xlu0 %3357, %v440_v32   ;;  %464 = vperm.xlu1 %3358, %v438_v34   ;;  %s3678_s16 = scalar_lea.vmem [#allocation2], %s3672_s13  ;;  %v434_v40 = vld [vmem:[%s5303_s2] sm:$0xff]  ;;  %v435_v41 = vld [vmem:[%s5303_s2 + $0x8] sm:$0xff]  ;;  %v437_v45 = vld [vmem:[%s5303_s2 + $0x18] sm:$0xff]  ;;  %s5237_s14 = scalar_lea.vmem [#allocation3], %s3672_s13 }
  0x48   : > { %v3267_v35 = vld [vmem:[%s3678_s16] sm:$0xff]  ;;  %v3268_v36 = vld [vmem:[%s3678_s16 + $0x8] sm:$0xff]  ;;  %3359 = vset.pattern.permute.xlu2 %v3480_v33  ;;  %v3269_v44 = vld [vmem:[%s3678_s16 + $0x10] sm:$0xff]  ;;  %s3250_s13 = sshll.u32 %s3462_s21, 4  ;;  %s2818_s30 = sshll.u32 %s5237_s14, 4  ;;  %s2819_s30 = int_to_ptr.vmem [resolvable:$true] %s2818_s30 }
  0x49   : > { %626 = vmatpush.bf16.msra.mxu0 %v3267_v35  ;;  %806 = vmatpush.bf16.msra.mxu3 %v3268_v36  ;;  %v3706_v42 = vld [vmem:[%s5302_s1 + $0x8] sm:$0xff]  ;;  %v3722_v46 = vld [vmem:[%s5302_s1 + $0x10] sm:$0xff]  ;;  %v3731_v47 = vld [vmem:[%s5302_s1 + $0x18] sm:$0xff]  ;;  %s2815_s17 = sadd.s32 %s3251_s15, %s3250_s13  ;;  %s5473_s9 = sand.u32 1, %s3454_s19  }
  0x4a   : > { %454 = vperm.xlu2 %3359, %v436_v43   ;;  %v483_v48 = vld [vmem:[%s5305_s4 + $0x8] sm:$0xff]  ;;  %v484_v49 = vld [vmem:[%s5305_s4 + $0x10] sm:$0xff]  ;;  %v486_v50 = vld [vmem:[%s5305_s4 + $0x20] sm:$0xff]  ;;  %s3252_s11 = sshll.u32 %s2815_s17, 3  ;;  %s2804_s21 = scalar_lea.sflag [#allocation4], %s5473_s9 }
  0x4b   : > { %v487_v51 = vld [vmem:[%s5305_s4 + $0x28] sm:$0xff]  ;;  %v489_v52 = vld [vmem:[%s5305_s4 + $0x38] sm:$0xff]  ;;  %v490_v53 = vld [vmem:[%s5305_s4 + $0x40] sm:$0xff]  ;;  %s3404_s17 = scalar_lea.hbm %s5306_s5, 512 }
  0x4c   : > { %2935 = vmatmul.msk.bf16.vlgmr.msra.gmra.mxu0 %vm606_vm0, %v3685_v37  ;;  %2985 = vmatmul.msk.bf16.vlgmr.msra.gmra.mxu3 %vm606_vm0, %v3685_v37  ;;  %v482_v54 = vld [vmem:[%s5305_s4] sm:$0xff]  ;;  %v492_v55 = vld [vmem:[%s5305_s4 + $0x50] sm:$0xff]  ;;  %v493_v56 = vld [vmem:[%s5305_s4 + $0x58] sm:$0xff] }
  0x4d   : > { %937 = vmatpush.bf16.msrb.mxu0 %v3269_v44  ;;  %v485_v57 = vld [vmem:[%s5305_s4 + $0x18] sm:$0xff]  ;;  %v495_v58 = vld [vmem:[%s5305_s4 + $0x68] sm:$0xff]  ;;  %v496_v60 = vld [vmem:[%s5305_s4 + $0x70] sm:$0xff] }
  0x4e   : > { %v3270_v59 = vld [vmem:[%s3678_s16 + $0x18] sm:$0xff]  ;;  %v488_v61 = vld [vmem:[%s5305_s4 + $0x30] sm:$0xff]  ;;  %v491_v62 = vld [vmem:[%s5305_s4 + $0x48] sm:$0xff] }
  0x4f   : > { %479 = vperm.xlu0 %3357, %v441_v38   ;;  %469 = vperm.xlu1 %3358, %v439_v39   ;;  %v494_v63 = vld [vmem:[%s5305_s4 + $0x60] sm:$0xff]  ;;  %v497_v0 = vld [vmem:[%s5305_s4 + $0x78] sm:$0xff] }
  0x51   : > { %1068 = vmatpush.bf16.msra.mxu0 %v3270_v59 }
  0x52   : > { %459 = vperm.xlu2 %3359, %v437_v45  }
  0x57   : > { %444 = vperm.xlu0 %3357, %v434_v40   ;;  %449 = vperm.xlu1 %3358, %v435_v41  }
  0x5a   : > { %500 = vperm.xlu2 %3359, %v482_v54  }
  0x5c   : > { %2936 = vmatmul.msk.bf16.gmra.mxu0 %vm606_vm0, %v3706_v42  ;;  %2986 = vmatmul.msk.bf16.gmra.mxu3 %vm606_vm0, %v3706_v42 }
  0x5f   : > { %505 = vperm.xlu0 %3357, %v483_v48   ;;  %510 = vperm.xlu1 %3358, %v484_v49  }
  0x62   : > { %515 = vperm.xlu2 %3359, %v485_v57  }
  0x67   : > { %520 = vperm.xlu0 %3357, %v486_v50   ;;  %525 = vperm.xlu1 %3358, %v487_v51  }
  0x6a   : > { %530 = vperm.xlu2 %3359, %v488_v61  }
  0x6c   : > { %2937 = vmatmul.msk.bf16.gmra.mxu0 %vm606_vm0, %v3722_v46  ;;  %2987 = vmatmul.msk.bf16.gmra.mxu3 %vm606_vm0, %v3722_v46 }
  0x6f   : > { %535 = vperm.xlu0 %3357, %v489_v52   ;;  %540 = vperm.xlu1 %3358, %v490_v53  }
  0x72   : > { %545 = vperm.xlu2 %3359, %v491_v62  }
  0x77   : > { %550 = vperm.xlu0 %3357, %v492_v55   ;;  %555 = vperm.xlu1 %3358, %v493_v56  }
  0x7a   : > { %560 = vperm.xlu2 %3359, %v494_v63  }
  0x7c   : > { %2938 = vmatmul.msk.bf16.gmra.mxu0 %vm606_vm0, %v3731_v47  ;;  %2988 = vmatmul.msk.bf16.gmra.mxu3 %vm606_vm0, %v3731_v47 }
  0x7f   : > { %565 = vperm.xlu0 %3357, %v495_v58   ;;  %570 = vperm.xlu1 %3358, %v496_v60  }
  0x82   : > { %575 = vperm.xlu2 %3359, %v497_v0  }
  0x8c   : > { %3003 = vmatmul.msk.bf16.vlgmr.msrb.gmra.mxu0 %vm606_vm0, %v3685_v37 }
  0x9c   : > { %3004 = vmatmul.msk.bf16.gmra.mxu0 %vm606_vm0, %v3706_v42 }
  0xa4   : > { %v3804_v15 = vpop.permute.xlu2 %454 }
  0xac   : > { %3005 = vmatmul.msk.bf16.gmra.mxu0 %vm606_vm0, %v3722_v46  ;;  %v3813_v22 = vpop.permute.xlu2 %459 }
  0xb9   : > { %v3800_v12 = vpop.permute.xlu1 %464  ;;  %v3802_v13 = vpop.permute.xlu0 %474 }
  0xbc   : > { %3006 = vmatmul.msk.bf16.gmra.mxu0 %vm606_vm0, %v3731_v47 }
  0xc1   : > { %v3806_v17 = vpop.permute.xlu1 %469  ;;  %v3810_v18 = vpop.permute.xlu0 %479 }
  0xc9   : > { %v628_v1 = vpop.f32.mrf.mxu0  ;;  %v3820_v30 = vpop.permute.xlu1 %449 }
  0xca   : > { %v3826_v41 = vpop.permute.xlu0 %444 }
  0xcb   : > { %v629_v54 = vadd.f32 %v628_v1, %v3826_v41 }
  0xcc   : > { %3021 = vmatmul.msk.bf16.vlgmr.msra.gmra.mxu0 %vm606_vm0, %v3685_v37 }
  0xcd   : > { %v648_v0 = vmax.f32 %v629_v54, 0.0  ;;  %v3895_v54 = vld [vmem:[%s5304_s3 + $0x28] sm:$0xff] }
  0xcf   : > { %v808_v2 = vpop.f32.mrf.mxu3 }
  0xd0   : > { %v809_v57 = vadd.f32 %v808_v2, %v3826_v41  ;;  %v3839_v2 = vld [vmem:[%s5304_s3] sm:$0xff] }
  0xd1   : > { %v630_v3 = vpop.f32.mrf.mxu0 }
  0xd2   : > { %v631_v43 = vadd.f32 %v630_v3, %v3820_v30 }
  0xd4   : > { %v649_v58 = vmax.f32 %v631_v43, 0.0 }
  0xd6   : > { %v656_v1 = vpack.c.bf16 %v649_v58, %v648_v0  ;;  %v3271_v58 = vld [vmem:[%s3678_s16 + $0x20] sm:$0xff]  ;;  %v3921_v0 = vld [vmem:[%s5304_s3 + $0x38] sm:$0xff] }
  0xd7   : > { %v810_v4 = vpop.f32.mrf.mxu3 }
  0xd8   : > { %v811_v59 = vadd.f32 %v810_v4, %v3820_v30 }
  0xd9   : > { %v633_v5 = vpop.f32.mrf.mxu0 }
  0xda   : > { %v634_v36 = vadd.f32 %v633_v5, %v3804_v15  ;;  %v828_v5 = vmax.f32 %v809_v57, 0.0  ;;  %v3906_v57 = vld [vmem:[%s5304_s3 + $0x30] sm:$0xff] }
  0xdc   : > { %3022 = vmatmul.msk.bf16.gmra.mxu0 %vm606_vm0, %v3706_v42  ;;  %v650_v55 = vmax.f32 %v634_v36, 0.0 }
  0xdf   : > { %v813_v6 = vpop.f32.mrf.mxu3 }
  0xe0   : > { %v814_v44 = vadd.f32 %v813_v6, %v3804_v15  ;;  %v829_v6 = vmax.f32 %v811_v59, 0.0 }
  0xe1   : > { %v635_v7 = vpop.f32.mrf.mxu0 }
  0xe2   : > { %v636_v29 = vadd.f32 %v635_v7, %v3813_v22  ;;  %v830_v60 = vmax.f32 %v814_v44, 0.0  ;;  %v836_v4 = vpack.c.bf16 %v829_v6, %v828_v5 }
  0xe4   : > { %v651_v45 = vmax.f32 %v636_v29, 0.0 }
  0xe6   : > { %v657_v62 = vpack.c.bf16 %v651_v45, %v650_v55 }
  0xe7   : > { %v815_v8 = vpop.f32.mrf.mxu3 }
  0xe8   : > { %v816_v48 = vadd.f32 %v815_v8, %v3813_v22 }
  0xe9   : > { %v638_v9 = vpop.f32.mrf.mxu0 }
  0xea   : > { %v639_v25 = vadd.f32 %v638_v9, %v3800_v12  ;;  %v831_v61 = vmax.f32 %v816_v48, 0.0 }
  0xec   : > { %3023 = vmatmul.msk.bf16.gmra.mxu0 %vm606_vm0, %v3722_v46  ;;  %v652_v38 = vmax.f32 %v639_v25, 0.0  ;;  %v837_v7 = vpack.c.bf16 %v831_v61, %v830_v60  ;;  %v3869_v25 = vld [vmem:[%s5304_s3 + $0x18] sm:$0xff] }
  0xef   : > { %v818_v10 = vpop.f32.mrf.mxu3 }
  0xf0   : > { %v819_v31 = vadd.f32 %v818_v10, %v3800_v12  ;;  %v3848_v10 = vld [vmem:[%s5304_s3 + $0x8] sm:$0xff] }
  0xf1   : > { %v640_v11 = vpop.f32.mrf.mxu0 }
  0xf2   : > { %v641_v23 = vadd.f32 %v640_v11, %v3806_v17  ;;  %v832_v50 = vmax.f32 %v819_v31, 0.0 }
  0xf4   : > { %v653_v32 = vmax.f32 %v641_v23, 0.0 }
  0xf6   : > { %v658_v53 = vpack.c.bf16 %v653_v32, %v652_v38 }
  0xf7   : > { %v820_v14 = vpop.f32.mrf.mxu3 }
  0xf8   : > { %v821_v33 = vadd.f32 %v820_v14, %v3806_v17 }
  0xf9   : > { %v643_v16 = vpop.f32.mrf.mxu0 }
  0xfa   : > { %v644_v20 = vadd.f32 %v643_v16, %v3802_v13  ;;  %v833_v51 = vmax.f32 %v821_v33, 0.0  ;;  %v3857_v16 = vld [vmem:[%s5304_s3 + $0x10] sm:$0xff] }
  0xfc   : > { %3024 = vmatmul.msk.bf16.gmra.mxu0 %vm606_vm0, %v3731_v47  ;;  %v654_v26 = vmax.f32 %v644_v20, 0.0  ;;  %v838_v63 = vpack.c.bf16 %v833_v51, %v832_v50 }
  0xff   : > { %v823_v19 = vpop.f32.mrf.mxu3 }
 0x100   : > { %v824_v27 = vadd.f32 %v823_v19, %v3802_v13 }
 0x101   : > { %v645_v21 = vpop.f32.mrf.mxu0 }
 0x102   : > { %v646_v24 = vadd.f32 %v645_v21, %v3810_v18  ;;  %v834_v39 = vmax.f32 %v824_v27, 0.0 }
 0x104   : > { %v655_v28 = vmax.f32 %v646_v24, 0.0 }
 0x106   : > { %v659_v34 = vpack.c.bf16 %v655_v28, %v654_v26 }
 0x107   : > { %v825_v35 = vpop.f32.mrf.mxu3 }
 0x108   : > { %v826_v40 = vadd.f32 %v825_v35, %v3810_v18  ;;  %729 = vmatpush.bf16.msra.mxu1 %v659_v34 }
 0x109   : > { %v3831_v49 = vpop.f32.mrf.mxu0 }
 0x10a   : > { %v835_v52 = vmax.f32 %v826_v40, 0.0  ;;  %v940_v40 = vadd.f32 %v3831_v49, %v3826_v41 }
 0x10c   : > { %730 = vmatpush.bf16.msra.mxu1 %v658_v53  ;;  %v839_v56 = vpack.c.bf16 %v835_v52, %v834_v39  ;;  %v959_v48 = vmax.f32 %v940_v40, 0.0  ;;  %v3884_v52 = vld [vmem:[%s5304_s3 + $0x20] sm:$0xff] }
 0x10e   : > { %844 = vmatpush.bf16.msrb.mxu3 %v839_v56 }
 0x110   : > { %731 = vmatpush.bf16.msra.mxu1 %v657_v62 }
 0x111   : > { %v941_v3 = vpop.f32.mrf.mxu0 }
 0x112   : > { %845 = vmatpush.bf16.msrb.mxu3 %v838_v63  ;;  %v942_v36 = vadd.f32 %v941_v3, %v3820_v30 }
 0x114   : > { %732 = vmatpush.bf16.msra.mxu1 %v656_v1  ;;  %v960_v44 = vmax.f32 %v942_v36, 0.0 }
 0x116   : > { %846 = vmatpush.bf16.msrb.mxu3 %v837_v7  ;;  %v967_v51 = vpack.c.bf16 %v960_v44, %v959_v48  ;;  %v3272_v44 = vld [vmem:[%s3678_s16 + $0x28] sm:$0xff] }
 0x117   : > { %2971 = vmatmul.msk.bf16.vlgmr.msra.gmra.mxu1 %vm700_vm1, %v3839_v2 }
 0x119   : > { %v944_v8 = vpop.f32.mrf.mxu0 }
 0x11a   : > { %847 = vmatpush.bf16.msrb.mxu3 %v836_v4  ;;  %v945_v33 = vadd.f32 %v944_v8, %v3804_v15 }
 0x11c   : > { %v961_v43 = vmax.f32 %v945_v33, 0.0 }
 0x11d   : > { %2989 = vmatmul.msk.bf16.vlgmr.msrb.gmra.mxu3 %vm700_vm1, %v3839_v2 }
 0x11e   : > { %1199 = vmatpush.bf16.msra.mxu3 %v3271_v58 }
 0x121   : > { %v946_v9 = vpop.f32.mrf.mxu0 }
 0x122   : > { %v947_v29 = vadd.f32 %v946_v9, %v3813_v22 }
 0x124   : > { %v962_v38 = vmax.f32 %v947_v29, 0.0 }
 0x126   : > { %v968_v45 = vpack.c.bf16 %v962_v38, %v961_v43 }
 0x127   : > { %2972 = vmatmul.msk.bf16.gmra.mxu1 %vm700_vm1, %v3848_v10 }
 0x129   : > { %v949_v11 = vpop.f32.mrf.mxu0 }
 0x12a   : > { %v950_v26 = vadd.f32 %v949_v11, %v3800_v12 }
 0x12c   : > { %v963_v34 = vmax.f32 %v950_v26, 0.0 }
 0x12d   : > { %2990 = vmatmul.msk.bf16.gmra.mxu3 %vm700_vm1, %v3848_v10 }
 0x131   : > { %v951_v14 = vpop.f32.mrf.mxu0 }
 0x132   : > { %v952_v23 = vadd.f32 %v951_v14, %v3806_v17 }
 0x134   : > { %v964_v31 = vmax.f32 %v952_v23, 0.0 }
 0x136   : > { %v969_v39 = vpack.c.bf16 %v964_v31, %v963_v34  ;;  %v3942_v31 = vpop.permute.xlu2 %500 }
 0x137   : > { %2973 = vmatmul.msk.bf16.gmra.mxu1 %vm700_vm1, %v3857_v16 }
 0x139   : > { %v954_v19 = vpop.f32.mrf.mxu0 }
 0x13a   : > { %v955_v20 = vadd.f32 %v954_v19, %v3802_v13 }
 0x13c   : > { %v965_v27 = vmax.f32 %v955_v20, 0.0 }
 0x13d   : > { %2991 = vmatmul.msk.bf16.gmra.mxu3 %vm700_vm1, %v3857_v16 }
 0x141   : > { %v956_v21 = vpop.f32.mrf.mxu0 }
 0x142   : > { %v957_v24 = vadd.f32 %v956_v21, %v3810_v18 }
 0x144   : > { %v966_v28 = vmax.f32 %v957_v24, 0.0 }
 0x146   : > { %v970_v32 = vpack.c.bf16 %v966_v28, %v965_v27 }
 0x147   : > { %2974 = vmatmul.msk.bf16.gmra.mxu1 %vm700_vm1, %v3869_v25 }
 0x148   : > { %975 = vmatpush.bf16.msra.mxu2 %v970_v32 }
 0x149   : > { %v1070_v35 = vpop.f32.mrf.mxu0 }
 0x14a   : > { %v1071_v20 = vadd.f32 %v1070_v35, %v3826_v41 }
 0x14c   : > { %976 = vmatpush.bf16.msra.mxu2 %v969_v39  ;;  %v1090_v26 = vmax.f32 %v1071_v20, 0.0 }
 0x14d   : > { %2992 = vmatmul.msk.bf16.gmra.mxu3 %vm700_vm1, %v3869_v25 }
 0x150   : > { %977 = vmatpush.bf16.msra.mxu2 %v968_v45  ;;  %v3955_v45 = vpop.permute.xlu1 %510 }
 0x151   : > { %v1072_v50 = vpop.f32.mrf.mxu0 }
 0x152   : > { %v1073_v11 = vadd.f32 %v1072_v50, %v3820_v30 }
 0x154   : > { %978 = vmatpush.bf16.msra.mxu2 %v967_v51  ;;  %v1091_v23 = vmax.f32 %v1073_v11, 0.0 }
 0x156   : > { %v1098_v27 = vpack.c.bf16 %v1091_v23, %v1090_v26 }
 0x157   : > { %2975 = vmatmul.msk.bf16.gmra.mxu1 %vm700_vm1, %v3884_v52  ;;  %3007 = vmatmul.msk.bf16.vlgmr.msra.gmra.mxu2 %vm700_vm1, %v3839_v2 }
 0x158   : > { %1330 = vmatpush.bf16.msrb.mxu2 %v3272_v44 }
 0x159   : > { %v1075_v49 = vpop.f32.mrf.mxu0 }
 0x15a   : > { %v1076_v8 = vadd.f32 %v1075_v49, %v3804_v15 }
 0x15c   : > { %v1092_v21 = vmax.f32 %v1076_v8, 0.0 }
 0x15d   : > { %2993 = vmatmul.msk.bf16.gmra.mxu3 %vm700_vm1, %v3884_v52 }
 0x161   : > { %v1077_v53 = vpop.f32.mrf.mxu0 }
 0x162   : > { %v1078_v1 = vadd.f32 %v1077_v53, %v3813_v22 }
 0x164   : > { %v1093_v14 = vmax.f32 %v1078_v1, 0.0  ;;  %v3975_v1 = vpop.permute.xlu2 %515 }
 0x165   : > { %5319 = vst [vmem:[#allocation6_spill] sm:$0xff] %v3975_v1 }
 0x166   : > { %v1099_v24 = vpack.c.bf16 %v1093_v14, %v1092_v21 }
 0x167   : > { %2976 = vmatmul.msk.bf16.gmra.mxu1 %vm700_vm1, %v3895_v54  ;;  %3008 = vmatmul.msk.bf16.gmra.mxu2 %vm700_vm1, %v3848_v10 }
 0x169   : > { %v1080_v55 = vpop.f32.mrf.mxu0 }
 0x16a   : > { %v1081_v3 = vadd.f32 %v1080_v55, %v3800_v12  ;;  %v3959_v55 = vpop.permute.xlu0 %505 }
 0x16c   : > { %v1094_v9 = vmax.f32 %v1081_v3, 0.0  ;;  %v3989_v11 = vpop.permute.xlu2 %530 }
 0x16d   : > { %2994 = vmatmul.msk.bf16.gmra.mxu3 %vm700_vm1, %v3895_v54 }
 0x171   : > { %v1082_v56 = vpop.f32.mrf.mxu0 }
 0x172   : > { %v1083_v62 = vadd.f32 %v1082_v56, %v3806_v17 }
 0x174   : > { %v1095_v7 = vmax.f32 %v1083_v62, 0.0 }
 0x176   : > { %v1100_v19 = vpack.c.bf16 %v1095_v7, %v1094_v9 }
 0x177   : > { %2977 = vmatmul.msk.bf16.gmra.mxu1 %vm700_vm1, %v3906_v57  ;;  %3009 = vmatmul.msk.bf16.gmra.mxu2 %vm700_vm1, %v3857_v16 }
 0x179   : > { %v1085_v59 = vpop.f32.mrf.mxu0 }
 0x17a   : > { %v1086_v60 = vadd.f32 %v1085_v59, %v3802_v13 }
 0x17c   : > { %v1096_v5 = vmax.f32 %v1086_v60, 0.0 }
 0x17d   : > { %2995 = vmatmul.msk.bf16.gmra.mxu3 %vm700_vm1, %v3906_v57 }
 0x181   : > { %v1087_v61 = vpop.f32.mrf.mxu0 }
 0x182   : > { %v1088_v63 = vadd.f32 %v1087_v61, %v3810_v18  ;;  %v3971_v61 = vpop.permute.xlu0 %520 }
 0x184   : > { %v1097_v6 = vmax.f32 %v1088_v63, 0.0 }
 0x186   : > { %v1101_v4 = vpack.c.bf16 %v1097_v6, %v1096_v5 }
 0x187   : > { %2978 = vmatmul.msk.bf16.gmra.mxu1 %vm700_vm1, %v3921_v0  ;;  %3010 = vmatmul.msk.bf16.gmra.mxu2 %vm700_vm1, %v3869_v25 }
 0x188   : > { %1106 = vmatpush.bf16.msrb.mxu1 %v1101_v4 }
 0x18c   : > { %1107 = vmatpush.bf16.msrb.mxu1 %v1100_v19 }
 0x18d   : > { %2996 = vmatmul.msk.bf16.gmra.mxu3 %vm700_vm1, %v3921_v0 }
 0x190   : > { %1108 = vmatpush.bf16.msrb.mxu1 %v1099_v24  ;;  %v3993_v24 = vpop.permute.xlu1 %525 }
 0x191   : > { %5320 = vst [vmem:[#allocation7_spill] sm:$0xff] %v3993_v24 }
 0x194   : > { %v734_v28 = vpop.f32.mrf.mxu1  ;;  %1109 = vmatpush.bf16.msrb.mxu1 %v1098_v27 }
 0x195   : > { %v735_v32 = vadd.f32 %v734_v28, %v3942_v31 }
 0x197   : > { %3011 = vmatmul.msk.bf16.gmra.mxu2 %vm700_vm1, %v3884_v52  ;;  %3025 = vmatmul.msk.bf16.vlgmr.msrb.gmra.mxu1 %vm700_vm1, %v3839_v2  ;;  %v774_v35 = vmax.f32 %v735_v32, 0.0 }
 0x19c   : > { %v3938_v29 = vpop.f32.mrf.mxu1 }
 0x19d   : > { %3039 = vmatmul.msk.bf16.vlgmr.msra.gmra.mxu3 %vm606_vm0, %v3685_v37  ;;  %v737_v44 = vadd.f32 %v3938_v29, %v3959_v55 }
 0x1a0   : > { %v849_v33 = vpop.f32.mrf.mxu3 }
 0x1a1   : > { %v850_v34 = vadd.f32 %v849_v33, %v3942_v31 }
 0x1a3   : > { %v889_v36 = vmax.f32 %v850_v34, 0.0 }
 0x1a4   : > { %v739_v38 = vpop.f32.mrf.mxu1 }
 0x1a5   : > { %v905_v39 = vmax.f32 %v774_v35, %v889_v36  ;;  %v740_v48 = vadd.f32 %v739_v38, %v3955_v45  ;;  %v4007_v38 = vpop.permute.xlu1 %540 }
 0x1a7   : > { %3012 = vmatmul.msk.bf16.gmra.mxu2 %vm700_vm1, %v3895_v54  ;;  %3026 = vmatmul.msk.bf16.gmra.mxu1 %vm700_vm1, %v3848_v10  ;;  %v776_v49 = vmax.f32 %v740_v48, 0.0 }
 0x1a8   : > { %v851_v40 = vpop.f32.mrf.mxu3 }
 0x1a9   : > { %v852_v35 = vadd.f32 %v851_v40, %v3959_v55 }
 0x1ac   : > { %v3950_v43 = vpop.f32.mrf.mxu1 }
 0x1ad   : > { %3040 = vmatmul.msk.bf16.gmra.mxu3 %vm606_vm0, %v3706_v42 }
 0x1b0   : > { %v854_v50 = vpop.f32.mrf.mxu3 }
 0x1b1   : > { %v855_v51 = vadd.f32 %v854_v50, %v3955_v45 }
 0x1b3   : > { %v891_v53 = vmax.f32 %v855_v51, 0.0 }
 0x1b4   : > { %v744_v56 = vpop.f32.mrf.mxu1 }
 0x1b5   : > { %v3961_v58 = vmax.f32 %v776_v49, %v891_v53  ;;  %v745_v62 = vadd.f32 %v744_v56, %v3971_v61  ;;  %v890_v49 = vmax.f32 %v852_v35, 0.0  ;;  %v742_v35 = vadd.f32 %v3950_v43, %v3975_v1 }
 0x1b7   : > { %3013 = vmatmul.msk.bf16.gmra.mxu2 %vm700_vm1, %v3906_v57  ;;  %3027 = vmatmul.msk.bf16.gmra.mxu1 %vm700_vm1, %v3857_v16  ;;  %v778_v5 = vmax.f32 %v745_v62, 0.0  ;;  %v775_v62 = vmax.f32 %v737_v44, 0.0 }
 0x1b8   : > { %v856_v59 = vpop.f32.mrf.mxu3 }
 0x1bc   : > { %v3967_v60 = vpop.f32.mrf.mxu1 }
 0x1bd   : > { %3041 = vmatmul.msk.bf16.gmra.mxu3 %vm606_vm0, %v3722_v46 }
 0x1c0   : > { %v859_v63 = vpop.f32.mrf.mxu3 }
 0x1c1   : > { %v860_v3 = vadd.f32 %v859_v63, %v3971_v61 }
 0x1c3   : > { %v893_v6 = vmax.f32 %v860_v3, 0.0 }
 0x1c4   : > { %v749_v7 = vpop.f32.mrf.mxu1 }
 0x1c5   : > { %v3977_v4 = vmax.f32 %v778_v5, %v893_v6  ;;  %v750_v14 = vadd.f32 %v749_v7, %v3989_v11  ;;  %v4016_v5 = vpop.permute.xlu0 %535  ;;  %v906_v7 = vmax.f32 %v775_v62, %v890_v49  ;;  %v777_v62 = vmax.f32 %v742_v35, 0.0 }
 0x1c6   : > { %5322 = vst [vmem:[#allocation9_spill] sm:$0xff] %v4016_v5 }
 0x1c7   : > { %3014 = vmatmul.msk.bf16.gmra.mxu2 %vm700_vm1, %v3921_v0  ;;  %3028 = vmatmul.msk.bf16.gmra.mxu1 %vm700_vm1, %v3869_v25  ;;  %v780_v21 = vmax.f32 %v750_v14, 0.0 }
 0x1c8   : > { %v3983_v8 = vpop.f32.mrf.mxu3 }
 0x1c9   : > { %v862_v35 = vadd.f32 %v3983_v8, %v3993_v24 }
 0x1cc   : > { %v3985_v9 = vpop.f32.mrf.mxu1 }
 0x1cd   : > { %3042 = vmatmul.msk.bf16.gmra.mxu3 %vm606_vm0, %v3731_v47 }
 0x1d0   : > { %v864_v19 = vpop.f32.mrf.mxu3 }
 0x1d1   : > { %v865_v20 = vadd.f32 %v864_v19, %v3989_v11 }
 0x1d3   : > { %v895_v23 = vmax.f32 %v865_v20, 0.0 }
 0x1d4   : > { %v754_v26 = vpop.f32.mrf.mxu1 }
 0x1d5   : > { %v3995_v27 = vmax.f32 %v780_v21, %v895_v23  ;;  %v755_v48 = vadd.f32 %v754_v26, %v4007_v38  ;;  %v857_v26 = vadd.f32 %v856_v59, %v3975_v1 }
 0x1d7   : > { %3029 = vmatmul.msk.bf16.gmra.mxu1 %vm700_vm1, %v3884_v52  ;;  %3057 = vmatmul.msk.bf16.vlgmr.msrb.gmra.mxu2 %vm606_vm0, %v3685_v37  ;;  %v782_v63 = vmax.f32 %v755_v48, 0.0 }
 0x1d8   : > { %v4001_v28 = vpop.f32.mrf.mxu3 }
 0x1da   : > { %v980_v32 = vpop.f32.mrf.mxu2 }
 0x1db   : > { %v981_v33 = vadd.f32 %v980_v32, %v3942_v31 }
 0x1dc   : > { %v4004_v34 = vpop.f32.mrf.mxu1 }
 0x1dd   : > { %5321 = vst [vmem:[#allocation8_spill] sm:$0xff] %v4004_v34  ;;  %v1020_v36 = vmax.f32 %v981_v33, 0.0  ;;  %v4032_v33 = vpop.permute.xlu0 %550 }
 0x1df   : > { %v4012_v50 = vmax.f32 %v905_v39, %v1020_v36 }
 0x1e0   : > { %v869_v51 = vpop.f32.mrf.mxu3 }
 0x1e1   : > { %v870_v53 = vadd.f32 %v869_v51, %v4007_v38  ;;  %v892_v51 = vmax.f32 %v857_v26, 0.0 }
 0x1e2   : > { %v982_v56 = vpop.f32.mrf.mxu2 }
 0x1e3   : > { %v897_v3 = vmax.f32 %v870_v53, 0.0  ;;  %v983_v40 = vadd.f32 %v982_v56, %v3959_v55  ;;  %v3273_v56 = vld [vmem:[%s3678_s16 + $0x30] sm:$0xff]  ;;  %v908_v43 = vmax.f32 %v777_v62, %v892_v51  ;;  %v747_v51 = vadd.f32 %v3967_v60, %v3993_v24 }
 0x1e4   : > { %v759_v6 = vpop.f32.mrf.mxu1  ;;  %1461 = vmatpush.bf16.msra.mxu2 %v3273_v56  ;;  %v894_v62 = vmax.f32 %v862_v35, 0.0 }
 0x1e5   : > { %v4018_v14 = vmax.f32 %v782_v63, %v897_v3  ;;  %v1021_v29 = vmax.f32 %v983_v40, 0.0  ;;  %v760_v36 = vadd.f32 %v759_v6, %v4032_v33  ;;  %v4043_v40 = vpop.permute.xlu2 %545 }
 0x1e6   : > { %5325 = vst [vmem:[#allocation12_spill] sm:$0xff] %v4043_v40 }
 0x1e7   : > { %v4020_v19 = vmax.f32 %v906_v7, %v1021_v29  ;;  %3030 = vmatmul.msk.bf16.gmra.mxu1 %vm700_vm1, %v3895_v54  ;;  %3058 = vmatmul.msk.bf16.gmra.mxu2 %vm606_vm0, %v3706_v42  ;;  %v784_v63 = vmax.f32 %v760_v36, 0.0 }
 0x1e8   : > { %v4026_v39 = vpop.f32.mrf.mxu3 }
 0x1e9   : > { %5323 = vst [vmem:[#allocation10_spill] sm:$0xff] %v4026_v39 }
 0x1ea   : > { %v985_v20 = vpop.f32.mrf.mxu2 }
 0x1eb   : > { %v986_v21 = vadd.f32 %v985_v20, %v3955_v45 }
 0x1ec   : > { %v4029_v23 = vpop.f32.mrf.mxu1 }
 0x1ed   : > { %5324 = vst [vmem:[#allocation11_spill] sm:$0xff] %v4029_v23  ;;  %v1022_v32 = vmax.f32 %v986_v21, 0.0 }
 0x1ef   : > { %v4038_v44 = vmax.f32 %v3961_v58, %v1022_v32 }
 0x1f0   : > { %v874_v48 = vpop.f32.mrf.mxu3 }
 0x1f1   : > { %v875_v49 = vadd.f32 %v874_v48, %v4032_v33  ;;  %v4060_v48 = vpop.permute.xlu2 %560 }
 0x1f2   : > { %v987_v53 = vpop.f32.mrf.mxu2 }
 0x1f3   : > { %v899_v59 = vmax.f32 %v875_v49, 0.0  ;;  %v988_v3 = vadd.f32 %v987_v53, %v3975_v1 }
 0x1f4   : > { %v764_v7 = vpop.f32.mrf.mxu1 }
 0x1f5   : > { %v4045_v6 = vmax.f32 %v784_v63, %v899_v59  ;;  %v1023_v58 = vmax.f32 %v988_v3, 0.0  ;;  %v765_v49 = vadd.f32 %v764_v7, %v4060_v48  ;;  %v779_v3 = vmax.f32 %v747_v51, 0.0 }
 0x1f7   : > { %v4047_v29 = vmax.f32 %v908_v43, %v1023_v58  ;;  %3031 = vmatmul.msk.bf16.gmra.mxu1 %vm700_vm1, %v3906_v57  ;;  %3059 = vmatmul.msk.bf16.gmra.mxu2 %vm606_vm0, %v3722_v46  ;;  %v786_v43 = vmax.f32 %v765_v49, 0.0  ;;  %v867_v49 = vadd.f32 %v4001_v28, %v4016_v5 }
 0x1f8   : > { %v4053_v20 = vpop.f32.mrf.mxu3 }
 0x1f9   : > { %5326 = vst [vmem:[#allocation13_spill] sm:$0xff] %v4047_v29 }
 0x1fa   : > { %5327 = vst [vmem:[#allocation14_spill] sm:$0xff] %v4053_v20  ;;  %v990_v21 = vpop.f32.mrf.mxu2 }
 0x1fb   : > { %v991_v26 = vadd.f32 %v990_v21, %v3971_v61  ;;  %v4070_v21 = vpop.permute.xlu1 %555 }
 0x1fc   : > { %v4056_v32 = vpop.f32.mrf.mxu1  ;;  %5329 = vst [vmem:[#allocation16_spill] sm:$0xff] %v4070_v21 }
 0x1fd   : > { %5328 = vst [vmem:[#allocation15_spill] sm:$0xff] %v4056_v32  ;;  %v1024_v36 = vmax.f32 %v991_v26, 0.0  ;;  %v910_v32 = vmax.f32 %v779_v3, %v894_v62 }
 0x1ff   : > { %v4066_v53 = vmax.f32 %v3977_v4, %v1024_v36 }
 0x200   : > { %v879_v56 = vpop.f32.mrf.mxu3 }
 0x201   : > { %v880_v63 = vadd.f32 %v879_v56, %v4060_v48 }
 0x202   : > { %v992_v59 = vpop.f32.mrf.mxu2 }
 0x203   : > { %v901_v58 = vmax.f32 %v880_v63, 0.0  ;;  %v993_v8 = vadd.f32 %v992_v59, %v3993_v24  ;;  %v4087_v62 = vpop.permute.xlu1 %570 }
 0x204   : > { %v769_v26 = vpop.f32.mrf.mxu1 }
 0x205   : > { %v4072_v60 = vmax.f32 %v786_v43, %v901_v58  ;;  %v1025_v7 = vmax.f32 %v993_v8, 0.0  ;;  %v770_v63 = vadd.f32 %v769_v26, %v4087_v62  ;;  %v896_v43 = vmax.f32 %v867_v49, 0.0 }
 0x207   : > { %v4074_v23 = vmax.f32 %v910_v32, %v1025_v7  ;;  %3032 = vmatmul.msk.bf16.gmra.mxu1 %vm700_vm1, %v3921_v0  ;;  %3060 = vmatmul.msk.bf16.gmra.mxu2 %vm606_vm0, %v3731_v47  ;;  %v752_v32 = vadd.f32 %v3985_v9, %v4016_v5 }
 0x208   : > { %v4080_v4 = vpop.f32.mrf.mxu3 }
 0x209   : > { %5330 = vst [vmem:[#allocation17_spill] sm:$0xff] %v4074_v23  ;;  %v781_v7 = vmax.f32 %v752_v32, 0.0 }
 0x20a   : > { %5331 = vst [vmem:[#allocation18_spill] sm:$0xff] %v4080_v4  ;;  %v995_v35 = vpop.f32.mrf.mxu2 }
 0x20b   : > { %v996_v36 = vadd.f32 %v995_v35, %v3989_v11  ;;  %v788_v35 = vmax.f32 %v770_v63, 0.0  ;;  %v912_v4 = vmax.f32 %v781_v7, %v896_v43 }
 0x20c   : > { %v4083_v51 = vpop.f32.mrf.mxu1 }
 0x20d   : > { %5332 = vst [vmem:[#allocation19_spill] sm:$0xff] %v4083_v51  ;;  %v1026_v56 = vmax.f32 %v996_v36, 0.0 }
 0x20f   : > { %v1042_v59 = vmax.f32 %v3995_v27, %v1026_v56 }
 0x210   : > { %v884_v3 = vpop.f32.mrf.mxu3 }
 0x211   : > { %v885_v58 = vadd.f32 %v884_v3, %v4087_v62 }
 0x212   : > { %v997_v8 = vpop.f32.mrf.mxu2 }
 0x213   : > { %v903_v51 = vmax.f32 %v885_v58, 0.0  ;;  %v998_v28 = vadd.f32 %v997_v8, %v4016_v5 }
 0x214   : > { %v1111_v36 = vpop.f32.mrf.mxu1 }
 0x215   : > { %v919_v20 = vmax.f32 %v788_v35, %v903_v51  ;;  %v1027_v21 = vmax.f32 %v998_v28, 0.0  ;;  %v1112_v9 = vadd.f32 %v1111_v36, %v3942_v31 }
 0x217   : > { %v4096_v34 = vmax.f32 %v912_v4, %v1027_v21  ;;  %v1151_v26 = vmax.f32 %v1112_v9, 0.0  ;;  %3075 = vmatmul.msk.bf16.vlgmr.msra.gmra.mxu2 %vm606_vm0, %v3685_v37 }
 0x218   : > { %v4100_v27 = vpop.f32.mrf.mxu3 }
 0x219   : > { %5333 = vst [vmem:[#allocation20_spill] sm:$0xff] %v4096_v34  ;;  %v4103_v49 = vmax.f32 %v4012_v50, %v1151_v26 }
 0x21a   : > { %5334 = vst [vmem:[#allocation21_spill] sm:$0xff] %v4100_v27  ;;  %v1000_v56 = vpop.f32.mrf.mxu2 }
 0x21b   : > { %v1001_v32 = vadd.f32 %v1000_v56, %v4007_v38 }
 0x21c   : > { %v4106_v63 = vpop.f32.mrf.mxu1 }
 0x21d   : > { %v1028_v51 = vmax.f32 %v1001_v32, 0.0 }
 0x21f   : > { %v1044_v3 = vmax.f32 %v4018_v14, %v1028_v51 }
 0x220   : > { %v4109_v43 = vpop.f32.mrf.mxu3 }
 0x222   : > { %v4111_v21 = vpop.f32.mrf.mxu2 }
 0x223   : > { %5335 = vst [vmem:[#allocation22_spill] sm:$0xff] %v4111_v21 }
 0x224   : > { %v1116_v4 = vpop.f32.mrf.mxu1 }
 0x225   : > { %v1117_v37 = vadd.f32 %v1116_v4, %v3955_v45 }
 0x227   : > { %v1153_v58 = vmax.f32 %v1117_v37, 0.0  ;;  %3076 = vmatmul.msk.bf16.gmra.mxu2 %vm606_vm0, %v3706_v42 }
 0x228   : > { %v1203_v50 = vpop.f32.mrf.mxu3 }
 0x229   : > { %v4117_v8 = vmax.f32 %v4038_v44, %v1153_v58 }
 0x22a   : > { %v1005_v7 = vpop.f32.mrf.mxu2 }
 0x22b   : > { %v1006_v35 = vadd.f32 %v1005_v7, %v4032_v33 }
 0x22c   : > { %v4120_v28 = vpop.f32.mrf.mxu1 }
 0x22d   : > { %5336 = vst [vmem:[#allocation23_spill] sm:$0xff] %v4120_v28  ;;  %v1030_v14 = vmax.f32 %v1006_v35, 0.0 }
 0x22f   : > { %v1046_v36 = vmax.f32 %v4045_v6, %v1030_v14 }
 0x230   : > { %v1206_v9 = vpop.f32.mrf.mxu3 }
 0x232   : > { %v4123_v26 = vpop.f32.mrf.mxu2 }
 0x233   : > { %5337 = vst [vmem:[#allocation24_spill] sm:$0xff] %v4123_v26 }
 0x234   : > { %v1121_v56 = vpop.f32.mrf.mxu1 }
 0x235   : > { %v1122_v32 = vadd.f32 %v1121_v56, %v3971_v61 }
 0x237   : > { %v1155_v51 = vmax.f32 %v1122_v32, 0.0  ;;  %3077 = vmatmul.msk.bf16.gmra.mxu2 %vm606_vm0, %v3722_v46 }
 0x238   : > { %v1208_v42 = vpop.f32.mrf.mxu3 }
 0x239   : > { %v4129_v44 = vmax.f32 %v4066_v53, %v1155_v51 }
 0x23a   : > { %v1010_v4 = vpop.f32.mrf.mxu2 }
 0x23b   : > { %v1011_v37 = vadd.f32 %v1010_v4, %v4060_v48 }
 0x23c   : > { %v4132_v58 = vpop.f32.mrf.mxu1 }
 0x23d   : > { %5338 = vst [vmem:[#allocation25_spill] sm:$0xff] %v4132_v58  ;;  %v1032_v6 = vmax.f32 %v1011_v37, 0.0 }
 0x23f   : > { %v1048_v7 = vmax.f32 %v4072_v60, %v1032_v6 }
 0x240   : > { %v1211_v35 = vpop.f32.mrf.mxu3 }
 0x242   : > { %v4135_v14 = vpop.f32.mrf.mxu2 }
 0x243   : > { %5339 = vst [vmem:[#allocation26_spill] sm:$0xff] %v4135_v14 }
 0x244   : > { %v1126_v56 = vpop.f32.mrf.mxu1 }
 0x245   : > { %v1127_v32 = vadd.f32 %v1126_v56, %v3989_v11 }
 0x247   : > { %v1157_v27 = vmax.f32 %v1127_v32, 0.0  ;;  %3078 = vmatmul.msk.bf16.gmra.mxu2 %vm606_vm0, %v3731_v47 }
 0x248   : > { %v1213_v46 = vpop.f32.mrf.mxu3 }
 0x249   : > { %v4140_v53 = vmax.f32 %v1042_v59, %v1157_v27  ;;  %v1214_v59 = vadd.f32 %v1213_v46, %v3806_v17 }
 0x24a   : > { %v1015_v51 = vpop.f32.mrf.mxu2 }
 0x24b   : > { %v1016_v4 = vadd.f32 %v1015_v51, %v4087_v62  ;;  %v1226_v34 = vmax.f32 %v1214_v59, 0.0 }
 0x24c   : > { %v4143_v26 = vpop.f32.mrf.mxu1 }
 0x24d   : > { %5340 = vst [vmem:[#allocation27_spill] sm:$0xff] %v4143_v26  ;;  %v1034_v37 = vmax.f32 %v1016_v4, 0.0 }
 0x24f   : > { %v1050_v60 = vmax.f32 %v919_v20, %v1034_v37  ;;  %v1212_v20 = vadd.f32 %v1211_v35, %v3800_v12  ;;  %v1202_v35 = vadd.f32 %v4109_v43, %v3826_v41 }
 0x250   : > { %v1216_v6 = vpop.f32.mrf.mxu3 }
 0x251   : > { %v1217_v32 = vadd.f32 %v1216_v6, %v3802_v13  ;;  %v1225_v26 = vmax.f32 %v1212_v20, 0.0 }
 0x252   : > { %v4145_v21 = vpop.f32.mrf.mxu2 }
 0x253   : > { %5341 = vst [vmem:[#allocation28_spill] sm:$0xff] %v4145_v21  ;;  %v1227_v4 = vmax.f32 %v1217_v32, 0.0  ;;  %v1231_v46 = vpack.c.bf16 %v1226_v34, %v1225_v26 }
 0x254   : > { %v1131_v14 = vpop.f32.mrf.mxu1 }
 0x255   : > { %v1132_v56 = vadd.f32 %v1131_v14, %v4007_v38  ;;  %v1209_v14 = vadd.f32 %v1208_v42, %v3813_v22 }
 0x257   : > { %v1159_v39 = vmax.f32 %v1132_v56, 0.0  ;;  %v1207_v56 = vadd.f32 %v1206_v9, %v3804_v15 }
 0x258   : > { %v1218_v47 = vpop.f32.mrf.mxu3 }
 0x259   : > { %v4150_v27 = vmax.f32 %v1044_v3, %v1159_v39  ;;  %v1219_v51 = vadd.f32 %v1218_v47, %v3810_v18  ;;  %v1204_v39 = vadd.f32 %v1203_v50, %v3820_v30  ;;  %v1224_v3 = vmax.f32 %v1209_v14, 0.0 }
 0x25a   : > { %v4153_v40 = vpop.f32.mrf.mxu2  ;;  %v1223_v32 = vmax.f32 %v1207_v56, 0.0 }
 0x25b   : > { %v1228_v37 = vmax.f32 %v1219_v51, 0.0 }
 0x25c   : > { %v4156_v21 = vpop.f32.mrf.mxu1  ;;  %v1230_v59 = vpack.c.bf16 %v1224_v3, %v1223_v32 }
 0x25d   : > { %5342 = vst [vmem:[#allocation29_spill] sm:$0xff] %v4156_v21  ;;  %v1232_v6 = vpack.c.bf16 %v1228_v37, %v1227_v4  ;;  %v1222_v21 = vmax.f32 %v1204_v39, 0.0  ;;  %v1221_v4 = vmax.f32 %v1202_v35, 0.0 }
 0x25f   : > { %1237 = vmatpush.bf16.msrb.mxu0 %v1232_v6  ;;  %v1229_v20 = vpack.c.bf16 %v1222_v21, %v1221_v4 }
 0x262   : > { %v1334_v47 = vpop.f32.mrf.mxu2 }
 0x263   : > { %1238 = vmatpush.bf16.msrb.mxu0 %v1231_v46 }
 0x264   : > { %v1136_v51 = vpop.f32.mrf.mxu1 }
 0x265   : > { %v1137_v42 = vadd.f32 %v1136_v51, %v4032_v33 }
 0x267   : > { %v1161_v37 = vmax.f32 %v1137_v42, 0.0  ;;  %1239 = vmatpush.bf16.msrb.mxu0 %v1230_v59 }
 0x269   : > { %v4164_v9 = vmax.f32 %v1046_v36, %v1161_v37 }
 0x26a   : > { %v1337_v50 = vpop.f32.mrf.mxu2 }
 0x26b   : > { %1240 = vmatpush.bf16.msrb.mxu0 %v1229_v20 }
 0x26c   : > { %v4166_v34 = vpop.f32.mrf.mxu1 }
 0x26d   : > { %5343 = vst [vmem:[#allocation30_spill] sm:$0xff] %v4166_v34 }
 0x26e   : > { %3043 = vmatmul.msk.bf16.vlgmr.msrb.gmra.mxu0 %vm700_vm1, %v3839_v2 }
 0x272   : > { %v1339_v43 = vpop.f32.mrf.mxu2 }
 0x274   : > { %v1141_v26 = vpop.f32.mrf.mxu1 }
 0x275   : > { %v1142_v14 = vadd.f32 %v1141_v26, %v4060_v48 }
 0x277   : > { %v1163_v6 = vmax.f32 %v1142_v14, 0.0  ;;  %v1340_v14 = vadd.f32 %v1339_v43, %v3813_v22 }
 0x279   : > { %v4171_v56 = vmax.f32 %v1048_v7, %v1163_v6 }
 0x27a   : > { %v1342_v39 = vpop.f32.mrf.mxu2 }
 0x27b   : > { %v1343_v37 = vadd.f32 %v1342_v39, %v3800_v12 }
 0x27c   : > { %v4173_v3 = vpop.f32.mrf.mxu1 }
 0x27d   : > { %5344 = vst [vmem:[#allocation31_spill] sm:$0xff] %v4173_v3  ;;  %v1355_v3 = vmax.f32 %v1340_v14, 0.0 }
 0x27e   : > { %3044 = vmatmul.msk.bf16.gmra.mxu0 %vm700_vm1, %v3848_v10 }
 0x282   : > { %v1344_v21 = vpop.f32.mrf.mxu2 }
 0x283   : > { %v1345_v59 = vadd.f32 %v1344_v21, %v3806_v17  ;;  %v1333_v21 = vadd.f32 %v4153_v40, %v3826_v41 }
 0x284   : > { %v1146_v36 = vpop.f32.mrf.mxu1 }
 0x285   : > { %v1147_v46 = vadd.f32 %v1146_v36, %v4087_v62  ;;  %v1357_v6 = vmax.f32 %v1345_v59, 0.0  ;;  %v1338_v36 = vadd.f32 %v1337_v50, %v3804_v15 }
 0x287   : > { %v1165_v35 = vmax.f32 %v1147_v46, 0.0  ;;  %v1356_v46 = vmax.f32 %v1343_v37, 0.0 }
 0x289   : > { %v4178_v32 = vmax.f32 %v1050_v60, %v1165_v35  ;;  %v1362_v34 = vpack.c.bf16 %v1357_v6, %v1356_v46 }
 0x28a   : > { %v1347_v51 = vpop.f32.mrf.mxu2 }
 0x28b   : > { %v1348_v7 = vadd.f32 %v1347_v51, %v3802_v13  ;;  %v1335_v51 = vadd.f32 %v1334_v47, %v3820_v30 }
 0x28d   : > { %v1358_v20 = vmax.f32 %v1348_v7, 0.0  ;;  %v1353_v43 = vmax.f32 %v1335_v51, 0.0  ;;  %v1352_v7 = vmax.f32 %v1333_v21, 0.0 }
 0x28e   : > { %3045 = vmatmul.msk.bf16.gmra.mxu0 %vm700_vm1, %v3857_v16 }
 0x28f   : > { %v1360_v59 = vpack.c.bf16 %v1353_v43, %v1352_v7 }
 0x292   : > { %v1349_v42 = vpop.f32.mrf.mxu2 }
 0x293   : > { %v1350_v4 = vadd.f32 %v1349_v42, %v3810_v18  ;;  %v1354_v42 = vmax.f32 %v1338_v36, 0.0 }
 0x295   : > { %v1359_v26 = vmax.f32 %v1350_v4, 0.0  ;;  %v1361_v39 = vpack.c.bf16 %v1355_v3, %v1354_v42  ;;  %v3274_v4 = vld [vmem:[%s3678_s16 + $0x38] sm:$0xff] }
 0x296   : > { %1592 = vmatpush.bf16.msra.mxu0 %v3274_v4 }
 0x297   : > { %v1363_v60 = vpack.c.bf16 %v1359_v26, %v1358_v20 }
 0x299   : > { %1368 = vmatpush.bf16.msrb.mxu3 %v1363_v60 }
 0x29a   : > { %v1463_v35 = vpop.f32.mrf.mxu2 }
 0x29b   : > { %v1464_v4 = vadd.f32 %v1463_v35, %v3826_v41 }
 0x29d   : > { %1369 = vmatpush.bf16.msrb.mxu3 %v1362_v34 }
 0x29e   : > { %3046 = vmatmul.msk.bf16.gmra.mxu0 %vm700_vm1, %v3869_v25 }
 0x2a1   : > { %1370 = vmatpush.bf16.msrb.mxu3 %v1361_v39 }
 0x2a2   : > { %v1465_v50 = vpop.f32.mrf.mxu2 }
 0x2a3   : > { %v1466_v7 = vadd.f32 %v1465_v50, %v3820_v30 }
 0x2a5   : > { %1371 = vmatpush.bf16.msrb.mxu3 %v1360_v59 }
 0x2a8   : > { %3061 = vmatmul.msk.bf16.vlgmr.msrb.gmra.mxu3 %vm700_vm1, %v3839_v2 }
 0x2aa   : > { %v1468_v47 = vpop.f32.mrf.mxu2 }
 0x2ab   : > { %v1469_v43 = vadd.f32 %v1468_v47, %v3804_v15 }
 0x2ae   : > { %3047 = vmatmul.msk.bf16.gmra.mxu0 %vm700_vm1, %v3884_v52 }
 0x2b2   : > { %v1470_v40 = vpop.f32.mrf.mxu2 }
 0x2b3   : > { %v1471_v51 = vadd.f32 %v1470_v40, %v3813_v22  ;;  %v1484_v40 = vmax.f32 %v1466_v7, 0.0  ;;  %v4257_v7 = vld [vmem:[%s5302_s1 + $0x10] sm:$0xff] }
 0x2b5   : > { %v1486_v59 = vmax.f32 %v1471_v51, 0.0  ;;  %v4241_v51 = vld [vmem:[%s5302_s1 + $0x8] sm:$0xff] }
 0x2b8   : > { %3062 = vmatmul.msk.bf16.gmra.mxu3 %vm700_vm1, %v3848_v10 }
 0x2ba   : > { %v1473_v34 = vpop.f32.mrf.mxu2 }
 0x2bb   : > { %v1474_v60 = vadd.f32 %v1473_v34, %v3800_v12  ;;  %v1485_v34 = vmax.f32 %v1469_v43, 0.0 }
 0x2bd   : > { %v1487_v39 = vmax.f32 %v1474_v60, 0.0 }
 0x2be   : > { %3048 = vmatmul.msk.bf16.gmra.mxu0 %vm700_vm1, %v3895_v54 }
 0x2c2   : > { %v1475_v3 = vpop.f32.mrf.mxu2 }
 0x2c3   : > { %v1476_v14 = vadd.f32 %v1475_v3, %v3806_v17 }
 0x2c5   : > { %v1488_v21 = vmax.f32 %v1476_v14, 0.0  ;;  %v4226_v14 = vld [vmem:[%s5302_s1] sm:$0xff] }
 0x2c7   : > { %v1493_v3 = vpack.c.bf16 %v1488_v21, %v1487_v39 }
 0x2c8   : > { %3063 = vmatmul.msk.bf16.gmra.mxu3 %vm700_vm1, %v3857_v16 }
 0x2ca   : > { %v1478_v37 = vpop.f32.mrf.mxu2 }
 0x2cb   : > { %v1479_v20 = vadd.f32 %v1478_v37, %v3802_v13  ;;  %v1492_v37 = vpack.c.bf16 %v1486_v59, %v1485_v34  ;;  %v4272_v34 = vld [vmem:[%s5302_s1 + $0x18] sm:$0xff] }
 0x2cd   : > { %v1489_v36 = vmax.f32 %v1479_v20, 0.0  ;;  %v1483_v20 = vmax.f32 %v1464_v4, 0.0 }
 0x2ce   : > { %3049 = vmatmul.msk.bf16.gmra.mxu0 %vm700_vm1, %v3906_v57 }
 0x2d2   : > { %v1480_v26 = vpop.f32.mrf.mxu2 }
 0x2d3   : > { %v1481_v6 = vadd.f32 %v1480_v26, %v3810_v18  ;;  %v1491_v26 = vpack.c.bf16 %v1484_v40, %v1483_v20 }
 0x2d5   : > { %v1490_v46 = vmax.f32 %v1481_v6, 0.0 }
 0x2d7   : > { %v1494_v42 = vpack.c.bf16 %v1490_v46, %v1489_v36 }
 0x2d8   : > { %3064 = vmatmul.msk.bf16.gmra.mxu3 %vm700_vm1, %v3869_v25 }
 0x2d9   : > { %1499 = vmatpush.bf16.msra.mxu1 %v1494_v42  ;;  %v3275_v42 = vld [vmem:[%s3678_s16 + $0x40] sm:$0xff] }
 0x2da   : > { %1723 = vmatpush.bf16.msra.mxu3 %v3275_v42 }
 0x2dd   : > { %1500 = vmatpush.bf16.msra.mxu1 %v1493_v3 }
 0x2de   : > { %3050 = vmatmul.msk.bf16.gmra.mxu0 %vm700_vm1, %v3921_v0 }
 0x2e1   : > { %1501 = vmatpush.bf16.msra.mxu1 %v1492_v37 }
 0x2e5   : > { %1502 = vmatpush.bf16.msra.mxu1 %v1491_v26 }
 0x2e8   : > { %3065 = vmatmul.msk.bf16.gmra.mxu3 %vm700_vm1, %v3884_v52  ;;  %3079 = vmatmul.msk.bf16.vlgmr.msra.gmra.mxu1 %vm700_vm1, %v3839_v2 }
 0x2eb   : > { %v1242_v50 = vpop.f32.mrf.mxu0 }
 0x2ec   : > { %v1243_v35 = vadd.f32 %v1242_v50, %v3942_v31 }
 0x2ee   : > { %v1282_v47 = vmax.f32 %v1243_v35, 0.0  ;;  %3093 = vmatmul.msk.bf16.vlgmr.msra.gmra.mxu0 %vm606_vm0, %v4226_v14 }
 0x2f0   : > { %v1298_v6 = vmax.f32 %v4103_v49, %v1282_v47 }
 0x2f3   : > { %v4231_v60 = vpop.f32.mrf.mxu0 }
 0x2f8   : > { %3066 = vmatmul.msk.bf16.gmra.mxu3 %vm700_vm1, %v3895_v54  ;;  %3080 = vmatmul.msk.bf16.gmra.mxu1 %vm700_vm1, %v3848_v10 }
 0x2fb   : > { %v1247_v2 = vpop.f32.mrf.mxu0 }
 0x2fc   : > { %v1248_v36 = vadd.f32 %v1247_v2, %v3955_v45 }
 0x2fe   : > { %v1284_v46 = vmax.f32 %v1248_v36, 0.0  ;;  %3094 = vmatmul.msk.bf16.gmra.mxu0 %vm606_vm0, %v4241_v51 }
 0x300   : > { %v1300_v49 = vmax.f32 %v4117_v8, %v1284_v46 }
 0x303   : > { %v4246_v21 = vpop.f32.mrf.mxu0 }
 0x304   : > { %5345 = vst [vmem:[#allocation32_spill] sm:$0xff] %v4246_v21 }
 0x308   : > { %3067 = vmatmul.msk.bf16.gmra.mxu3 %vm700_vm1, %v3906_v57  ;;  %3081 = vmatmul.msk.bf16.gmra.mxu1 %vm700_vm1, %v3857_v16 }
 0x30b   : > { %v1252_v10 = vpop.f32.mrf.mxu0 }
 0x30c   : > { %v1253_v43 = vadd.f32 %v1252_v10, %v3971_v61 }
 0x30e   : > { %v1286_v39 = vmax.f32 %v1253_v43, 0.0  ;;  %3095 = vmatmul.msk.bf16.gmra.mxu0 %vm606_vm0, %v4257_v7 }
 0x310   : > { %v1302_v8 = vmax.f32 %v4129_v44, %v1286_v39 }
 0x313   : > { %v4262_v59 = vpop.f32.mrf.mxu0 }
 0x314   : > { %5346 = vst [vmem:[#allocation33_spill] sm:$0xff] %v4262_v59 }
 0x318   : > { %3068 = vmatmul.msk.bf16.gmra.mxu3 %vm700_vm1, %v3921_v0  ;;  %3082 = vmatmul.msk.bf16.gmra.mxu1 %vm700_vm1, %v3869_v25 }
 0x31b   : > { %v1257_v16 = vpop.f32.mrf.mxu0 }
 0x31c   : > { %v1258_v3 = vadd.f32 %v1257_v16, %v3989_v11 }
 0x31e   : > { %v1288_v4 = vmax.f32 %v1258_v3, 0.0  ;;  %3096 = vmatmul.msk.bf16.gmra.mxu0 %vm606_vm0, %v4272_v34 }
 0x320   : > { %v1304_v44 = vmax.f32 %v4140_v53, %v1288_v4 }
 0x323   : > { %v4277_v40 = vpop.f32.mrf.mxu0 }
 0x324   : > { %5347 = vst [vmem:[#allocation34_spill] sm:$0xff] %v4277_v40 }
 0x328   : > { %3083 = vmatmul.msk.bf16.gmra.mxu1 %vm700_vm1, %v3884_v52  ;;  %3111 = vmatmul.msk.bf16.vlgmr.msra.gmra.mxu3 %vm606_vm0, %v4226_v14  ;;  %v3276_v52 = vld [vmem:[%s3678_s16 + $0x48] sm:$0xff] }
 0x329   : > { %1854 = vmatpush.bf16.msrb.mxu1 %v3276_v52 }
 0x32b   : > { %v1262_v25 = vpop.f32.mrf.mxu0  ;;  %v1373_v37 = vpop.f32.mrf.mxu3 }
 0x32c   : > { %v1263_v20 = vadd.f32 %v1262_v25, %v4007_v38  ;;  %v1374_v26 = vadd.f32 %v1373_v37, %v3942_v31 }
 0x32e   : > { %v1290_v50 = vmax.f32 %v1263_v20, 0.0  ;;  %v1413_v35 = vmax.f32 %v1374_v26, 0.0 }
 0x330   : > { %v1306_v47 = vmax.f32 %v4150_v27, %v1290_v50  ;;  %v1429_v53 = vmax.f32 %v1298_v6, %v1413_v35 }
 0x333   : > { %v4286_v2 = vpop.f32.mrf.mxu0  ;;  %v4288_v36 = vpop.f32.mrf.mxu3 }
 0x334   : > { %5348 = vst [vmem:[#allocation35_spill] sm:$0xff] %v4286_v2 }
 0x338   : > { %3084 = vmatmul.msk.bf16.gmra.mxu1 %vm700_vm1, %v3895_v54  ;;  %3112 = vmatmul.msk.bf16.gmra.mxu3 %vm606_vm0, %v4241_v51 }
 0x33b   : > { %v1267_v46 = vpop.f32.mrf.mxu0  ;;  %v1378_v42 = vpop.f32.mrf.mxu3 }
 0x33c   : > { %v1268_v10 = vadd.f32 %v1267_v46, %v4032_v33  ;;  %v1379_v43 = vadd.f32 %v1378_v42, %v3955_v45 }
 0x33e   : > { %v1292_v27 = vmax.f32 %v1268_v10, 0.0  ;;  %v1415_v6 = vmax.f32 %v1379_v43, 0.0  ;;  %v4319_v43 = vpop.f32.mrf.mxu1 }
 0x33f   : > { %5353 = vst [vmem:[#allocation40_spill] sm:$0xff] %v4319_v43 }
 0x340   : > { %v1308_v39 = vmax.f32 %v4164_v9, %v1292_v27  ;;  %v1431_v16 = vmax.f32 %v1300_v49, %v1415_v6 }
 0x343   : > { %v4298_v3 = vpop.f32.mrf.mxu0  ;;  %v4300_v4 = vpop.f32.mrf.mxu3 }
 0x344   : > { %5349 = vst [vmem:[#allocation36_spill] sm:$0xff] %v4298_v3 }
 0x345   : > { %5350 = vst [vmem:[#allocation37_spill] sm:$0xff] %v4300_v4 }
 0x348   : > { %3085 = vmatmul.msk.bf16.gmra.mxu1 %vm700_vm1, %v3906_v57  ;;  %3113 = vmatmul.msk.bf16.gmra.mxu3 %vm606_vm0, %v4257_v7 }
 0x34b   : > { %v1272_v54 = vpop.f32.mrf.mxu0  ;;  %v1383_v25 = vpop.f32.mrf.mxu3 }
 0x34c   : > { %v1273_v37 = vadd.f32 %v1272_v54, %v4060_v48  ;;  %v1384_v20 = vadd.f32 %v1383_v25, %v3971_v61 }
 0x34e   : > { %v1294_v26 = vmax.f32 %v1273_v37, 0.0  ;;  %v1417_v50 = vmax.f32 %v1384_v20, 0.0 }
 0x350   : > { %v1310_v9 = vmax.f32 %v4171_v56, %v1294_v26  ;;  %v1433_v49 = vmax.f32 %v1302_v8, %v1417_v50 }
 0x353   : > { %v4309_v35 = vpop.f32.mrf.mxu0  ;;  %v4311_v52 = vpop.f32.mrf.mxu3 }
 0x354   : > { %5351 = vst [vmem:[#allocation38_spill] sm:$0xff] %v4309_v35 }
 0x355   : > { %5352 = vst [vmem:[#allocation39_spill] sm:$0xff] %v4311_v52 }
 0x358   : > { %3086 = vmatmul.msk.bf16.gmra.mxu1 %vm700_vm1, %v3921_v0  ;;  %3114 = vmatmul.msk.bf16.gmra.mxu3 %vm606_vm0, %v4272_v34 }
 0x35b   : > { %v1277_v57 = vpop.f32.mrf.mxu0  ;;  %v1388_v46 = vpop.f32.mrf.mxu3 }
 0x35c   : > { %v1278_v42 = vadd.f32 %v1277_v57, %v4087_v62  ;;  %v1389_v10 = vadd.f32 %v1388_v46, %v3989_v11 }
 0x35e   : > { %v1296_v56 = vmax.f32 %v1278_v42, 0.0  ;;  %v1419_v8 = vmax.f32 %v1389_v10, 0.0 }
 0x360   : > { %v1312_v27 = vmax.f32 %v4178_v32, %v1296_v56  ;;  %v1435_v6 = vmax.f32 %v1304_v44, %v1419_v8 }
 0x363   : > { %v4322_v54 = vpop.f32.mrf.mxu0  ;;  %v4324_v25 = vpop.f32.mrf.mxu3 }
 0x364   : > { %5354 = vst [vmem:[#allocation41_spill] sm:$0xff] %v4322_v54 }
 0x365   : > { %5355 = vst [vmem:[#allocation42_spill] sm:$0xff] %v4324_v25  ;;  %v1504_v0 = vpop.f32.mrf.mxu1 }
 0x366   : > { %v1505_v37 = vadd.f32 %v1504_v0, %v3942_v31 }
 0x368   : > { %v1544_v20 = vmax.f32 %v1505_v37, 0.0  ;;  %3129 = vmatmul.msk.bf16.vlgmr.msrb.gmra.mxu1 %vm606_vm0, %v4226_v14 }
 0x36a   : > { %v4329_v26 = vmax.f32 %v1429_v53, %v1544_v20 }
 0x36b   : > { %v1393_v50 = vpop.f32.mrf.mxu3  ;;  %v4331_v57 = vpop.f32.mrf.mxu0 }
 0x36c   : > { %v1394_v46 = vadd.f32 %v1393_v50, %v4007_v38 }
 0x36d   : > { %v4334_v32 = vpop.f32.mrf.mxu1 }
 0x36e   : > { %v1421_v44 = vmax.f32 %v1394_v46, 0.0 }
 0x370   : > { %v1437_v42 = vmax.f32 %v1306_v47, %v1421_v44 }
 0x373   : > { %v4336_v10 = vpop.f32.mrf.mxu3  ;;  %v1596_v56 = vpop.f32.mrf.mxu0 }
 0x374   : > { %5356 = vst [vmem:[#allocation43_spill] sm:$0xff] %v4336_v10 }
 0x375   : > { %v1509_v8 = vpop.f32.mrf.mxu1 }
 0x376   : > { %v1510_v0 = vadd.f32 %v1509_v8, %v3955_v45 }
 0x378   : > { %v1546_v37 = vmax.f32 %v1510_v0, 0.0  ;;  %3130 = vmatmul.msk.bf16.gmra.mxu1 %vm606_vm0, %v4241_v51 }
 0x37a   : > { %v4341_v53 = vmax.f32 %v1431_v16, %v1546_v37 }
 0x37b   : > { %v1398_v20 = vpop.f32.mrf.mxu3  ;;  %v1599_v54 = vpop.f32.mrf.mxu0 }
 0x37c   : > { %v1399_v50 = vadd.f32 %v1398_v20, %v4032_v33 }
 0x37d   : > { %v4344_v43 = vpop.f32.mrf.mxu1 }
 0x37e   : > { %5357 = vst [vmem:[#allocation44_spill] sm:$0xff] %v4344_v43  ;;  %v1423_v46 = vmax.f32 %v1399_v50, 0.0 }
 0x380   : > { %v4346_v47 = vmax.f32 %v1308_v39, %v1423_v46 }
 0x383   : > { %v4348_v44 = vpop.f32.mrf.mxu3  ;;  %v1601_v35 = vpop.f32.mrf.mxu0 }
 0x384   : > { %5358 = vst [vmem:[#allocation45_spill] sm:$0xff] %v4348_v44 }
 0x385   : > { %v1514_v3 = vpop.f32.mrf.mxu1 }
 0x386   : > { %v1515_v8 = vadd.f32 %v1514_v3, %v3971_v61 }
 0x388   : > { %v1548_v0 = vmax.f32 %v1515_v8, 0.0  ;;  %3131 = vmatmul.msk.bf16.gmra.mxu1 %vm606_vm0, %v4257_v7 }
 0x38a   : > { %v4353_v16 = vmax.f32 %v1433_v49, %v1548_v0 }
 0x38b   : > { %v1403_v37 = vpop.f32.mrf.mxu3  ;;  %v1604_v10 = vpop.f32.mrf.mxu0 }
 0x38c   : > { %v1404_v20 = vadd.f32 %v1403_v37, %v4060_v48 }
 0x38d   : > { %v4356_v2 = vpop.f32.mrf.mxu1 }
 0x38e   : > { %5359 = vst [vmem:[#allocation46_spill] sm:$0xff] %v4356_v2  ;;  %v1425_v39 = vmax.f32 %v1404_v20, 0.0 }
 0x390   : > { %v1441_v50 = vmax.f32 %v1310_v9, %v1425_v39 }
 0x393   : > { %v4358_v46 = vpop.f32.mrf.mxu3  ;;  %v1606_v44 = vpop.f32.mrf.mxu0 }
 0x394   : > { %5360 = vst [vmem:[#allocation47_spill] sm:$0xff] %v4358_v46 }
 0x395   : > { %v1519_v25 = vpop.f32.mrf.mxu1 }
 0x396   : > { %v1520_v3 = vadd.f32 %v1519_v25, %v3989_v11  ;;  %v1607_v25 = vadd.f32 %v1606_v44, %v3806_v17 }
 0x398   : > { %v1550_v8 = vmax.f32 %v1520_v3, 0.0  ;;  %3132 = vmatmul.msk.bf16.gmra.mxu1 %vm606_vm0, %v4272_v34 }
 0x39a   : > { %v4363_v49 = vmax.f32 %v1435_v6, %v1550_v8  ;;  %v1605_v6 = vadd.f32 %v1604_v10, %v3800_v12 }
 0x39b   : > { %v1408_v0 = vpop.f32.mrf.mxu3  ;;  %v1609_v40 = vpop.f32.mrf.mxu0 }
 0x39c   : > { %v1409_v37 = vadd.f32 %v1408_v0, %v4087_v62  ;;  %v1610_v39 = vadd.f32 %v1609_v40, %v3802_v13  ;;  %v1600_v40 = vadd.f32 %v1599_v54, %v3804_v15 }
 0x39d   : > { %v4366_v5 = vpop.f32.mrf.mxu1 }
 0x39e   : > { %5361 = vst [vmem:[#allocation48_spill] sm:$0xff] %v4366_v5  ;;  %v1427_v20 = vmax.f32 %v1409_v37, 0.0  ;;  %v1620_v8 = vmax.f32 %v1610_v39, 0.0  ;;  %v1602_v5 = vadd.f32 %v1601_v35, %v3813_v22  ;;  %v1619_v37 = vmax.f32 %v1607_v25, 0.0 }
 0x39f   : > { %v1616_v35 = vmax.f32 %v1600_v40, 0.0  ;;  %v4401_v40 = vld [vmem:[%s5304_s3 + $0x8] sm:$0xff] }
 0x3a0   : > { %v1443_v9 = vmax.f32 %v1312_v27, %v1427_v20  ;;  %v1617_v58 = vmax.f32 %v1602_v5, 0.0  ;;  %v4388_v5 = vld [vmem:[%s5304_s3] sm:$0xff] }
 0x3a2   : > { %v1623_v25 = vpack.c.bf16 %v1617_v58, %v1616_v35 }
 0x3a3   : > { %v4369_v46 = vpop.f32.mrf.mxu3  ;;  %v1611_v23 = vpop.f32.mrf.mxu0 }
 0x3a4   : > { %5362 = vst [vmem:[#allocation49_spill] sm:$0xff] %v4369_v46  ;;  %v1612_v3 = vadd.f32 %v1611_v23, %v3810_v18  ;;  %v1618_v46 = vmax.f32 %v1605_v6, 0.0  ;;  %v1597_v23 = vadd.f32 %v1596_v56, %v3820_v30 }
 0x3a5   : > { %v1524_v2 = vpop.f32.mrf.mxu1 }
 0x3a6   : > { %v1621_v52 = vmax.f32 %v1612_v3, 0.0  ;;  %v1525_v0 = vadd.f32 %v1524_v2, %v4007_v38  ;;  %v1624_v10 = vpack.c.bf16 %v1619_v37, %v1618_v46  ;;  %v1595_v2 = vadd.f32 %v4331_v57, %v3826_v41 }
 0x3a8   : > { %v1625_v27 = vpack.c.bf16 %v1621_v52, %v1620_v8  ;;  %v1552_v20 = vmax.f32 %v1525_v0, 0.0  ;;  %v1615_v52 = vmax.f32 %v1597_v23, 0.0  ;;  %v1614_v3 = vmax.f32 %v1595_v2, 0.0 }
 0x3aa   : > { %v4377_v59 = vmax.f32 %v1437_v42, %v1552_v20  ;;  %1630 = vmatpush.bf16.msrb.mxu2 %v1625_v27  ;;  %v1622_v42 = vpack.c.bf16 %v1615_v52, %v1614_v3  ;;  %v4413_v3 = vld [vmem:[%s5304_s3 + $0x10] sm:$0xff] }
 0x3ab   : > { %v1725_v44 = vpop.f32.mrf.mxu3 }
 0x3ad   : > { %v4380_v39 = vpop.f32.mrf.mxu1 }
 0x3ae   : > { %5363 = vst [vmem:[#allocation50_spill] sm:$0xff] %v4380_v39  ;;  %1631 = vmatpush.bf16.msrb.mxu2 %v1624_v10 }
 0x3b2   : > { %1632 = vmatpush.bf16.msrb.mxu2 %v1623_v25 }
 0x3b3   : > { %v1727_v54 = vpop.f32.mrf.mxu3 }
 0x3b5   : > { %v1529_v6 = vpop.f32.mrf.mxu1 }
 0x3b6   : > { %v1530_v8 = vadd.f32 %v1529_v6, %v4032_v33  ;;  %1633 = vmatpush.bf16.msrb.mxu2 %v1622_v42 }
 0x3b8   : > { %v1554_v56 = vmax.f32 %v1530_v8, 0.0 }
 0x3b9   : > { %3097 = vmatmul.msk.bf16.vlgmr.msrb.gmra.mxu2 %vm700_vm1, %v4388_v5 }
 0x3ba   : > { %v4393_v57 = vmax.f32 %v4346_v47, %v1554_v56 }
 0x3bb   : > { %v1730_v58 = vpop.f32.mrf.mxu3 }
 0x3bd   : > { %v4395_v46 = vpop.f32.mrf.mxu1 }
 0x3be   : > { %5364 = vst [vmem:[#allocation51_spill] sm:$0xff] %v4395_v46 }
 0x3c3   : > { %v1732_v0 = vpop.f32.mrf.mxu3 }
 0x3c4   : > { %v1733_v46 = vadd.f32 %v1732_v0, %v3813_v22  ;;  %v1726_v0 = vadd.f32 %v1725_v44, %v3826_v41 }
 0x3c5   : > { %v1534_v37 = vpop.f32.mrf.mxu1 }
 0x3c6   : > { %v1535_v27 = vadd.f32 %v1534_v37, %v4060_v48 }
 0x3c8   : > { %v1556_v20 = vmax.f32 %v1535_v27, 0.0 }
 0x3c9   : > { %3098 = vmatmul.msk.bf16.gmra.mxu2 %vm700_vm1, %v4401_v40 }
 0x3ca   : > { %v4405_v23 = vmax.f32 %v1441_v50, %v1556_v20 }
 0x3cb   : > { %v1735_v47 = vpop.f32.mrf.mxu3 }
 0x3cd   : > { %v4407_v10 = vpop.f32.mrf.mxu1 }
 0x3ce   : > { %5365 = vst [vmem:[#allocation52_spill] sm:$0xff] %v4407_v10 }
 0x3d3   : > { %v1737_v2 = vpop.f32.mrf.mxu3 }
 0x3d4   : > { %v1738_v37 = vadd.f32 %v1737_v2, %v3806_v17  ;;  %v1731_v2 = vadd.f32 %v1730_v58, %v3804_v15  ;;  %v4439_v58 = vld [vmem:[%s5304_s3 + $0x20] sm:$0xff] }
 0x3d5   : > { %v1539_v35 = vpop.f32.mrf.mxu1 }
 0x3d6   : > { %v1540_v52 = vadd.f32 %v1539_v35, %v4087_v62  ;;  %v1736_v35 = vadd.f32 %v1735_v47, %v3800_v12  ;;  %v1750_v39 = vmax.f32 %v1738_v37, 0.0  ;;  %v1728_v47 = vadd.f32 %v1727_v54, %v3820_v30  ;;  %v4448_v54 = vld [vmem:[%s5304_s3 + $0x28] sm:$0xff] }
 0x3d8   : > { %v1558_v25 = vmax.f32 %v1540_v52, 0.0  ;;  %v1746_v37 = vmax.f32 %v1728_v47, 0.0 }
 0x3d9   : > { %3099 = vmatmul.msk.bf16.gmra.mxu2 %vm700_vm1, %v4413_v3 }
 0x3da   : > { %v4417_v42 = vmax.f32 %v1443_v9, %v1558_v25  ;;  %v4429_v25 = vld [vmem:[%s5304_s3 + $0x18] sm:$0xff] }
 0x3db   : > { %v1740_v50 = vpop.f32.mrf.mxu3 }
 0x3dc   : > { %v1741_v8 = vadd.f32 %v1740_v50, %v3802_v13  ;;  %v1749_v50 = vmax.f32 %v1736_v35, 0.0  ;;  %v4458_v35 = vld [vmem:[%s5304_s3 + $0x30] sm:$0xff] }
 0x3dd   : > { %v4419_v6 = vpop.f32.mrf.mxu1 }
 0x3de   : > { %5366 = vst [vmem:[#allocation53_spill] sm:$0xff] %v4419_v6  ;;  %v1751_v52 = vmax.f32 %v1741_v8, 0.0  ;;  %v1748_v8 = vmax.f32 %v1733_v46, 0.0  ;;  %v1745_v6 = vmax.f32 %v1726_v0, 0.0  ;;  %v3277_v46 = vld [vmem:[%s3678_s16 + $0x50] sm:$0xff] }
 0x3df   : > { %1985 = vmatpush.bf16.msra.mxu2 %v3277_v46 }
 0x3e0   : > { %v1753_v24 = vpack.c.bf16 %v1746_v37, %v1745_v6 }
 0x3e3   : > { %v1742_v56 = vpop.f32.mrf.mxu3 }
 0x3e4   : > { %v1743_v27 = vadd.f32 %v1742_v56, %v3810_v18  ;;  %v1755_v56 = vpack.c.bf16 %v1750_v39, %v1749_v50 }
 0x3e5   : > { %v1856_v20 = vpop.f32.mrf.mxu1 }
 0x3e6   : > { %v1752_v10 = vmax.f32 %v1743_v27, 0.0 }
 0x3e8   : > { %v1756_v9 = vpack.c.bf16 %v1752_v10, %v1751_v52  ;;  %v1747_v10 = vmax.f32 %v1731_v2, 0.0 }
 0x3e9   : > { %3100 = vmatmul.msk.bf16.gmra.mxu2 %vm700_vm1, %v4429_v25 }
 0x3ea   : > { %1761 = vmatpush.bf16.msrb.mxu0 %v1756_v9  ;;  %v1754_v52 = vpack.c.bf16 %v1748_v8, %v1747_v10 }
 0x3ed   : > { %v1858_v27 = vpop.f32.mrf.mxu1 }
 0x3ee   : > { %1762 = vmatpush.bf16.msrb.mxu0 %v1755_v56  ;;  %v1859_v4 = vadd.f32 %v1858_v27, %v3820_v30 }
 0x3f2   : > { %1763 = vmatpush.bf16.msrb.mxu0 %v1754_v52 }
 0x3f5   : > { %v1861_v29 = vpop.f32.mrf.mxu1 }
 0x3f6   : > { %1764 = vmatpush.bf16.msrb.mxu0 %v1753_v24  ;;  %v1862_v46 = vadd.f32 %v1861_v29, %v3804_v15  ;;  %v1877_v29 = vmax.f32 %v1859_v4, 0.0 }
 0x3f8   : > { %v1878_v28 = vmax.f32 %v1862_v46, 0.0 }
 0x3f9   : > { %3101 = vmatmul.msk.bf16.gmra.mxu2 %vm700_vm1, %v4439_v58  ;;  %3115 = vmatmul.msk.bf16.vlgmr.msrb.gmra.mxu0 %vm700_vm1, %v4388_v5 }
 0x3fd   : > { %v1863_v44 = vpop.f32.mrf.mxu1 }
 0x3fe   : > { %v1864_v10 = vadd.f32 %v1863_v44, %v3813_v22 }
 0x405   : > { %v1866_v39 = vpop.f32.mrf.mxu1 }
 0x406   : > { %v1867_v8 = vadd.f32 %v1866_v39, %v3800_v12  ;;  %v4475_v39 = vld [vmem:[%s5304_s3 + $0x38] sm:$0xff] }
 0x408   : > { %v1880_v43 = vmax.f32 %v1867_v8, 0.0 }
 0x409   : > { %3102 = vmatmul.msk.bf16.gmra.mxu2 %vm700_vm1, %v4448_v54  ;;  %3116 = vmatmul.msk.bf16.gmra.mxu0 %vm700_vm1, %v4401_v40 }
 0x40d   : > { %v1868_v24 = vpop.f32.mrf.mxu1 }
 0x40e   : > { %v1869_v50 = vadd.f32 %v1868_v24, %v3806_v17  ;;  %v1857_v24 = vadd.f32 %v1856_v20, %v3826_v41 }
 0x410   : > { %v1881_v37 = vmax.f32 %v1869_v50, 0.0  ;;  %v1876_v27 = vmax.f32 %v1857_v24, 0.0 }
 0x412   : > { %v1886_v21 = vpack.c.bf16 %v1881_v37, %v1880_v43  ;;  %v1884_v43 = vpack.c.bf16 %v1877_v29, %v1876_v27 }
 0x415   : > { %v1871_v6 = vpop.f32.mrf.mxu1 }
 0x416   : > { %v1872_v9 = vadd.f32 %v1871_v6, %v3802_v13  ;;  %v1879_v6 = vmax.f32 %v1864_v10, 0.0 }
 0x418   : > { %v1882_v56 = vmax.f32 %v1872_v9, 0.0  ;;  %v1885_v44 = vpack.c.bf16 %v1879_v6, %v1878_v28 }
 0x419   : > { %3103 = vmatmul.msk.bf16.gmra.mxu2 %vm700_vm1, %v4458_v35  ;;  %3117 = vmatmul.msk.bf16.gmra.mxu0 %vm700_vm1, %v4413_v3 }
 0x41d   : > { %v1873_v2 = vpop.f32.mrf.mxu1 }
 0x41e   : > { %v1874_v47 = vadd.f32 %v1873_v2, %v3810_v18 }
 0x420   : > { %v1883_v0 = vmax.f32 %v1874_v47, 0.0 }
 0x422   : > { %v1887_v52 = vpack.c.bf16 %v1883_v0, %v1882_v56  ;;  %v3278_v56 = vld [vmem:[%s3678_s16 + $0x58] sm:$0xff] }
 0x423   : > { %2116 = vmatpush.bf16.msra.mxu0 %v3278_v56 }
 0x424   : > { %1892 = vmatpush.bf16.msrb.mxu3 %v1887_v52 }
 0x428   : > { %1893 = vmatpush.bf16.msrb.mxu3 %v1886_v21 }
 0x429   : > { %3104 = vmatmul.msk.bf16.gmra.mxu2 %vm700_vm1, %v4475_v39  ;;  %3118 = vmatmul.msk.bf16.gmra.mxu0 %vm700_vm1, %v4429_v25 }
 0x42c   : > { %1894 = vmatpush.bf16.msrb.mxu3 %v1885_v44 }
 0x430   : > { %1895 = vmatpush.bf16.msrb.mxu3 %v1884_v43 }
 0x433   : > { %3133 = vmatmul.msk.bf16.vlgmr.msrb.gmra.mxu3 %vm700_vm1, %v4388_v5 }
 0x439   : > { %3119 = vmatmul.msk.bf16.gmra.mxu0 %vm700_vm1, %v4439_v58  ;;  %3147 = vmatmul.msk.bf16.vlgmr.msra.gmra.mxu2 %vm606_vm0, %v4226_v14 }
 0x43c   : > { %v1635_v21 = vpop.f32.mrf.mxu2 }
 0x43d   : > { %v1636_v20 = vadd.f32 %v1635_v21, %v3942_v31 }
 0x43f   : > { %v1675_v9 = vmax.f32 %v1636_v20, 0.0 }
 0x441   : > { %v1691_v28 = vmax.f32 %v4329_v26, %v1675_v9 }
 0x443   : > { %3134 = vmatmul.msk.bf16.gmra.mxu3 %vm700_vm1, %v4401_v40 }
 0x444   : > { %v4491_v4 = vpop.f32.mrf.mxu2 }
 0x449   : > { %3120 = vmatmul.msk.bf16.gmra.mxu0 %vm700_vm1, %v4448_v54  ;;  %3148 = vmatmul.msk.bf16.gmra.mxu2 %vm606_vm0, %v4241_v51 }
 0x44c   : > { %v1640_v2 = vpop.f32.mrf.mxu2 }
 0x44d   : > { %v1641_v50 = vadd.f32 %v1640_v2, %v3955_v45 }
 0x44f   : > { %v1677_v47 = vmax.f32 %v1641_v50, 0.0 }
 0x451   : > { %v1693_v8 = vmax.f32 %v4341_v53, %v1677_v47 }
 0x453   : > { %3135 = vmatmul.msk.bf16.gmra.mxu3 %vm700_vm1, %v4413_v3 }
 0x454   : > { %v4501_v26 = vpop.f32.mrf.mxu2 }
 0x455   : > { %5367 = vst [vmem:[#allocation54_spill] sm:$0xff] %v4501_v26 }
 0x459   : > { %3121 = vmatmul.msk.bf16.gmra.mxu0 %vm700_vm1, %v4458_v35  ;;  %3149 = vmatmul.msk.bf16.gmra.mxu2 %vm606_vm0, %v4257_v7 }
 0x45c   : > { %v1645_v0 = vpop.f32.mrf.mxu2 }
 0x45d   : > { %v1646_v10 = vadd.f32 %v1645_v0, %v3971_v61 }
 0x45f   : > { %v1679_v37 = vmax.f32 %v1646_v10, 0.0 }
 0x461   : > { %v1695_v52 = vmax.f32 %v4353_v16, %v1679_v37 }
 0x463   : > { %3136 = vmatmul.msk.bf16.gmra.mxu3 %vm700_vm1, %v4429_v25 }
 0x464   : > { %v4512_v53 = vpop.f32.mrf.mxu2 }
 0x465   : > { %5368 = vst [vmem:[#allocation55_spill] sm:$0xff] %v4512_v53 }
 0x469   : > { %3122 = vmatmul.msk.bf16.gmra.mxu0 %vm700_vm1, %v4475_v39  ;;  %3150 = vmatmul.msk.bf16.gmra.mxu2 %vm606_vm0, %v4272_v34 }
 0x46c   : > { %v1650_v46 = vpop.f32.mrf.mxu2 }
 0x46d   : > { %v1651_v6 = vadd.f32 %v1650_v46, %v3989_v11 }
 0x46f   : > { %v1681_v24 = vmax.f32 %v1651_v6, 0.0 }
 0x471   : > { %v1697_v29 = vmax.f32 %v4363_v49, %v1681_v24 }
 0x473   : > { %3137 = vmatmul.msk.bf16.gmra.mxu3 %vm700_vm1, %v4439_v58 }
 0x474   : > { %v4522_v16 = vpop.f32.mrf.mxu2 }
 0x475   : > { %5369 = vst [vmem:[#allocation56_spill] sm:$0xff] %v4522_v16 }
 0x476   : > { %v1766_v44 = vpop.f32.mrf.mxu0 }
 0x477   : > { %v1767_v27 = vadd.f32 %v1766_v44, %v3942_v31 }
 0x479   : > { %v1806_v43 = vmax.f32 %v1767_v27, 0.0  ;;  %3165 = vmatmul.msk.bf16.vlgmr.msra.gmra.mxu0 %vm606_vm0, %v4226_v14 }
 0x47b   : > { %v1822_v21 = vmax.f32 %v1691_v28, %v1806_v43  ;;  %v3279_v28 = vld [vmem:[%s3678_s16 + $0x60] sm:$0xff] }
 0x47c   : > { %v1655_v20 = vpop.f32.mrf.mxu2  ;;  %2247 = vmatpush.bf16.msra.mxu3 %v3279_v28 }
 0x47d   : > { %v1656_v9 = vadd.f32 %v1655_v20, %v4007_v38 }
 0x47e   : > { %v4528_v2 = vpop.f32.mrf.mxu0 }
 0x47f   : > { %v1683_v49 = vmax.f32 %v1656_v9, 0.0 }
 0x481   : > { %v1699_v50 = vmax.f32 %v4377_v59, %v1683_v49 }
 0x483   : > { %3138 = vmatmul.msk.bf16.gmra.mxu3 %vm700_vm1, %v4448_v54 }
 0x484   : > { %v4533_v47 = vpop.f32.mrf.mxu2 }
 0x485   : > { %5370 = vst [vmem:[#allocation57_spill] sm:$0xff] %v4533_v47 }
 0x486   : > { %v1771_v56 = vpop.f32.mrf.mxu0 }
 0x487   : > { %v1772_v0 = vadd.f32 %v1771_v56, %v3955_v45 }
 0x489   : > { %v1808_v10 = vmax.f32 %v1772_v0, 0.0  ;;  %3166 = vmatmul.msk.bf16.gmra.mxu0 %vm606_vm0, %v4241_v51 }
 0x48b   : > { %v1824_v37 = vmax.f32 %v1693_v8, %v1808_v10 }
 0x48c   : > { %v1660_v46 = vpop.f32.mrf.mxu2 }
 0x48d   : > { %v1661_v6 = vadd.f32 %v1660_v46, %v4032_v33 }
 0x48e   : > { %v4540_v24 = vpop.f32.mrf.mxu0 }
 0x48f   : > { %5371 = vst [vmem:[#allocation58_spill] sm:$0xff] %v4540_v24  ;;  %v1685_v59 = vmax.f32 %v1661_v6, 0.0 }
 0x491   : > { %v1701_v44 = vmax.f32 %v4393_v57, %v1685_v59 }
 0x493   : > { %3139 = vmatmul.msk.bf16.gmra.mxu3 %vm700_vm1, %v4458_v35 }
 0x494   : > { %v4545_v27 = vpop.f32.mrf.mxu2 }
 0x495   : > { %5372 = vst [vmem:[#allocation59_spill] sm:$0xff] %v4545_v27 }
 0x496   : > { %v1776_v43 = vpop.f32.mrf.mxu0 }
 0x497   : > { %v1777_v20 = vadd.f32 %v1776_v43, %v3971_v61 }
 0x499   : > { %v1810_v9 = vmax.f32 %v1777_v20, 0.0  ;;  %3167 = vmatmul.msk.bf16.gmra.mxu0 %vm606_vm0, %v4257_v7 }
 0x49b   : > { %v1826_v8 = vmax.f32 %v1695_v52, %v1810_v9 }
 0x49c   : > { %v1665_v49 = vpop.f32.mrf.mxu2 }
 0x49d   : > { %v1666_v56 = vadd.f32 %v1665_v49, %v4060_v48 }
 0x49e   : > { %v4551_v0 = vpop.f32.mrf.mxu0 }
 0x49f   : > { %5373 = vst [vmem:[#allocation60_spill] sm:$0xff] %v4551_v0  ;;  %v1687_v10 = vmax.f32 %v1666_v56, 0.0 }
 0x4a1   : > { %v1703_v57 = vmax.f32 %v4405_v23, %v1687_v10 }
 0x4a3   : > { %3140 = vmatmul.msk.bf16.gmra.mxu3 %vm700_vm1, %v4475_v39 }
 0x4a4   : > { %v4556_v28 = vpop.f32.mrf.mxu2 }
 0x4a5   : > { %5374 = vst [vmem:[#allocation61_spill] sm:$0xff] %v4556_v28 }
 0x4a6   : > { %v1781_v46 = vpop.f32.mrf.mxu0 }
 0x4a7   : > { %v1782_v6 = vadd.f32 %v1781_v46, %v3989_v11 }
 0x4a9   : > { %v1812_v59 = vmax.f32 %v1782_v6, 0.0  ;;  %3168 = vmatmul.msk.bf16.gmra.mxu0 %vm606_vm0, %v4272_v34 }
 0x4ab   : > { %v1828_v52 = vmax.f32 %v1697_v29, %v1812_v59 }
 0x4ac   : > { %v1670_v43 = vpop.f32.mrf.mxu2 }
 0x4ad   : > { %v1671_v20 = vadd.f32 %v1670_v43, %v4087_v62 }
 0x4ae   : > { %v4562_v9 = vpop.f32.mrf.mxu0 }
 0x4af   : > { %5375 = vst [vmem:[#allocation62_spill] sm:$0xff] %v4562_v9  ;;  %v1689_v49 = vmax.f32 %v1671_v20, 0.0 }
 0x4b1   : > { %v1705_v23 = vmax.f32 %v4417_v42, %v1689_v49 }
 0x4b3   : > { %3183 = vmatmul.msk.bf16.vlgmr.msra.gmra.mxu3 %vm606_vm0, %v4226_v14 }
 0x4b4   : > { %v4567_v56 = vpop.f32.mrf.mxu2 }
 0x4b5   : > { %5376 = vst [vmem:[#allocation63_spill] sm:$0xff] %v4567_v56 }
 0x4b6   : > { %v1786_v10 = vpop.f32.mrf.mxu0  ;;  %v1897_v46 = vpop.f32.mrf.mxu3 }
 0x4b7   : > { %v1787_v6 = vadd.f32 %v1786_v10, %v4007_v38  ;;  %v1898_v28 = vadd.f32 %v1897_v46, %v3942_v31 }
 0x4b9   : > { %v1814_v29 = vmax.f32 %v1787_v6, 0.0  ;;  %v1937_v59 = vmax.f32 %v1898_v28, 0.0 }
 0x4bb   : > { %v1830_v27 = vmax.f32 %v1699_v50, %v1814_v29  ;;  %v4571_v43 = vmax.f32 %v1822_v21, %v1937_v59 }
 0x4bc   : > { %v4573_v47 = vpop.f32.mrf.mxu2 }
 0x4be   : > { %v4575_v20 = vpop.f32.mrf.mxu0  ;;  %v4577_v42 = vpop.f32.mrf.mxu3 }
 0x4bf   : > { %5377 = vst [vmem:[#allocation64_spill] sm:$0xff] %v4575_v20 }
 0x4c0   : > { %5378 = vst [vmem:[#allocation65_spill] sm:$0xff] %v4577_v42 }
 0x4c3   : > { %3184 = vmatmul.msk.bf16.gmra.mxu3 %vm606_vm0, %v4241_v51 }
 0x4c4   : > { %v1989_v14 = vpop.f32.mrf.mxu2 }
 0x4c6   : > { %v1791_v49 = vpop.f32.mrf.mxu0  ;;  %v1902_v56 = vpop.f32.mrf.mxu3 }
 0x4c7   : > { %v1792_v10 = vadd.f32 %v1791_v49, %v4032_v33  ;;  %v1903_v46 = vadd.f32 %v1902_v56, %v3955_v45 }
 0x4c9   : > { %v1816_v28 = vmax.f32 %v1792_v10, 0.0  ;;  %v1939_v50 = vmax.f32 %v1903_v46, 0.0 }
 0x4cb   : > { %v4583_v21 = vmax.f32 %v1701_v44, %v1816_v28  ;;  %v4585_v6 = vmax.f32 %v1824_v37, %v1939_v50 }
 0x4cc   : > { %v1992_v29 = vpop.f32.mrf.mxu2 }
 0x4ce   : > { %v4587_v59 = vpop.f32.mrf.mxu0  ;;  %v4589_v20 = vpop.f32.mrf.mxu3 }
 0x4cf   : > { %5379 = vst [vmem:[#allocation66_spill] sm:$0xff] %v4587_v59 }
 0x4d0   : > { %5380 = vst [vmem:[#allocation67_spill] sm:$0xff] %v4589_v20 }
 0x4d3   : > { %3185 = vmatmul.msk.bf16.gmra.mxu3 %vm606_vm0, %v4257_v7 }
 0x4d4   : > { %v1994_v51 = vpop.f32.mrf.mxu2 }
 0x4d6   : > { %v1796_v9 = vpop.f32.mrf.mxu0  ;;  %v1907_v16 = vpop.f32.mrf.mxu3 }
 0x4d7   : > { %v1797_v49 = vadd.f32 %v1796_v9, %v4060_v48  ;;  %v1908_v56 = vadd.f32 %v1907_v16, %v3971_v61 }
 0x4d9   : > { %v1818_v10 = vmax.f32 %v1797_v49, 0.0  ;;  %v1941_v44 = vmax.f32 %v1908_v56, 0.0 }
 0x4db   : > { %v4595_v46 = vmax.f32 %v1703_v57, %v1818_v10  ;;  %v4597_v37 = vmax.f32 %v1826_v8, %v1941_v44 }
 0x4dc   : > { %v1997_v28 = vpop.f32.mrf.mxu2 }
 0x4de   : > { %v4599_v50 = vpop.f32.mrf.mxu0  ;;  %v4601_v59 = vpop.f32.mrf.mxu3 }
 0x4df   : > { %5381 = vst [vmem:[#allocation68_spill] sm:$0xff] %v4599_v50 }
 0x4e0   : > { %5382 = vst [vmem:[#allocation69_spill] sm:$0xff] %v4601_v59 }
 0x4e3   : > { %3186 = vmatmul.msk.bf16.gmra.mxu3 %vm606_vm0, %v4272_v34 }
 0x4e4   : > { %v1999_v7 = vpop.f32.mrf.mxu2 }
 0x4e5   : > { %v2000_v20 = vadd.f32 %v1999_v7, %v3806_v17 }
 0x4e6   : > { %v1801_v0 = vpop.f32.mrf.mxu0  ;;  %v1912_v53 = vpop.f32.mrf.mxu3 }
 0x4e7   : > { %v1802_v9 = vadd.f32 %v1801_v0, %v4087_v62  ;;  %v1913_v16 = vadd.f32 %v1912_v53, %v3989_v11  ;;  %v1998_v53 = vadd.f32 %v1997_v28, %v3800_v12 }
 0x4e9   : > { %v1820_v49 = vmax.f32 %v1802_v9, 0.0  ;;  %v1943_v57 = vmax.f32 %v1913_v16, 0.0  ;;  %v1995_v16 = vadd.f32 %v1994_v51, %v3813_v22 }
 0x4eb   : > { %v1836_v56 = vmax.f32 %v1705_v23, %v1820_v49  ;;  %v4607_v8 = vmax.f32 %v1828_v52, %v1943_v57  ;;  %v2012_v49 = vmax.f32 %v2000_v20, 0.0  ;;  %v2010_v1 = vmax.f32 %v1995_v16, 0.0 }
 0x4ec   : > { %v2002_v10 = vpop.f32.mrf.mxu2 }
 0x4ed   : > { %v2003_v59 = vadd.f32 %v2002_v10, %v3802_v13  ;;  %v1993_v10 = vadd.f32 %v1992_v29, %v3804_v15 }
 0x4ee   : > { %v4609_v44 = vpop.f32.mrf.mxu0  ;;  %v4611_v50 = vpop.f32.mrf.mxu3 }
 0x4ef   : > { %5383 = vst [vmem:[#allocation70_spill] sm:$0xff] %v4609_v44  ;;  %v2013_v23 = vmax.f32 %v2003_v59, 0.0  ;;  %v1988_v59 = vadd.f32 %v4573_v47, %v3826_v41  ;;  %v2009_v51 = vmax.f32 %v1993_v10, 0.0 }
 0x4f0   : > { %5384 = vst [vmem:[#allocation71_spill] sm:$0xff] %v4611_v50  ;;  %v2011_v50 = vmax.f32 %v1998_v53, 0.0 }
 0x4f2   : > { %v2017_v42 = vpack.c.bf16 %v2012_v49, %v2011_v50 }
 0x4f4   : > { %v2004_v34 = vpop.f32.mrf.mxu2 }
 0x4f5   : > { %v2005_v24 = vadd.f32 %v2004_v34, %v3810_v18  ;;  %v1990_v34 = vadd.f32 %v1989_v14, %v3820_v30 }
 0x4f6   : > { %v1917_v0 = vpop.f32.mrf.mxu3  ;;  %v4616_v26 = vpop.f32.mrf.mxu0 }
 0x4f7   : > { %v2014_v52 = vmax.f32 %v2005_v24, 0.0  ;;  %v1918_v9 = vadd.f32 %v1917_v0, %v4007_v38  ;;  %v2008_v20 = vmax.f32 %v1990_v34, 0.0  ;;  %v2016_v0 = vpack.c.bf16 %v2010_v1, %v2009_v51 }
 0x4f9   : > { %v2018_v57 = vpack.c.bf16 %v2014_v52, %v2013_v23  ;;  %v1945_v44 = vmax.f32 %v1918_v9, 0.0  ;;  %v2007_v23 = vmax.f32 %v1988_v59, 0.0 }
 0x4fb   : > { %v4622_v7 = vmax.f32 %v1830_v27, %v1945_v44  ;;  %2023 = vmatpush.bf16.msra.mxu1 %v2018_v57  ;;  %v2015_v29 = vpack.c.bf16 %v2008_v20, %v2007_v23 }
 0x4fe   : > { %v4625_v28 = vpop.f32.mrf.mxu3  ;;  %v2120_v24 = vpop.f32.mrf.mxu0 }
 0x4ff   : > { %2024 = vmatpush.bf16.msra.mxu1 %v2017_v42 }
 0x503   : > { %2025 = vmatpush.bf16.msra.mxu1 %v2016_v0 }
 0x506   : > { %v1922_v27 = vpop.f32.mrf.mxu3  ;;  %v2123_v44 = vpop.f32.mrf.mxu0 }
 0x507   : > { %v1923_v53 = vadd.f32 %v1922_v27, %v4032_v33  ;;  %2026 = vmatpush.bf16.msra.mxu1 %v2015_v29 }
 0x509   : > { %v1947_v14 = vmax.f32 %v1923_v53, 0.0 }
 0x50a   : > { %3151 = vmatmul.msk.bf16.vlgmr.msra.gmra.mxu1 %vm700_vm1, %v4388_v5 }
 0x50b   : > { %v4633_v50 = vmax.f32 %v4583_v21, %v1947_v14 }
 0x50e   : > { %v4635_v47 = vpop.f32.mrf.mxu3  ;;  %v2125_v42 = vpop.f32.mrf.mxu0 }
 0x50f   : > { %5385 = vst [vmem:[#allocation72_spill] sm:$0xff] %v4635_v47 }
 0x516   : > { %v1927_v52 = vpop.f32.mrf.mxu3  ;;  %v2128_v1 = vpop.f32.mrf.mxu0 }
 0x517   : > { %v1928_v9 = vadd.f32 %v1927_v52, %v4060_v48  ;;  %v2129_v53 = vadd.f32 %v2128_v1, %v3800_v12 }
 0x519   : > { %v1949_v16 = vmax.f32 %v1928_v9, 0.0  ;;  %v2126_v9 = vadd.f32 %v2125_v42, %v3813_v22 }
 0x51a   : > { %3152 = vmatmul.msk.bf16.gmra.mxu1 %vm700_vm1, %v4401_v40 }
 0x51b   : > { %v4641_v49 = vmax.f32 %v4595_v46, %v1949_v16 }
 0x51e   : > { %v4643_v57 = vpop.f32.mrf.mxu3  ;;  %v2130_v10 = vpop.f32.mrf.mxu0 }
 0x51f   : > { %5386 = vst [vmem:[#allocation73_spill] sm:$0xff] %v4643_v57  ;;  %v2131_v46 = vadd.f32 %v2130_v10, %v3806_v17  ;;  %v2119_v10 = vadd.f32 %v4616_v26, %v3826_v41 }
 0x521   : > { %v2143_v16 = vmax.f32 %v2131_v46, 0.0 }
 0x526   : > { %v1932_v34 = vpop.f32.mrf.mxu3  ;;  %v2133_v21 = vpop.f32.mrf.mxu0 }
 0x527   : > { %v1933_v59 = vadd.f32 %v1932_v34, %v4087_v62  ;;  %v2134_v0 = vadd.f32 %v2133_v21, %v3802_v13 }
 0x529   : > { %v1951_v51 = vmax.f32 %v1933_v59, 0.0  ;;  %v2144_v14 = vmax.f32 %v2134_v0, 0.0  ;;  %v2142_v59 = vmax.f32 %v2129_v53, 0.0  ;;  %v2138_v0 = vmax.f32 %v2119_v10, 0.0 }
 0x52a   : > { %3153 = vmatmul.msk.bf16.gmra.mxu1 %vm700_vm1, %v4413_v3 }
 0x52b   : > { %v4648_v20 = vmax.f32 %v1836_v56, %v1951_v51  ;;  %v2124_v56 = vadd.f32 %v2123_v44, %v3804_v15  ;;  %v2121_v51 = vadd.f32 %v2120_v24, %v3820_v30  ;;  %v2148_v57 = vpack.c.bf16 %v2143_v16, %v2142_v59 }
 0x52d   : > { %v2139_v42 = vmax.f32 %v2121_v51, 0.0 }
 0x52e   : > { %v4651_v23 = vpop.f32.mrf.mxu3  ;;  %v2135_v29 = vpop.f32.mrf.mxu0 }
 0x52f   : > { %5387 = vst [vmem:[#allocation74_spill] sm:$0xff] %v4651_v23  ;;  %v2136_v27 = vadd.f32 %v2135_v29, %v3810_v18  ;;  %v2141_v23 = vmax.f32 %v2126_v9, 0.0  ;;  %v2140_v29 = vmax.f32 %v2124_v56, 0.0  ;;  %v2146_v46 = vpack.c.bf16 %v2139_v42, %v2138_v0 }
 0x531   : > { %v2145_v52 = vmax.f32 %v2136_v27, 0.0  ;;  %v2147_v1 = vpack.c.bf16 %v2141_v23, %v2140_v29  ;;  %v3280_v27 = vld [vmem:[%s3678_s16 + $0x68] sm:$0xff] }
 0x532   : > { %2378 = vmatpush.bf16.msrb.mxu1 %v3280_v27 }
 0x533   : > { %v2149_v34 = vpack.c.bf16 %v2145_v52, %v2144_v14 }
 0x535   : > { %2154 = vmatpush.bf16.msrb.mxu2 %v2149_v34 }
 0x536   : > { %v2249_v21 = vpop.f32.mrf.mxu3 }
 0x537   : > { %v2250_v27 = vadd.f32 %v2249_v21, %v3826_v41 }
 0x539   : > { %2155 = vmatpush.bf16.msrb.mxu2 %v2148_v57 }
 0x53a   : > { %3154 = vmatmul.msk.bf16.gmra.mxu1 %vm700_vm1, %v4429_v25 }
 0x53d   : > { %2156 = vmatpush.bf16.msrb.mxu2 %v2147_v1 }
 0x53e   : > { %v2251_v44 = vpop.f32.mrf.mxu3 }
 0x53f   : > { %v2252_v0 = vadd.f32 %v2251_v44, %v3820_v30 }
 0x541   : > { %2157 = vmatpush.bf16.msrb.mxu2 %v2146_v46 }
 0x544   : > { %3169 = vmatmul.msk.bf16.vlgmr.msrb.gmra.mxu2 %vm700_vm1, %v4388_v5 }
 0x546   : > { %v2254_v24 = vpop.f32.mrf.mxu3 }
 0x547   : > { %v2255_v42 = vadd.f32 %v2254_v24, %v3804_v15 }
 0x54a   : > { %3155 = vmatmul.msk.bf16.gmra.mxu1 %vm700_vm1, %v4439_v58 }
 0x54e   : > { %v2256_v26 = vpop.f32.mrf.mxu3 }
 0x54f   : > { %v2257_v51 = vadd.f32 %v2256_v26, %v3813_v22  ;;  %v2270_v26 = vmax.f32 %v2252_v0, 0.0  ;;  %v4727_v0 = vld [vmem:[%s5302_s1 + $0x10] sm:$0xff] }
 0x551   : > { %v2272_v46 = vmax.f32 %v2257_v51, 0.0  ;;  %v4711_v51 = vld [vmem:[%s5302_s1 + $0x8] sm:$0xff] }
 0x554   : > { %3170 = vmatmul.msk.bf16.gmra.mxu2 %vm700_vm1, %v4401_v40 }
 0x556   : > { %v2259_v57 = vpop.f32.mrf.mxu3 }
 0x557   : > { %v2260_v34 = vadd.f32 %v2259_v57, %v3800_v12  ;;  %v2271_v57 = vmax.f32 %v2255_v42, 0.0 }
 0x559   : > { %v2273_v1 = vmax.f32 %v2260_v34, 0.0 }
 0x55a   : > { %3156 = vmatmul.msk.bf16.gmra.mxu1 %vm700_vm1, %v4448_v54 }
 0x55e   : > { %v2261_v23 = vpop.f32.mrf.mxu3 }
 0x55f   : > { %v2262_v9 = vadd.f32 %v2261_v23, %v3806_v17 }
 0x561   : > { %v2274_v10 = vmax.f32 %v2262_v9, 0.0  ;;  %v4696_v9 = vld [vmem:[%s5302_s1] sm:$0xff] }
 0x563   : > { %v2279_v23 = vpack.c.bf16 %v2274_v10, %v2273_v1 }
 0x564   : > { %3171 = vmatmul.msk.bf16.gmra.mxu2 %vm700_vm1, %v4413_v3 }
 0x566   : > { %v2264_v53 = vpop.f32.mrf.mxu3 }
 0x567   : > { %v2265_v14 = vadd.f32 %v2264_v53, %v3802_v13  ;;  %v2278_v53 = vpack.c.bf16 %v2272_v46, %v2271_v57  ;;  %v4742_v57 = vld [vmem:[%s5302_s1 + $0x18] sm:$0xff] }
 0x569   : > { %v2275_v56 = vmax.f32 %v2265_v14, 0.0  ;;  %v2269_v14 = vmax.f32 %v2250_v27, 0.0 }
 0x56a   : > { %3157 = vmatmul.msk.bf16.gmra.mxu1 %vm700_vm1, %v4458_v35 }
 0x56e   : > { %v2266_v52 = vpop.f32.mrf.mxu3 }
 0x56f   : > { %v2267_v16 = vadd.f32 %v2266_v52, %v3810_v18  ;;  %v2277_v52 = vpack.c.bf16 %v2270_v26, %v2269_v14 }
 0x571   : > { %v2276_v59 = vmax.f32 %v2267_v16, 0.0 }
 0x573   : > { %v2280_v29 = vpack.c.bf16 %v2276_v59, %v2275_v56 }
 0x574   : > { %3172 = vmatmul.msk.bf16.gmra.mxu2 %vm700_vm1, %v4429_v25 }
 0x575   : > { %2285 = vmatpush.bf16.msrb.mxu0 %v2280_v29  ;;  %v3281_v29 = vld [vmem:[%s3678_s16 + $0x70] sm:$0xff] }
 0x576   : > { %2509 = vmatpush.bf16.msra.mxu2 %v3281_v29 }
 0x579   : > { %2286 = vmatpush.bf16.msrb.mxu0 %v2279_v23 }
 0x57a   : > { %3158 = vmatmul.msk.bf16.gmra.mxu1 %vm700_vm1, %v4475_v39 }
 0x57d   : > { %2287 = vmatpush.bf16.msrb.mxu0 %v2278_v53 }
 0x581   : > { %2288 = vmatpush.bf16.msrb.mxu0 %v2277_v52 }
 0x584   : > { %3173 = vmatmul.msk.bf16.gmra.mxu2 %vm700_vm1, %v4439_v58  ;;  %3187 = vmatmul.msk.bf16.vlgmr.msrb.gmra.mxu0 %vm700_vm1, %v4388_v5 }
 0x587   : > { %v2028_v44 = vpop.f32.mrf.mxu1 }
 0x588   : > { %v2029_v21 = vadd.f32 %v2028_v44, %v3942_v31 }
 0x58a   : > { %v2068_v24 = vmax.f32 %v2029_v21, 0.0  ;;  %3201 = vmatmul.msk.bf16.vlgmr.msrb.gmra.mxu1 %vm606_vm0, %v4696_v9 }
 0x58c   : > { %v2084_v16 = vmax.f32 %v4571_v43, %v2068_v24 }
 0x58f   : > { %v4701_v34 = vpop.f32.mrf.mxu1 }
 0x594   : > { %3174 = vmatmul.msk.bf16.gmra.mxu2 %vm700_vm1, %v4448_v54  ;;  %3188 = vmatmul.msk.bf16.gmra.mxu0 %vm700_vm1, %v4401_v40 }
 0x597   : > { %v2033_v5 = vpop.f32.mrf.mxu1 }
 0x598   : > { %v2034_v56 = vadd.f32 %v2033_v5, %v3955_v45 }
 0x59a   : > { %v2070_v59 = vmax.f32 %v2034_v56, 0.0  ;;  %3202 = vmatmul.msk.bf16.gmra.mxu1 %vm606_vm0, %v4711_v51 }
 0x59c   : > { %v2086_v43 = vmax.f32 %v4585_v6, %v2070_v59 }
 0x59f   : > { %v4716_v10 = vpop.f32.mrf.mxu1 }
 0x5a4   : > { %3175 = vmatmul.msk.bf16.gmra.mxu2 %vm700_vm1, %v4458_v35  ;;  %3189 = vmatmul.msk.bf16.gmra.mxu0 %vm700_vm1, %v4413_v3 }
 0x5a7   : > { %v2038_v40 = vpop.f32.mrf.mxu1 }
 0x5a8   : > { %v2039_v42 = vadd.f32 %v2038_v40, %v3971_v61 }
 0x5aa   : > { %v2072_v1 = vmax.f32 %v2039_v42, 0.0  ;;  %3203 = vmatmul.msk.bf16.gmra.mxu1 %vm606_vm0, %v4727_v0 }
 0x5ac   : > { %v2088_v6 = vmax.f32 %v4597_v37, %v2072_v1 }
 0x5af   : > { %v4732_v46 = vpop.f32.mrf.mxu1 }
 0x5b4   : > { %3176 = vmatmul.msk.bf16.gmra.mxu2 %vm700_vm1, %v4475_v39  ;;  %3190 = vmatmul.msk.bf16.gmra.mxu0 %vm700_vm1, %v4429_v25 }
 0x5b7   : > { %v2043_v3 = vpop.f32.mrf.mxu1 }
 0x5b8   : > { %v2044_v23 = vadd.f32 %v2043_v3, %v3989_v11 }
 0x5ba   : > { %v2074_v27 = vmax.f32 %v2044_v23, 0.0  ;;  %3204 = vmatmul.msk.bf16.gmra.mxu1 %vm606_vm0, %v4742_v57 }
 0x5bc   : > { %v2090_v37 = vmax.f32 %v4607_v8, %v2074_v27 }
 0x5bf   : > { %v4747_v26 = vpop.f32.mrf.mxu1 }
 0x5c4   : > { %3191 = vmatmul.msk.bf16.gmra.mxu0 %vm700_vm1, %v4439_v58  ;;  %3219 = vmatmul.msk.bf16.vlgmr.msra.gmra.mxu2 %vm606_vm0, %v4696_v9  ;;  %v3282_v58 = vld [vmem:[%s3678_s16 + $0x78] sm:$0xff]  ;;  %s2817_s16 = scalar_lea.hbm %s5306_s5, %s3252_s11 }
 0x5c5   : > { %2640 = vmatpush.bf16.msra.mxu0 %v3282_v58  ;;  %s2820_s6 = sshll.u32 %s2817_s16, 4  ;;  %s2821_s6 = int_to_ptr.hbm [resolvable:$true] %s2820_s6 }
 0x5c6   : > { %s3398_s22 = sshra.s32 %s2821_s6, 4  ;;  %s3399_s22 = int_to_ptr.hbm [resolvable:$true] %s3398_s22 }
 0x5c7   : > { %v2048_v25 = vpop.f32.mrf.mxu1  ;;  %v2159_v53 = vpop.f32.mrf.mxu2  ;;  %s3400_s10 = scalar_lea.hbm %s3399_s22, 128  ;;  %p3405_p4 = scmp.lt.s32.totalorder %s3399_s22, %s5306_s5 }
 0x5c8   : > { %v2049_v14 = vadd.f32 %v2048_v25, %v4007_v38  ;;  %v2160_v52 = vadd.f32 %v2159_v53, %v3942_v31  ;;  %p3401_p1 = scmp.ne.s32.totalorder %s3399_s22, %s3400_s10  ;;  %p3406_p5 = scmp.lt.s32.totalorder %s3404_s17, %s3400_s10 }
 0x5ca   : > { %v2076_v44 = vmax.f32 %v2049_v14, 0.0  ;;  %v2199_v21 = vmax.f32 %v2160_v52, 0.0  ;;  %p3402_p2 = pnand %p3401_p1, %p3573_p8  ;;  %p3407_p6 = por %p3406_p5, %p3405_p4 }
 0x5cc   : > { %v4756_v24 = vmax.f32 %v4622_v7, %v2076_v44  ;;  %v4758_v8 = vmax.f32 %v2084_v16, %v2199_v21  ;;  %p3403_p3 = pneg %p3402_p2 }
 0x5ce   : > { %p3408_p7 = pnand %p3407_p6, %p3403_p3 }
 0x5cf   : > { %v4760_v5 = vpop.f32.mrf.mxu1  ;;  %v2161_v56 = vpop.f32.mrf.mxu2 }
 0x5d4   : > { %3192 = vmatmul.msk.bf16.gmra.mxu0 %vm700_vm1, %v4448_v54  ;;  %3220 = vmatmul.msk.bf16.gmra.mxu2 %vm606_vm0, %v4711_v51 }
 0x5d7   : > { %v2053_v59 = vpop.f32.mrf.mxu1  ;;  %v2164_v29 = vpop.f32.mrf.mxu2 }
 0x5d8   : > { %v2054_v40 = vadd.f32 %v2053_v59, %v4032_v33  ;;  %v2165_v7 = vadd.f32 %v2164_v29, %v3955_v45  ;;  %v1245_v59 = vadd.f32 %v4231_v60, %v3959_v55  ;;  %v1638_v60 = vadd.f32 %v4491_v4, %v3959_v55 }
 0x5da   : > { %v2078_v42 = vmax.f32 %v2054_v40, 0.0  ;;  %v2201_v16 = vmax.f32 %v2165_v7, 0.0  ;;  %v1376_v40 = vadd.f32 %v4288_v36, %v3959_v55 }
 0x5dc   : > { %v4770_v1 = vmax.f32 %v4633_v50, %v2078_v42  ;;  %v4772_v3 = vmax.f32 %v2086_v43, %v2201_v16 }
 0x5df   : > { %v4774_v23 = vpop.f32.mrf.mxu1  ;;  %v4776_v54 = vpop.f32.mrf.mxu2 }
 0x5e0   : > { %5388 = vst [vmem:[#allocation75_spill] sm:$0xff] %v4774_v23 }
 0x5e4   : > { %3193 = vmatmul.msk.bf16.gmra.mxu0 %vm700_vm1, %v4458_v35  ;;  %3221 = vmatmul.msk.bf16.gmra.mxu2 %vm606_vm0, %v4727_v0  ;;  %v1114_v35 = vadd.f32 %v4106_v63, %v3959_v55  ;;  %v1283_v63 = vmax.f32 %v1245_v59, 0.0 }
 0x5e7   : > { %v2058_v27 = vpop.f32.mrf.mxu1  ;;  %v2169_v25 = vpop.f32.mrf.mxu2 }
 0x5e8   : > { %v2059_v53 = vadd.f32 %v2058_v27, %v4060_v48  ;;  %v2170_v14 = vadd.f32 %v2169_v25, %v3971_v61 }
 0x5ea   : > { %v2080_v50 = vmax.f32 %v2059_v53, 0.0  ;;  %v2203_v52 = vmax.f32 %v2170_v14, 0.0  ;;  %v1414_v53 = vmax.f32 %v1376_v40, 0.0 }
 0x5ec   : > { %v4785_v43 = vmax.f32 %v4641_v49, %v2080_v50  ;;  %v4787_v44 = vmax.f32 %v2088_v6, %v2203_v52  ;;  %v1152_v49 = vmax.f32 %v1114_v35, 0.0  ;;  %v1769_v35 = vadd.f32 %v4528_v2, %v3959_v55 }
 0x5ee   : > { %v1168_v25 = vmax.f32 %v4020_v19, %v1152_v49  ;;  %v1676_v19 = vmax.f32 %v1638_v60, 0.0  ;;  %v5391_v49 = vld [vmem:[#allocation65_spill] sm:$0xff] }
 0x5ef   : > { %v4789_v21 = vpop.f32.mrf.mxu1  ;;  %v4791_v58 = vpop.f32.mrf.mxu2 }
 0x5f0   : > { %5389 = vst [vmem:[#allocation76_spill] sm:$0xff] %v4789_v21  ;;  %v1299_v50 = vmax.f32 %v1168_v25, %v1283_v63  ;;  %v5393_v63 = vld [vmem:[#allocation23_spill] sm:$0xff] }
 0x5f4   : > { %3194 = vmatmul.msk.bf16.gmra.mxu0 %vm700_vm1, %v4475_v39  ;;  %3222 = vmatmul.msk.bf16.gmra.mxu2 %vm606_vm0, %v4742_v57  ;;  %v1507_v39 = vadd.f32 %v4334_v32, %v3959_v55 }
 0x5f6   : > { %v1545_v52 = vmax.f32 %v1507_v39, 0.0 }
 0x5f7   : > { %v2063_v29 = vpop.f32.mrf.mxu1  ;;  %v2174_v6 = vpop.f32.mrf.mxu2 }
 0x5f8   : > { %v2064_v7 = vadd.f32 %v2063_v29, %v4087_v62  ;;  %v2175_v42 = vadd.f32 %v2174_v6, %v3989_v11  ;;  %v1430_v29 = vmax.f32 %v1299_v50, %v1414_v53  ;;  %v1900_v6 = vadd.f32 %v5391_v49, %v3959_v55  ;;  %v5394_v53 = vld [vmem:[#allocation32_spill] sm:$0xff] }
 0x5fa   : > { %v2082_v16 = vmax.f32 %v2064_v7, 0.0  ;;  %v2205_v27 = vmax.f32 %v2175_v42, 0.0  ;;  %v1561_v40 = vmax.f32 %v1430_v29, %v1545_v52  ;;  %v5392_v42 = vld [vmem:[#allocation6_spill] sm:$0xff]  ;;  %v5395_v29 = vld [vmem:[#allocation37_spill] sm:$0xff] }
 0x5fb   : > { %v1119_v2 = vadd.f32 %v5393_v63, %v5392_v42  ;;  %v1250_v60 = vadd.f32 %v5394_v53, %v5392_v42  ;;  %v1381_v49 = vadd.f32 %v5395_v29, %v5392_v42  ;;  %v5396_v63 = vld [vmem:[#allocation44_spill] sm:$0xff]  ;;  %v5398_v29 = vld [vmem:[#allocation54_spill] sm:$0xff] }
 0x5fc   : > { %v4811_v14 = vmax.f32 %v4648_v20, %v2082_v16  ;;  %v4813_v36 = vmax.f32 %v2090_v37, %v2205_v27  ;;  %v1807_v20 = vmax.f32 %v1769_v35, 0.0  ;;  %v2031_v37 = vadd.f32 %v4701_v34, %v3959_v55 }
 0x5fd   : > { %v1692_v39 = vmax.f32 %v1561_v40, %v1676_v19  ;;  %v1938_v16 = vmax.f32 %v1900_v6, 0.0  ;;  %v2162_v27 = vadd.f32 %v2161_v56, %v3959_v55  ;;  %v1154_v35 = vmax.f32 %v1119_v2, 0.0  ;;  %v5397_v2 = vld [vmem:[#allocation13_spill] sm:$0xff] }
 0x5fe   : > { %v2069_v52 = vmax.f32 %v2031_v37, 0.0  ;;  %v1416_v53 = vmax.f32 %v1381_v49, 0.0 }
 0x5ff   : > { %v4817_v59 = vpop.f32.mrf.mxu1  ;;  %v4819_v32 = vpop.f32.mrf.mxu2  ;;  %v1823_v50 = vmax.f32 %v1692_v39, %v1807_v20  ;;  %v1512_v20 = vadd.f32 %v5396_v63, %v5392_v42 }
 0x600   : > { %5390 = vst [vmem:[#allocation77_spill] sm:$0xff] %v4817_v59  ;;  %v1643_v59 = vadd.f32 %v5398_v29, %v5392_v42 }
 0x601   : > { %v2290_v4 = vpop.f32.mrf.mxu0  ;;  %v1954_v56 = vmax.f32 %v1823_v50, %v1938_v16  ;;  %v1547_v50 = vmax.f32 %v1512_v20, 0.0 }
 0x602   : > { %v2291_v7 = vadd.f32 %v2290_v4, %v3942_v31  ;;  %v2200_v4 = vmax.f32 %v2162_v27, 0.0  ;;  %v1678_v49 = vmax.f32 %v1643_v59, 0.0 }
 0x603   : > { %v2085_v37 = vmax.f32 %v1954_v56, %v2069_v52 }
 0x604   : > { %v2330_v25 = vmax.f32 %v2291_v7, 0.0  ;;  %3237 = vmatmul.msk.bf16.vlgmr.msra.gmra.mxu0 %vm606_vm0, %v4696_v9  ;;  %v1285_v9 = vmax.f32 %v1250_v60, 0.0 }
 0x605   : > { %v2216_v21 = vmax.f32 %v2085_v37, %v2200_v4 }
 0x606   : > { %v4834_v34 = vmax.f32 %v4758_v8, %v2330_v25  ;;  %v1170_v25 = vmax.f32 %v5397_v2, %v1154_v35 }
 0x607   : > { %v2179_v19 = vpop.f32.mrf.mxu2  ;;  %v4838_v6 = vpop.f32.mrf.mxu1 }
 0x608   : > { %v2180_v40 = vadd.f32 %v2179_v19, %v4007_v38  ;;  %v1301_v60 = vmax.f32 %v1170_v25, %v1285_v9  ;;  %v5399_v19 = vld [vmem:[#allocation58_spill] sm:$0xff]  ;;  %v2036_v9 = vadd.f32 %v4716_v10, %v5392_v42 }
 0x609   : > { %v2292_v7 = vpop.f32.mrf.mxu0  ;;  %v1774_v63 = vadd.f32 %v5399_v19, %v5392_v42 }
 0x60a   : > { %v2207_v39 = vmax.f32 %v2180_v40, 0.0  ;;  %v2293_v8 = vadd.f32 %v2292_v7, %v3959_v55  ;;  %v1432_v35 = vmax.f32 %v1301_v60, %v1416_v53  ;;  %v5401_v7 = vld [vmem:[#allocation67_spill] sm:$0xff]  ;;  %v2167_v53 = vadd.f32 %v4776_v54, %v5392_v42 }
 0x60b   : > { %v1905_v4 = vadd.f32 %v5401_v7, %v5392_v42  ;;  %v2071_v19 = vmax.f32 %v2036_v9, 0.0 }
 0x60c   : > { %v4848_v16 = vmax.f32 %v4756_v24, %v2207_v39  ;;  %v2331_v27 = vmax.f32 %v2293_v8, 0.0  ;;  %v1563_v24 = vmax.f32 %v1432_v35, %v1547_v50  ;;  %v1809_v39 = vmax.f32 %v1774_v63, 0.0  ;;  %v5402_v8 = vld [vmem:[#allocation7_spill] sm:$0xff] }
 0x60d   : > { %v1940_v29 = vmax.f32 %v1905_v4, 0.0  ;;  %v5405_v35 = vld [vmem:[#allocation39_spill] sm:$0xff] }
 0x60e   : > { %v4852_v52 = vmax.f32 %v2216_v21, %v2331_v27  ;;  %v5403_v21 = vld [vmem:[#allocation25_spill] sm:$0xff]  ;;  %v1694_v25 = vmax.f32 %v1563_v24, %v1678_v49  ;;  %v1386_v49 = vadd.f32 %v5405_v35, %v5402_v8  ;;  %v5408_v35 = vld [vmem:[#allocation55_spill] sm:$0xff] }
 0x60f   : > { %v4854_v56 = vpop.f32.mrf.mxu2  ;;  %v4856_v40 = vpop.f32.mrf.mxu1  ;;  %v1124_v2 = vadd.f32 %v5403_v21, %v5402_v8  ;;  %v5404_v27 = vld [vmem:[#allocation33_spill] sm:$0xff]  ;;  %v5406_v21 = vld [vmem:[#allocation46_spill] sm:$0xff]  ;;  %v1648_v23 = vadd.f32 %v5408_v35, %v5402_v8 }
 0x610   : > { %5400 = vst [vmem:[#allocation65_spill] sm:$0xff] %v4854_v56  ;;  %v1255_v60 = vadd.f32 %v5404_v27, %v5402_v8  ;;  %v1825_v50 = vmax.f32 %v1694_v25, %v1809_v39  ;;  %v1517_v39 = vadd.f32 %v5406_v21, %v5402_v8  ;;  %v1418_v27 = vmax.f32 %v1386_v49, 0.0 }
 0x611   : > { %v2295_v37 = vpop.f32.mrf.mxu0  ;;  %v1156_v63 = vmax.f32 %v1124_v2, 0.0  ;;  %v5407_v2 = vld [vmem:[#allocation17_spill] sm:$0xff]  ;;  %v1680_v49 = vmax.f32 %v1648_v23, 0.0 }
 0x612   : > { %v2296_v20 = vadd.f32 %v2295_v37, %v3955_v45  ;;  %v1956_v54 = vmax.f32 %v1825_v50, %v1940_v29  ;;  %v2202_v37 = vmax.f32 %v2167_v53, 0.0  ;;  %v1549_v50 = vmax.f32 %v1517_v39, 0.0 }
 0x614   : > { %v2332_v59 = vmax.f32 %v2296_v20, 0.0  ;;  %3238 = vmatmul.msk.bf16.gmra.mxu0 %vm606_vm0, %v4711_v51  ;;  %v1287_v51 = vmax.f32 %v1255_v60, 0.0  ;;  %v2087_v9 = vmax.f32 %v1956_v54, %v2071_v19 }
 0x616   : > { %v4872_v10 = vmax.f32 %v4772_v3, %v2332_v59  ;;  %v1172_v59 = vmax.f32 %v5407_v2, %v1156_v63  ;;  %v2218_v47 = vmax.f32 %v2087_v9, %v2202_v37 }
 0x617   : > { %v2184_v7 = vpop.f32.mrf.mxu2  ;;  %v4876_v4 = vpop.f32.mrf.mxu1 }
 0x618   : > { %v2185_v24 = vadd.f32 %v2184_v7, %v4032_v33  ;;  %v1303_v60 = vmax.f32 %v1172_v59, %v1287_v51  ;;  %v5409_v7 = vld [vmem:[#allocation60_spill] sm:$0xff]  ;;  %v2041_v51 = vadd.f32 %v4732_v46, %v5402_v8 }
 0x619   : > { %v2297_v20 = vpop.f32.mrf.mxu0  ;;  %v1779_v21 = vadd.f32 %v5409_v7, %v5402_v8 }
 0x61a   : > { %v2209_v25 = vmax.f32 %v2185_v24, 0.0  ;;  %v2298_v3 = vadd.f32 %v2297_v20, %v5392_v42  ;;  %v1434_v63 = vmax.f32 %v1303_v60, %v1418_v27  ;;  %v5411_v20 = vld [vmem:[#allocation69_spill] sm:$0xff]  ;;  %v2172_v27 = vadd.f32 %v4791_v58, %v5402_v8 }
 0x61b   : > { %v1910_v37 = vadd.f32 %v5411_v20, %v5402_v8  ;;  %v2073_v7 = vmax.f32 %v2041_v51, 0.0 }
 0x61c   : > { %v4886_v29 = vmax.f32 %v4770_v1, %v2209_v25  ;;  %v2333_v53 = vmax.f32 %v2298_v3, 0.0  ;;  %v1565_v1 = vmax.f32 %v1434_v63, %v1549_v50  ;;  %v1811_v25 = vmax.f32 %v1779_v21, 0.0  ;;  %v5412_v3 = vld [vmem:[#allocation9_spill] sm:$0xff]  ;;  %v5415_v63 = vld [vmem:[#allocation42_spill] sm:$0xff] }
 0x61d   : > { %v1942_v35 = vmax.f32 %v1910_v37, 0.0  ;;  %v2204_v58 = vmax.f32 %v2172_v27, 0.0 }
 0x61e   : > { %v4890_v19 = vmax.f32 %v2218_v47, %v2333_v53  ;;  %v5413_v47 = vld [vmem:[#allocation27_spill] sm:$0xff]  ;;  %v1696_v59 = vmax.f32 %v1565_v1, %v1680_v49  ;;  %v5414_v53 = vld [vmem:[#allocation34_spill] sm:$0xff]  ;;  %v1391_v49 = vadd.f32 %v5415_v63, %v5412_v3  ;;  %v5418_v63 = vld [vmem:[#allocation56_spill] sm:$0xff] }
 0x61f   : > { %v4892_v54 = vpop.f32.mrf.mxu2  ;;  %v4894_v24 = vpop.f32.mrf.mxu1  ;;  %v1129_v2 = vadd.f32 %v5413_v47, %v5412_v3  ;;  %v1260_v60 = vadd.f32 %v5414_v53, %v5412_v3  ;;  %v5416_v47 = vld [vmem:[#allocation48_spill] sm:$0xff] }
 0x620   : > { %5410 = vst [vmem:[#allocation6_spill] sm:$0xff] %v4892_v54  ;;  %v1827_v50 = vmax.f32 %v1696_v59, %v1811_v25  ;;  %v1522_v53 = vadd.f32 %v5416_v47, %v5412_v3  ;;  %v5417_v59 = vld [vmem:[#allocation20_spill] sm:$0xff]  ;;  %v1653_v54 = vadd.f32 %v5418_v63, %v5412_v3 }
 0x621   : > { %v2300_v9 = vpop.f32.mrf.mxu0  ;;  %v1158_v21 = vmax.f32 %v1129_v2, 0.0 }
 0x622   : > { %v2301_v39 = vadd.f32 %v2300_v9, %v3971_v61  ;;  %v1958_v9 = vmax.f32 %v1827_v50, %v1942_v35  ;;  %v1551_v50 = vmax.f32 %v1522_v53, 0.0 }
 0x623   : > { %v1174_v2 = vmax.f32 %v5417_v59, %v1158_v21 }
 0x624   : > { %v2334_v23 = vmax.f32 %v2301_v39, 0.0  ;;  %3239 = vmatmul.msk.bf16.gmra.mxu0 %vm606_vm0, %v4727_v0  ;;  %v1289_v39 = vmax.f32 %v1260_v60, 0.0  ;;  %v2089_v25 = vmax.f32 %v1958_v9, %v2073_v7 }
 0x626   : > { %v4910_v46 = vmax.f32 %v4787_v44, %v2334_v23  ;;  %v1420_v23 = vmax.f32 %v1391_v49, 0.0  ;;  %v2220_v56 = vmax.f32 %v2089_v25, %v2204_v58  ;;  %v1305_v60 = vmax.f32 %v1174_v2, %v1289_v39 }
 0x627   : > { %v2189_v20 = vpop.f32.mrf.mxu2  ;;  %v2390_v37 = vpop.f32.mrf.mxu1  ;;  %v1682_v49 = vmax.f32 %v1653_v54, 0.0  ;;  %v2046_v39 = vadd.f32 %v4747_v26, %v5412_v3 }
 0x628   : > { %v2190_v1 = vadd.f32 %v2189_v20, %v4060_v48  ;;  %v5419_v20 = vld [vmem:[#allocation62_spill] sm:$0xff]  ;;  %v1436_v21 = vmax.f32 %v1305_v60, %v1420_v23 }
 0x629   : > { %v2302_v0 = vpop.f32.mrf.mxu0  ;;  %v1784_v47 = vadd.f32 %v5419_v20, %v5412_v3  ;;  %v2075_v23 = vmax.f32 %v2046_v39, 0.0 }
 0x62a   : > { %v2211_v51 = vmax.f32 %v2190_v1, 0.0  ;;  %v2303_v44 = vadd.f32 %v2302_v0, %v5402_v8  ;;  %v5420_v0 = vld [vmem:[#allocation71_spill] sm:$0xff]  ;;  %v1567_v25 = vmax.f32 %v1436_v21, %v1551_v50 }
 0x62b   : > { %v1915_v59 = vadd.f32 %v5420_v0, %v5412_v3 }
 0x62c   : > { %v4922_v35 = vmax.f32 %v4785_v43, %v2211_v51  ;;  %v2335_v27 = vmax.f32 %v2303_v44, 0.0  ;;  %v1813_v43 = vmax.f32 %v1784_v47, 0.0  ;;  %v1698_v51 = vmax.f32 %v1567_v25, %v1682_v49 }
 0x62d   : > { %v1944_v44 = vmax.f32 %v1915_v59, 0.0 }
 0x62e   : > { %v4926_v7 = vmax.f32 %v2220_v56, %v2335_v27  ;;  %v2177_v56 = vadd.f32 %v4819_v32, %v5412_v3  ;;  %v1829_v54 = vmax.f32 %v1698_v51, %v1813_v43 }
 0x62f   : > { %v4928_v9 = vpop.f32.mrf.mxu2  ;;  %v2392_v1 = vpop.f32.mrf.mxu1 }
 0x630   : > { %v1960_v50 = vmax.f32 %v1829_v54, %v1944_v44  ;;  %v2206_v26 = vmax.f32 %v2177_v56, 0.0  ;;  %v2393_v39 = vadd.f32 %v2392_v1, %v3806_v17  ;;  %v2391_v44 = vadd.f32 %v2390_v37, %v3800_v12 }
 0x631   : > { %v2305_v58 = vpop.f32.mrf.mxu0  ;;  %v2383_v37 = vadd.f32 %v4856_v40, %v3820_v30 }
 0x632   : > { %v2306_v53 = vadd.f32 %v2305_v58, %v3989_v11  ;;  %v2091_v21 = vmax.f32 %v1960_v50, %v2075_v23  ;;  %v2405_v23 = vmax.f32 %v2393_v39, 0.0  ;;  %v2386_v50 = vadd.f32 %v4876_v4, %v3804_v15 }
 0x634   : > { %v2336_v2 = vmax.f32 %v2306_v53, 0.0  ;;  %3240 = vmatmul.msk.bf16.gmra.mxu0 %vm606_vm0, %v4742_v57  ;;  %v2222_v0 = vmax.f32 %v2091_v21, %v2206_v26  ;;  %v2404_v26 = vmax.f32 %v2391_v44, 0.0 }
 0x636   : > { %v4940_v63 = vmax.f32 %v4813_v36, %v2336_v2  ;;  %v2410_v21 = vpack.c.bf16 %v2405_v23, %v2404_v26  ;;  %v4984_v23 = vld [vmem:[%s5304_s3 + $0x8] sm:$0xff] }
 0x637   : > { %v2194_v27 = vpop.f32.mrf.mxu2  ;;  %v2395_v60 = vpop.f32.mrf.mxu1 }
 0x638   : > { %v2195_v20 = vadd.f32 %v2194_v27, %v4087_v62  ;;  %v2396_v58 = vadd.f32 %v2395_v60, %v3802_v13 }
 0x639   : > { %v2307_v47 = vpop.f32.mrf.mxu0 }
 0x63a   : > { %v2213_v49 = vmax.f32 %v2195_v20, 0.0  ;;  %v2308_v32 = vadd.f32 %v2307_v47, %v5412_v3  ;;  %v2406_v56 = vmax.f32 %v2396_v58, 0.0 }
 0x63c   : > { %v2229_v59 = vmax.f32 %v4811_v14, %v2213_v49  ;;  %v2337_v57 = vmax.f32 %v2308_v32, 0.0  ;;  %v2388_v14 = vadd.f32 %v4894_v24, %v3813_v22  ;;  %v2381_v24 = vadd.f32 %v4838_v6, %v3826_v41 }
 0x63d   : > { %v2402_v32 = vmax.f32 %v2386_v50, 0.0 }
 0x63e   : > { %v4946_v25 = vmax.f32 %v2222_v0, %v2337_v57  ;;  %v2403_v47 = vmax.f32 %v2388_v14, 0.0  ;;  %v2401_v0 = vmax.f32 %v2383_v37, 0.0  ;;  %v2400_v57 = vmax.f32 %v2381_v24, 0.0 }
 0x63f   : > { %v4948_v36 = vpop.f32.mrf.mxu2  ;;  %v2397_v43 = vpop.f32.mrf.mxu1 }
 0x640   : > { %5421 = vst [vmem:[#allocation23_spill] sm:$0xff] %v4948_v36  ;;  %v2398_v53 = vadd.f32 %v2397_v43, %v3810_v18  ;;  %v2409_v4 = vpack.c.bf16 %v2403_v47, %v2402_v32  ;;  %v2408_v58 = vpack.c.bf16 %v2401_v0, %v2400_v57 }
 0x641   : > { %v2310_v51 = vpop.f32.mrf.mxu0 }
 0x642   : > { %v2407_v2 = vmax.f32 %v2398_v53, 0.0  ;;  %v2311_v54 = vadd.f32 %v2310_v51, %v4007_v38  ;;  %v4971_v53 = vld [vmem:[%s5304_s3] sm:$0xff] }
 0x644   : > { %v2411_v27 = vpack.c.bf16 %v2407_v2, %v2406_v56  ;;  %v2338_v60 = vmax.f32 %v2311_v54, 0.0 }
 0x646   : > { %v4959_v1 = vmax.f32 %v4848_v16, %v2338_v60  ;;  %2416 = vmatpush.bf16.msrb.mxu3 %v2411_v27 }
 0x647   : > { %v2511_v20 = vpop.f32.mrf.mxu2 }
 0x649   : > { %v4963_v49 = vpop.f32.mrf.mxu0 }
 0x64a   : > { %2417 = vmatpush.bf16.msrb.mxu3 %v2410_v21  ;;  %v4997_v21 = vld [vmem:[%s5304_s3 + $0x10] sm:$0xff] }
 0x64e   : > { %2418 = vmatpush.bf16.msrb.mxu3 %v2409_v4 }
 0x64f   : > { %v2513_v16 = vpop.f32.mrf.mxu2 }
 0x651   : > { %v2315_v43 = vpop.f32.mrf.mxu0 }
 0x652   : > { %v2316_v39 = vadd.f32 %v2315_v43, %v4032_v33  ;;  %2419 = vmatpush.bf16.msrb.mxu3 %v2408_v58 }
 0x654   : > { %v2340_v40 = vmax.f32 %v2316_v39, 0.0 }
 0x655   : > { %3205 = vmatmul.msk.bf16.vlgmr.msrb.gmra.mxu3 %vm700_vm1, %v4971_v53 }
 0x656   : > { %v4976_v6 = vmax.f32 %v4886_v29, %v2340_v40 }
 0x657   : > { %v2516_v51 = vpop.f32.mrf.mxu2 }
 0x659   : > { %v4978_v44 = vpop.f32.mrf.mxu0 }
 0x65f   : > { %v2518_v56 = vpop.f32.mrf.mxu2 }
 0x661   : > { %v2320_v2 = vpop.f32.mrf.mxu0 }
 0x662   : > { %v2321_v54 = vadd.f32 %v2320_v2, %v4060_v48 }
 0x664   : > { %v2342_v14 = vmax.f32 %v2321_v54, 0.0  ;;  %v2519_v54 = vadd.f32 %v2518_v56, %v3813_v22  ;;  %v2512_v56 = vadd.f32 %v2511_v20, %v3826_v41 }
 0x665   : > { %3206 = vmatmul.msk.bf16.gmra.mxu3 %vm700_vm1, %v4984_v23 }
 0x666   : > { %v4989_v27 = vmax.f32 %v4922_v35, %v2342_v14 }
 0x667   : > { %v2521_v29 = vpop.f32.mrf.mxu2 }
 0x668   : > { %v2522_v39 = vadd.f32 %v2521_v29, %v3800_v12  ;;  %v2514_v29 = vadd.f32 %v2513_v16, %v3820_v30 }
 0x669   : > { %v4991_v60 = vpop.f32.mrf.mxu0 }
 0x66f   : > { %v2523_v50 = vpop.f32.mrf.mxu2 }
 0x670   : > { %v2524_v57 = vadd.f32 %v2523_v50, %v3806_v17  ;;  %v2517_v50 = vadd.f32 %v2516_v51, %v3804_v15  ;;  %v3380_v51 = vld [vmem:[%s5304_s3 + $0x20] sm:$0xff] }
 0x671   : > { %v2325_v26 = vpop.f32.mrf.mxu0 }
 0x672   : > { %v2326_v37 = vadd.f32 %v2325_v26, %v4087_v62  ;;  %v2536_v14 = vmax.f32 %v2524_v57, 0.0  ;;  %v5013_v26 = vld [vmem:[%s5304_s3 + $0x18] sm:$0xff]  ;;  %v2532_v57 = vmax.f32 %v2514_v29, 0.0 }
 0x674   : > { %v2344_v47 = vmax.f32 %v2326_v37, 0.0  ;;  %v2535_v37 = vmax.f32 %v2522_v39, 0.0  ;;  %v3381_v39 = vld [vmem:[%s5304_s3 + $0x28] sm:$0xff] }
 0x675   : > { %3207 = vmatmul.msk.bf16.gmra.mxu3 %vm700_vm1, %v4997_v21 }
 0x676   : > { %v5001_v24 = vmax.f32 %v2229_v59, %v2344_v47  ;;  %v2534_v47 = vmax.f32 %v2519_v54, 0.0 }
 0x677   : > { %v2526_v35 = vpop.f32.mrf.mxu2 }
 0x678   : > { %5422 = vst [vmem:[#allocation32_spill] sm:$0xff] %v5001_v24  ;;  %v2527_v0 = vadd.f32 %v2526_v35, %v3802_v13  ;;  %v2541_v35 = vpack.c.bf16 %v2536_v14, %v2535_v37 }
 0x679   : > { %v5003_v32 = vpop.f32.mrf.mxu0 }
 0x67a   : > { %5423 = vst [vmem:[#allocation37_spill] sm:$0xff] %v5003_v32  ;;  %v2537_v40 = vmax.f32 %v2527_v0, 0.0 }
 0x67f   : > { %v2528_v4 = vpop.f32.mrf.mxu2 }
 0x680   : > { %v2529_v58 = vadd.f32 %v2528_v4, %v3810_v18  ;;  %v2533_v4 = vmax.f32 %v2517_v50, 0.0 }
 0x681   : > { %v2642_v43 = vpop.f32.mrf.mxu0 }
 0x682   : > { %v2538_v2 = vmax.f32 %v2529_v58, 0.0  ;;  %v2540_v58 = vpack.c.bf16 %v2534_v47, %v2533_v4 }
 0x684   : > { %v2542_v59 = vpack.c.bf16 %v2538_v2, %v2537_v40  ;;  %v2531_v40 = vmax.f32 %v2512_v56, 0.0 }
 0x685   : > { %3208 = vmatmul.msk.bf16.gmra.mxu3 %vm700_vm1, %v5013_v26 }
 0x686   : > { %2547 = vmatpush.bf16.msra.mxu1 %v2542_v59  ;;  %v2539_v2 = vpack.c.bf16 %v2532_v57, %v2531_v40  ;;  %v3382_v59 = vld [vmem:[%s5304_s3 + $0x30] sm:$0xff] }
 0x689   : > { %v2644_v0 = vpop.f32.mrf.mxu0 }
 0x68a   : > { %2548 = vmatpush.bf16.msra.mxu1 %v2541_v35  ;;  %v2645_v36 = vadd.f32 %v2644_v0, %v3820_v30 }
 0x68e   : > { %2549 = vmatpush.bf16.msra.mxu1 %v2540_v58 }
 0x691   : > { %v2647_v24 = vpop.f32.mrf.mxu0 }
 0x692   : > { %2550 = vmatpush.bf16.msra.mxu1 %v2539_v2  ;;  %v2648_v2 = vadd.f32 %v2647_v24, %v3804_v15  ;;  %v2663_v15 = vmax.f32 %v2645_v36, 0.0 }
 0x695   : > { %3209 = vmatmul.msk.bf16.gmra.mxu3 %vm700_vm1, %v3380_v51  ;;  %3223 = vmatmul.msk.bf16.vlgmr.msra.gmra.mxu1 %vm700_vm1, %v4971_v53 }
 0x699   : > { %v2649_v16 = vpop.f32.mrf.mxu0 }
 0x69a   : > { %v2650_v57 = vadd.f32 %v2649_v16, %v3813_v22 }
 0x6a1   : > { %v2652_v20 = vpop.f32.mrf.mxu0 }
 0x6a2   : > { %v2653_v35 = vadd.f32 %v2652_v20, %v3800_v12  ;;  %v3383_v12 = vld [vmem:[%s5304_s3 + $0x38] sm:$0xff] }
 0x6a4   : > { %v2666_v32 = vmax.f32 %v2653_v35, 0.0 }
 0x6a5   : > { %3210 = vmatmul.msk.bf16.gmra.mxu3 %vm700_vm1, %v3381_v39  ;;  %3224 = vmatmul.msk.bf16.gmra.mxu1 %vm700_vm1, %v4984_v23 }
 0x6a9   : > { %v2654_v54 = vpop.f32.mrf.mxu0 }
 0x6aa   : > { %v2655_v29 = vadd.f32 %v2654_v54, %v3806_v17  ;;  %v2643_v17 = vadd.f32 %v2642_v43, %v3826_v41  ;;  %v2664_v54 = vmax.f32 %v2648_v2, 0.0 }
 0x6ac   : > { %v2667_v58 = vmax.f32 %v2655_v29, 0.0  ;;  %v2662_v22 = vmax.f32 %v2643_v17, 0.0 }
 0x6ae   : > { %v2670_v30 = vpack.c.bf16 %v2663_v15, %v2662_v22 }
 0x6b1   : > { %v2657_v14 = vpop.f32.mrf.mxu0 }
 0x6b2   : > { %v2658_v50 = vadd.f32 %v2657_v14, %v3802_v13  ;;  %v2665_v13 = vmax.f32 %v2650_v57, 0.0  ;;  %v2672_v14 = vpack.c.bf16 %v2667_v58, %v2666_v32 }
 0x6b4   : > { %v2668_v56 = vmax.f32 %v2658_v50, 0.0 }
 0x6b5   : > { %3211 = vmatmul.msk.bf16.gmra.mxu3 %vm700_vm1, %v3382_v59  ;;  %3225 = vmatmul.msk.bf16.gmra.mxu1 %vm700_vm1, %v4997_v21 }
 0x6b9   : > { %v2659_v37 = vpop.f32.mrf.mxu0 }
 0x6ba   : > { %v2660_v47 = vadd.f32 %v2659_v37, %v3810_v18  ;;  %v2671_v18 = vpack.c.bf16 %v2665_v13, %v2664_v54 }
 0x6bc   : > { %v2669_v4 = vmax.f32 %v2660_v47, 0.0 }
 0x6be   : > { %v2673_v40 = vpack.c.bf16 %v2669_v4, %v2668_v56 }
 0x6c0   : > { %2678 = vmatpush.bf16.msrb.mxu2 %v2673_v40 }
 0x6c4   : > { %2679 = vmatpush.bf16.msrb.mxu2 %v2672_v14 }
 0x6c5   : > { %3212 = vmatmul.msk.bf16.gmra.mxu3 %vm700_vm1, %v3383_v12  ;;  %3226 = vmatmul.msk.bf16.gmra.mxu1 %vm700_vm1, %v5013_v26 }
 0x6c8   : > { %2680 = vmatpush.bf16.msrb.mxu2 %v2671_v18 }
 0x6cc   : > { %2681 = vmatpush.bf16.msrb.mxu2 %v2670_v30 }
 0x6cf   : > { %3241 = vmatmul.msk.bf16.vlgmr.msrb.gmra.mxu2 %vm700_vm1, %v4971_v53 }
 0x6d5   : > { %3227 = vmatmul.msk.bf16.gmra.mxu1 %vm700_vm1, %v3380_v51 }
 0x6d8   : > { %v2421_v41 = vpop.f32.mrf.mxu3 }
 0x6df   : > { %3242 = vmatmul.msk.bf16.gmra.mxu2 %vm700_vm1, %v4984_v23 }
 0x6e0   : > { %v2423_v53 = vpop.f32.mrf.mxu3 }
 0x6e5   : > { %3228 = vmatmul.msk.bf16.gmra.mxu1 %vm700_vm1, %v3381_v39 }
 0x6e8   : > { %v2426_v24 = vpop.f32.mrf.mxu3 }
 0x6e9   : > { %v2427_v13 = vadd.f32 %v2426_v24, %v3955_v45 }
 0x6eb   : > { %v2463_v15 = vmax.f32 %v2427_v13, 0.0 }
 0x6ef   : > { %3243 = vmatmul.msk.bf16.gmra.mxu2 %vm700_vm1, %v4997_v21 }
 0x6f0   : > { %v2428_v32 = vpop.f32.mrf.mxu3 }
 0x6f5   : > { %3229 = vmatmul.msk.bf16.gmra.mxu1 %vm700_vm1, %v3382_v59 }
 0x6f8   : > { %v2431_v20 = vpop.f32.mrf.mxu3 }
 0x6ff   : > { %3244 = vmatmul.msk.bf16.gmra.mxu2 %vm700_vm1, %v5013_v26  ;;  %v2422_v26 = vadd.f32 %v2421_v41, %v3942_v31  ;;  %v2479_v41 = vmax.f32 %v4872_v10, %v2463_v15 }
 0x700   : > { %v2433_v14 = vpop.f32.mrf.mxu3 }
 0x701   : > { %v2461_v16 = vmax.f32 %v2422_v26, 0.0 }
 0x703   : > { %v2477_v50 = vmax.f32 %v4834_v34, %v2461_v16 }
 0x705   : > { %3230 = vmatmul.msk.bf16.gmra.mxu1 %vm700_vm1, %v3383_v12 }
 0x708   : > { %v2436_v24 = vpop.f32.mrf.mxu3 }
 0x70f   : > { %3245 = vmatmul.msk.bf16.gmra.mxu2 %vm700_vm1, %v3380_v51 }
 0x712   : > { %v2552_v36 = vpop.f32.mrf.mxu1 }
 0x713   : > { %v2553_v0 = vadd.f32 %v2552_v36, %v3942_v31  ;;  %v2429_v36 = vadd.f32 %v2428_v32, %v5392_v42 }
 0x715   : > { %v2592_v51 = vmax.f32 %v2553_v0, 0.0  ;;  %v2464_v26 = vmax.f32 %v2429_v36, 0.0 }
 0x717   : > { %v2608_v47 = vmax.f32 %v2477_v50, %v2592_v51  ;;  %v2432_v50 = vadd.f32 %v2431_v20, %v3971_v61 }
 0x71a   : > { %v2554_v23 = vpop.f32.mrf.mxu1 }
 0x71b   : > { %v2555_v35 = vadd.f32 %v2554_v23, %v3959_v55 }
 0x71d   : > { %v2593_v58 = vmax.f32 %v2555_v35, 0.0 }
 0x71f   : > { %3246 = vmatmul.msk.bf16.gmra.mxu2 %vm700_vm1, %v3381_v39 }
 0x722   : > { %v2557_v21 = vpop.f32.mrf.mxu1 }
 0x72a   : > { %v2559_v43 = vpop.f32.mrf.mxu1 }
 0x72f   : > { %3247 = vmatmul.msk.bf16.gmra.mxu2 %vm700_vm1, %v3382_v59  ;;  %v2424_v59 = vadd.f32 %v2423_v53, %v3959_v55 }
 0x731   : > { %v2462_v4 = vmax.f32 %v2424_v59, 0.0 }
 0x732   : > { %v2562_v29 = vpop.f32.mrf.mxu1 }
 0x733   : > { %v2478_v2 = vmax.f32 %v4852_v52, %v2462_v4 }
 0x735   : > { %v2609_v17 = vmax.f32 %v2478_v2, %v2593_v58  ;;  %v2434_v58 = vadd.f32 %v2433_v14, %v5402_v8 }
 0x737   : > { %v2466_v2 = vmax.f32 %v2434_v58, 0.0 }
 0x73f   : > { %3248 = vmatmul.msk.bf16.gmra.mxu2 %vm700_vm1, %v3383_v12  ;;  %v2564_v12 = vpop.f32.mrf.mxu1 }
 0x747   : > { %v2567_v0 = vpop.f32.mrf.mxu1 }
 0x752   : > { %v2683_v39 = vpop.f32.mrf.mxu2 }
 0x753   : > { %v2684_v37 = vadd.f32 %v2683_v39, %v3942_v31  ;;  %v2558_v31 = vadd.f32 %v2557_v21, %v3955_v45  ;;  %v2480_v39 = vmax.f32 %v4890_v19, %v2464_v26 }
 0x755   : > { %v2723_v56 = vmax.f32 %v2684_v37, 0.0  ;;  %v2594_v22 = vmax.f32 %v2558_v31, 0.0  ;;  %v2465_v37 = vmax.f32 %v2432_v50, 0.0 }
 0x757   : > { %v2739_v57 = vmax.f32 %v2608_v47, %v2723_v56  ;;  %v2610_v53 = vmax.f32 %v2479_v41, %v2594_v22  ;;  %v2438_v47 = vpop.f32.mrf.mxu3  ;;  %v2569_v56 = vpop.f32.mrf.mxu1 }
 0x759   : > { %2755 = vxpose.xlu0.b32.start [1/16] %v2739_v57, 128  ;;  %v2481_v57 = vmax.f32 %v4910_v46, %v2465_v37  ;;  %v2437_v46 = vadd.f32 %v2436_v24, %v3989_v11  ;;  %v2439_v37 = vadd.f32 %v2438_v47, %v5412_v3 }
 0x75a   : > { %v2685_v40 = vpop.f32.mrf.mxu2 }
 0x75b   : > { %v2686_v34 = vadd.f32 %v2685_v40, %v3959_v55  ;;  %v2560_v55 = vadd.f32 %v2559_v43, %v5392_v42 }
 0x75d   : > { %v2724_v54 = vmax.f32 %v2686_v34, 0.0  ;;  %v2595_v16 = vmax.f32 %v2560_v55, 0.0  ;;  %v5424_v34 = vld [vmem:[#allocation12_spill] sm:$0xff] }
 0x75f   : > { %v2740_v18 = vmax.f32 %v2609_v17, %v2724_v54  ;;  %v2611_v32 = vmax.f32 %v2480_v39, %v2595_v16  ;;  %v5425_v17 = vld [vmem:[#allocation10_spill] sm:$0xff]  ;;  %v2441_v54 = vpop.f32.mrf.mxu3  ;;  %v2572_v41 = vpop.f32.mrf.mxu1 }
 0x760   : > { %v872_v31 = vadd.f32 %v5425_v17, %v5424_v34 }
 0x761   : > { %2756 = vxpose.xlu0.b32.cont [2/16] %v2740_v18, 128  ;;  %v2482_v18 = vmax.f32 %v4926_v7, %v2466_v2  ;;  %v2467_v7 = vmax.f32 %v2437_v46, 0.0 }
 0x762   : > { %v2688_v30 = vpop.f32.mrf.mxu2  ;;  %v898_v55 = vmax.f32 %v872_v31, 0.0  ;;  %v2468_v31 = vmax.f32 %v2439_v37, 0.0 }
 0x763   : > { %v2689_v52 = vadd.f32 %v2688_v30, %v3955_v45  ;;  %v2563_v45 = vadd.f32 %v2562_v29, %v3971_v61 }
 0x765   : > { %v2725_v23 = vmax.f32 %v2689_v52, 0.0  ;;  %v2596_v35 = vmax.f32 %v2563_v45, 0.0  ;;  %v2568_v52 = vadd.f32 %v2567_v0, %v3989_v11 }
 0x767   : > { %v2741_v21 = vmax.f32 %v2610_v53, %v2725_v23  ;;  %v2612_v20 = vmax.f32 %v2481_v57, %v2596_v35  ;;  %v5428_v23 = vld [vmem:[#allocation29_spill] sm:$0xff]  ;;  %v2598_v39 = vmax.f32 %v2568_v52, 0.0  ;;  %v5431_v57 = vld [vmem:[#allocation50_spill] sm:$0xff] }
 0x768   : > { %v1134_v26 = vadd.f32 %v5428_v23, %v5424_v34  ;;  %v1527_v58 = vadd.f32 %v5431_v57, %v5424_v34  ;;  %v2484_v23 = vmax.f32 %v4946_v25, %v2468_v31 }
 0x769   : > { %2757 = vxpose.xlu0.b32.cont [3/16] %v2741_v21, 128 }
 0x76a   : > { %v2690_v51 = vpop.f32.mrf.mxu2 }
 0x76b   : > { %v2691_v10 = vadd.f32 %v2690_v51, %v5392_v42  ;;  %v2565_v42 = vadd.f32 %v2564_v12, %v5402_v8  ;;  %v5427_v12 = vld [vmem:[#allocation22_spill] sm:$0xff] }
 0x76c   : > { %v1003_v30 = vadd.f32 %v5427_v12, %v5424_v34 }
 0x76d   : > { %v2726_v59 = vmax.f32 %v2691_v10, 0.0  ;;  %v2597_v13 = vmax.f32 %v2565_v42, 0.0  ;;  %v1160_v10 = vmax.f32 %v1134_v26, 0.0  ;;  %v2570_v42 = vadd.f32 %v2569_v56, %v5412_v3 }
 0x76e   : > { %v1029_v16 = vmax.f32 %v1003_v30, 0.0  ;;  %v2442_v26 = vadd.f32 %v2441_v54, %v4007_v38 }
 0x76f   : > { %v2742_v43 = vmax.f32 %v2611_v32, %v2726_v59  ;;  %v2613_v36 = vmax.f32 %v2482_v18, %v2597_v13  ;;  %v5430_v32 = vld [vmem:[#allocation43_spill] sm:$0xff]  ;;  %v2483_v59 = vmax.f32 %v4940_v63, %v2467_v7  ;;  %v5432_v13 = vld [vmem:[#allocation57_spill] sm:$0xff]  ;;  %v2574_v63 = vpop.f32.mrf.mxu1  ;;  %v5433_v18 = vld [vmem:[#allocation64_spill] sm:$0xff] }
 0x770   : > { %v1396_v45 = vadd.f32 %v5430_v32, %v5424_v34  ;;  %v1658_v17 = vadd.f32 %v5432_v13, %v5424_v34  ;;  %v1789_v46 = vadd.f32 %v5433_v18, %v5424_v34  ;;  %v5438_v32 = vld [vmem:[#allocation30_spill] sm:$0xff]  ;;  %v5441_v13 = vld [vmem:[#allocation45_spill] sm:$0xff] }
 0x771   : > { %2758 = vxpose.xlu0.b32.cont [4/16] %v2742_v43, 128 }
 0x772   : > { %v2693_v4 = vpop.f32.mrf.mxu2  ;;  %v1684_v30 = vmax.f32 %v1658_v17, 0.0 }
 0x773   : > { %v2694_v19 = vadd.f32 %v2693_v4, %v3971_v61  ;;  %v5426_v61 = vld [vmem:[#allocation8_spill] sm:$0xff] }
 0x774   : > { %v757_v22 = vadd.f32 %v5426_v61, %v5424_v34  ;;  %v5434_v61 = vld [vmem:[#allocation16_spill] sm:$0xff] }
 0x775   : > { %v2727_v40 = vmax.f32 %v2694_v19, 0.0  ;;  %v2443_v19 = vpop.f32.mrf.mxu3  ;;  %v1139_v25 = vadd.f32 %v5438_v32, %v5434_v61  ;;  %v1401_v17 = vadd.f32 %v5441_v13, %v5434_v61 }
 0x776   : > { %v783_v24 = vmax.f32 %v757_v22, 0.0  ;;  %v5435_v22 = vld [vmem:[#allocation14_spill] sm:$0xff]  ;;  %v2444_v18 = vadd.f32 %v2443_v19, %v5424_v34 }
 0x777   : > { %v2743_v29 = vmax.f32 %v2612_v20, %v2727_v40  ;;  %v2614_v20 = vmax.f32 %v2483_v59, %v2598_v39  ;;  %v877_v12 = vadd.f32 %v5435_v22, %v5434_v61  ;;  %v5439_v59 = vld [vmem:[#allocation65_spill] sm:$0xff] }
 0x778   : > { %v914_v50 = vmax.f32 %v783_v24, %v898_v55  ;;  %v2182_v37 = vadd.f32 %v5439_v59, %v5424_v34  ;;  %v2470_v19 = vmax.f32 %v2444_v18, 0.0 }
 0x779   : > { %2759 = vxpose.xlu0.b32.cont [5/16] %v2743_v29, 128  ;;  %v1422_v29 = vmax.f32 %v1396_v45, 0.0 }
 0x77a   : > { %v2695_v15 = vpop.f32.mrf.mxu2  ;;  %v1045_v35 = vmax.f32 %v914_v50, %v1029_v16 }
 0x77b   : > { %v2696_v14 = vadd.f32 %v2695_v15, %v5402_v8  ;;  %v5429_v8 = vld [vmem:[#allocation35_spill] sm:$0xff] }
 0x77c   : > { %v1265_v51 = vadd.f32 %v5429_v8, %v5424_v34  ;;  %v1176_v2 = vmax.f32 %v1045_v35, %v1160_v10  ;;  %v1815_v8 = vmax.f32 %v1789_v46, 0.0  ;;  %v900_v10 = vmax.f32 %v877_v12, 0.0 }
 0x77d   : > { %v2728_v53 = vmax.f32 %v2696_v14, 0.0  ;;  %v2599_v14 = vmax.f32 %v2570_v42, 0.0  ;;  %v2313_v42 = vadd.f32 %v4963_v49, %v5424_v34  ;;  %v5442_v49 = vld [vmem:[#allocation51_spill] sm:$0xff] }
 0x77e   : > { %v1291_v4 = vmax.f32 %v1265_v51, 0.0  ;;  %v2051_v51 = vadd.f32 %v4760_v5, %v5424_v34  ;;  %v5440_v5 = vld [vmem:[#allocation36_spill] sm:$0xff]  ;;  %v1532_v12 = vadd.f32 %v5442_v49, %v5434_v61 }
 0x77f   : > { %v2744_v21 = vmax.f32 %v2613_v36, %v2728_v53  ;;  %v1920_v36 = vadd.f32 %v4625_v28, %v5424_v34  ;;  %v5436_v53 = vld [vmem:[#allocation11_spill] sm:$0xff]  ;;  %v2615_v39 = vmax.f32 %v2484_v23, %v2599_v14  ;;  %v2573_v28 = vadd.f32 %v2572_v41, %v4007_v38 }
 0x780   : > { %v1307_v15 = vmax.f32 %v1176_v2, %v1291_v4  ;;  %v762_v55 = vadd.f32 %v5436_v53, %v5434_v61  ;;  %v1270_v57 = vadd.f32 %v5440_v5, %v5434_v61  ;;  %v2077_v41 = vmax.f32 %v2051_v51, 0.0 }
 0x781   : > { %2760 = vxpose.xlu0.b32.cont [6/16] %v2744_v21, 128  ;;  %v5437_v21 = vld [vmem:[#allocation24_spill] sm:$0xff]  ;;  %v1946_v54 = vmax.f32 %v1920_v36, 0.0  ;;  %v1424_v23 = vmax.f32 %v1401_v17, 0.0 }
 0x782   : > { %v2698_v0 = vpop.f32.mrf.mxu2  ;;  %v1438_v56 = vmax.f32 %v1307_v15, %v1422_v29  ;;  %v1008_v24 = vadd.f32 %v5437_v21, %v5434_v61  ;;  %v1162_v29 = vmax.f32 %v1139_v25, 0.0  ;;  %v2208_v15 = vmax.f32 %v2182_v37, 0.0  ;;  %v5447_v37 = vld [vmem:[#allocation15_spill] sm:$0xff] }
 0x783   : > { %v2699_v43 = vadd.f32 %v2698_v0, %v3989_v11  ;;  %v1553_v11 = vmax.f32 %v1527_v58, 0.0  ;;  %v2446_v0 = vpop.f32.mrf.mxu3  ;;  %v1293_v22 = vmax.f32 %v1270_v57, 0.0  ;;  %v5448_v57 = vld [vmem:[#allocation26_spill] sm:$0xff] }
 0x784   : > { %v1031_v4 = vmax.f32 %v1008_v24, 0.0  ;;  %v1555_v24 = vmax.f32 %v1532_v12, 0.0  ;;  %v5452_v12 = vld [vmem:[#allocation38_spill] sm:$0xff] }
 0x785   : > { %v2729_v40 = vmax.f32 %v2699_v43, 0.0  ;;  %v1569_v16 = vmax.f32 %v1438_v56, %v1553_v11  ;;  %v2469_v43 = vmax.f32 %v2442_v26, 0.0  ;;  %v5443_v26 = vld [vmem:[#allocation59_spill] sm:$0xff] }
 0x787   : > { %v2745_v47 = vmax.f32 %v2614_v20, %v2729_v40  ;;  %v1700_v45 = vmax.f32 %v1569_v16, %v1684_v30  ;;  %v2577_v20 = vpop.f32.mrf.mxu1  ;;  %v2600_v40 = vmax.f32 %v2573_v28, 0.0  ;;  %v2485_v11 = vmax.f32 %v4959_v1, %v2469_v43  ;;  %v5444_v16 = vld [vmem:[#allocation66_spill] sm:$0xff] }
 0x788   : > { %v2339_v30 = vmax.f32 %v2313_v42, 0.0  ;;  %v1663_v1 = vadd.f32 %v5443_v26, %v5434_v61  ;;  %v2578_v13 = vadd.f32 %v2577_v20, %v4032_v33  ;;  %v2318_v20 = vadd.f32 %v4978_v44, %v5434_v61  ;;  %v5454_v44 = vld [vmem:[#allocation52_spill] sm:$0xff] }
 0x789   : > { %2761 = vxpose.xlu0.b32.cont [7/16] %v2745_v47, 128  ;;  %v1831_v58 = vmax.f32 %v1700_v45, %v1815_v8  ;;  %v2616_v36 = vmax.f32 %v2485_v11, %v2600_v40  ;;  %v1794_v8 = vadd.f32 %v5444_v16, %v5434_v61  ;;  %v5446_v45 = vld [vmem:[#allocation72_spill] sm:$0xff]  ;;  %v5449_v40 = vld [vmem:[#allocation75_spill] sm:$0xff] }
 0x78a   : > { %v2700_v52 = vpop.f32.mrf.mxu2  ;;  %v1686_v25 = vmax.f32 %v1663_v1, 0.0 }
 0x78b   : > { %v2701_v7 = vadd.f32 %v2700_v52, %v5412_v3  ;;  %v785_v3 = vmax.f32 %v762_v55, 0.0  ;;  %v1962_v31 = vmax.f32 %v1831_v58, %v1946_v54  ;;  %v2575_v52 = vadd.f32 %v2574_v63, %v5424_v34  ;;  %v2448_v51 = vpop.f32.mrf.mxu3  ;;  %v5445_v63 = vld [vmem:[#allocation18_spill] sm:$0xff] }
 0x78c   : > { %v1925_v54 = vadd.f32 %v5446_v45, %v5434_v61  ;;  %v1817_v42 = vmax.f32 %v1794_v8, 0.0 }
 0x78d   : > { %v2730_v50 = vmax.f32 %v2701_v7, 0.0  ;;  %v916_v2 = vmax.f32 %v785_v3, %v900_v10  ;;  %v2093_v56 = vmax.f32 %v1962_v31, %v2077_v41 }
 0x78f   : > { %v2746_v35 = vmax.f32 %v2615_v39, %v2730_v50  ;;  %v1047_v14 = vmax.f32 %v916_v2, %v1031_v4  ;;  %v2224_v7 = vmax.f32 %v2093_v56, %v2208_v15  ;;  %v5150_v39 = vpop.permute.xlu0 %565  ;;  %v2601_v50 = vmax.f32 %v2575_v52, 0.0  ;;  %v2579_v3 = vpop.f32.mrf.mxu1 }
 0x790   : > { %v882_v10 = vadd.f32 %v5445_v63, %v5150_v39  ;;  %v767_v43 = vadd.f32 %v5447_v37, %v5150_v39  ;;  %v2447_v4 = vadd.f32 %v2446_v0, %v4032_v33  ;;  %v1013_v58 = vadd.f32 %v5448_v57, %v5150_v39  ;;  %v5456_v57 = vld [vmem:[#allocation68_spill] sm:$0xff] }
 0x791   : > { %2762 = vxpose.xlu0.b32.cont [8/16] %v2746_v35, 128  ;;  %v1178_v55 = vmax.f32 %v1047_v14, %v1162_v29  ;;  %v2355_v28 = vmax.f32 %v2224_v7, %v2339_v30  ;;  %v2056_v2 = vadd.f32 %v5449_v40, %v5434_v61  ;;  %v1948_v0 = vmax.f32 %v1925_v54, 0.0 }
 0x792   : > { %v2703_v47 = vpop.f32.mrf.mxu2  ;;  %v902_v31 = vmax.f32 %v882_v10, 0.0  ;;  %v787_v18 = vmax.f32 %v767_v43, 0.0  ;;  %v2471_v14 = vmax.f32 %v2447_v4, 0.0  ;;  %v1033_v49 = vmax.f32 %v1013_v58, 0.0 }
 0x793   : > { %v2704_v46 = vadd.f32 %v2703_v47, %v4007_v38  ;;  %v1309_v38 = vmax.f32 %v1178_v55, %v1293_v22  ;;  %v2486_v35 = vmax.f32 %v2355_v28, %v2470_v19  ;;  %v5450_v47 = vld [vmem:[#allocation31_spill] sm:$0xff]  ;;  %v1275_v56 = vadd.f32 %v5452_v12, %v5150_v39  ;;  %v2451_v7 = vpop.f32.mrf.mxu3  ;;  %v5461_v12 = vld [vmem:[#allocation76_spill] sm:$0xff] }
 0x794   : > { %v1144_v15 = vadd.f32 %v5450_v47, %v5150_v39  ;;  %v2602_v52 = vmax.f32 %v2578_v13, 0.0  ;;  %v2580_v45 = vadd.f32 %v2579_v3, %v5434_v61  ;;  %v1799_v58 = vadd.f32 %v5456_v57, %v5150_v39  ;;  %v5457_v3 = vld [vmem:[#allocation21_spill] sm:$0xff] }
 0x795   : > { %v2731_v53 = vmax.f32 %v2704_v46, 0.0  ;;  %v1440_v32 = vmax.f32 %v1309_v38, %v1424_v23  ;;  %v2617_v29 = vmax.f32 %v2486_v35, %v2601_v50  ;;  %v5453_v23 = vld [vmem:[#allocation47_spill] sm:$0xff]  ;;  %v2487_v38 = vmax.f32 %v4976_v6, %v2471_v14  ;;  %v5455_v6 = vld [vmem:[#allocation61_spill] sm:$0xff] }
 0x796   : > { %v1164_v55 = vmax.f32 %v1144_v15, 0.0  ;;  %v1406_v26 = vadd.f32 %v5453_v23, %v5150_v39  ;;  %v1295_v28 = vmax.f32 %v1275_v56, 0.0  ;;  %v1537_v50 = vadd.f32 %v5454_v44, %v5150_v39  ;;  %v5459_v15 = vld [vmem:[#allocation19_spill] sm:$0xff] }
 0x797   : > { %v2747_v21 = vmax.f32 %v2616_v36, %v2731_v53  ;;  %v1571_v41 = vmax.f32 %v1440_v32, %v1555_v24  ;;  %v2079_v36 = vmax.f32 %v2056_v2, 0.0  ;;  %v918_v53 = vmax.f32 %v787_v18, %v902_v31  ;;  %v2582_v10 = vpop.f32.mrf.mxu1 }
 0x798   : > { %v2449_v24 = vadd.f32 %v2448_v51, %v5434_v61  ;;  %v2341_v32 = vmax.f32 %v2318_v20, 0.0  ;;  %v1426_v37 = vmax.f32 %v1406_v26, 0.0  ;;  %v1668_v43 = vadd.f32 %v5455_v6, %v5150_v39 }
 0x799   : > { %2763 = vxpose.xlu0.b32.cont [9/16] %v2747_v21, 128  ;;  %v1702_v11 = vmax.f32 %v1571_v41, %v1686_v25  ;;  %v1049_v8 = vmax.f32 %v918_v53, %v1033_v49  ;;  %v2618_v25 = vmax.f32 %v2487_v38, %v2602_v52  ;;  %v5185_v41 = vpop.permute.xlu2 %575  ;;  %v2603_v40 = vmax.f32 %v2580_v45, 0.0 }
 0x79a   : > { %v2705_v59 = vpop.f32.mrf.mxu2  ;;  %v2472_v35 = vmax.f32 %v2449_v24, 0.0  ;;  %v887_v2 = vadd.f32 %v5457_v3, %v5185_v41  ;;  %v1688_v13 = vmax.f32 %v1668_v43, 0.0  ;;  %v2452_v18 = vadd.f32 %v2451_v7, %v4060_v48 }
 0x79b   : > { %v2706_v5 = vadd.f32 %v2705_v59, %v5424_v34  ;;  %v5451_v34 = vld [vmem:[#allocation6_spill] sm:$0xff]  ;;  %v1833_v30 = vmax.f32 %v1702_v11, %v1817_v42  ;;  %v1180_v59 = vmax.f32 %v1049_v8, %v1164_v55  ;;  %v772_v11 = vadd.f32 %v5459_v15, %v5185_v41  ;;  %v5462_v55 = vld [vmem:[#allocation40_spill] sm:$0xff] }
 0x79c   : > { %v2187_v46 = vadd.f32 %v5451_v34, %v5434_v61  ;;  %v1819_v49 = vmax.f32 %v1799_v58, 0.0  ;;  %v2061_v56 = vadd.f32 %v5461_v12, %v5150_v39  ;;  %v2583_v20 = vadd.f32 %v2582_v10, %v4060_v48  ;;  %v5467_v15 = vld [vmem:[#allocation70_spill] sm:$0xff] }
 0x79d   : > { %v2732_v17 = vmax.f32 %v2706_v5, 0.0  ;;  %v1964_v1 = vmax.f32 %v1833_v30, %v1948_v0  ;;  %v1311_v4 = vmax.f32 %v1180_v59, %v1295_v28  ;;  %v1557_v5 = vmax.f32 %v1537_v50, 0.0  ;;  %v2453_v30 = vpop.f32.mrf.mxu3 }
 0x79e   : > { %v2210_v21 = vmax.f32 %v2187_v46, 0.0  ;;  %v5460_v46 = vld [vmem:[#allocation28_spill] sm:$0xff]  ;;  %v904_v53 = vmax.f32 %v887_v2, 0.0  ;;  %v1149_v23 = vadd.f32 %v5462_v55, %v5185_v41  ;;  %v789_v7 = vmax.f32 %v772_v11, 0.0  ;;  %v5466_v2 = vld [vmem:[#allocation63_spill] sm:$0xff] }
 0x79f   : > { %v2748_v22 = vmax.f32 %v2617_v29, %v2732_v17  ;;  %v2095_v63 = vmax.f32 %v1964_v1, %v2079_v36  ;;  %v1442_v29 = vmax.f32 %v1311_v4, %v1426_v37  ;;  %v5458_v17 = vld [vmem:[#allocation73_spill] sm:$0xff]  ;;  %v1018_v14 = vadd.f32 %v5460_v46, %v5185_v41 }
 0x7a0   : > { %v1930_v31 = vadd.f32 %v5458_v17, %v5150_v39  ;;  %v2081_v44 = vmax.f32 %v2061_v56, 0.0  ;;  %v2323_v50 = vadd.f32 %v4991_v60, %v5150_v39  ;;  %v920_v10 = vmax.f32 %v789_v7, %v904_v53  ;;  %v5465_v60 = vld [vmem:[#allocation53_spill] sm:$0xff] }
 0x7a1   : > { %2764 = vxpose.xlu0.b32.cont [10/16] %v2748_v22, 128  ;;  %v2226_v51 = vmax.f32 %v2095_v63, %v2210_v21  ;;  %v1573_v22 = vmax.f32 %v1442_v29, %v1557_v5  ;;  %v2473_v21 = vmax.f32 %v2452_v18, 0.0  ;;  %v1035_v24 = vmax.f32 %v1018_v14, 0.0  ;;  %v5469_v53 = vld [vmem:[#allocation77_spill] sm:$0xff] }
 0x7a2   : > { %v2708_v19 = vpop.f32.mrf.mxu2  ;;  %v1950_v1 = vmax.f32 %v1930_v31, 0.0  ;;  %v2604_v63 = vmax.f32 %v2583_v20, 0.0  ;;  %v2454_v6 = vadd.f32 %v2453_v30, %v5150_v39  ;;  %v2343_v5 = vmax.f32 %v2323_v50, 0.0 }
 0x7a3   : > { %v2709_v16 = vadd.f32 %v2708_v19, %v4032_v33  ;;  %v2357_v42 = vmax.f32 %v2226_v51, %v2341_v32  ;;  %v1704_v26 = vmax.f32 %v1573_v22, %v1688_v13  ;;  %v2192_v19 = vadd.f32 %v4928_v9, %v5150_v39  ;;  %v5468_v22 = vld [vmem:[#allocation74_spill] sm:$0xff] }
 0x7a4   : > { %v1166_v32 = vmax.f32 %v1149_v23, 0.0  ;;  %v2489_v37 = vmax.f32 %v4989_v27, %v2473_v21  ;;  %v1051_v51 = vmax.f32 %v920_v10, %v1035_v24  ;;  %v1673_v27 = vadd.f32 %v5466_v2, %v5185_v41 }
 0x7a5   : > { %v2733_v54 = vmax.f32 %v2709_v16, 0.0  ;;  %v2488_v0 = vmax.f32 %v2357_v42, %v2472_v35  ;;  %v5463_v16 = vld [vmem:[#allocation41_spill] sm:$0xff]  ;;  %v1835_v28 = vmax.f32 %v1704_v26, %v1819_v49  ;;  %v2212_v59 = vmax.f32 %v2192_v19, 0.0  ;;  %v2456_v29 = vpop.f32.mrf.mxu3  ;;  %v5470_v19 = vld [vmem:[#allocation23_spill] sm:$0xff] }
 0x7a6   : > { %v1280_v8 = vadd.f32 %v5463_v16, %v5185_v41  ;;  %v2620_v57 = vmax.f32 %v2489_v37, %v2604_v63  ;;  %v2474_v17 = vmax.f32 %v2454_v6, 0.0  ;;  %v1804_v11 = vadd.f32 %v5467_v15, %v5185_v41 }
 0x7a7   : > { %v2749_v33 = vmax.f32 %v2618_v25, %v2733_v54  ;;  %v2619_v36 = vmax.f32 %v2488_v0, %v2603_v40  ;;  %v5464_v25 = vld [vmem:[#allocation49_spill] sm:$0xff]  ;;  %v1966_v54 = vmax.f32 %v1835_v28, %v1950_v1  ;;  %v1182_v40 = vmax.f32 %v1051_v51, %v1166_v32 }
 0x7a8   : > { %v1411_v45 = vadd.f32 %v5464_v25, %v5185_v41  ;;  %v1297_v35 = vmax.f32 %v1280_v8, 0.0  ;;  %v1690_v14 = vmax.f32 %v1673_v27, 0.0  ;;  %v1935_v49 = vadd.f32 %v5468_v22, %v5185_v41 }
 0x7a9   : > { %2765 = vxpose.xlu0.b32.cont [11/16] %v2749_v33, 128  ;;  %v1542_v33 = vadd.f32 %v5465_v60, %v5185_v41  ;;  %v2097_v4 = vmax.f32 %v1966_v54, %v2081_v44  ;;  %v2457_v30 = vadd.f32 %v2456_v29, %v4087_v62  ;;  %v2066_v55 = vadd.f32 %v5469_v53, %v5185_v41 }
 0x7aa   : > { %v2710_v47 = vpop.f32.mrf.mxu2  ;;  %v1428_v3 = vmax.f32 %v1411_v45, 0.0  ;;  %v1313_v31 = vmax.f32 %v1182_v40, %v1297_v35  ;;  %v1952_v7 = vmax.f32 %v1935_v49, 0.0  ;;  %v2197_v21 = vadd.f32 %v5470_v19, %v5185_v41  ;;  %v5472_v45 = vld [vmem:[#allocation32_spill] sm:$0xff] }
 0x7ab   : > { %v2711_v34 = vadd.f32 %v2710_v47, %v5434_v61  ;;  %v2584_v61 = vpop.f32.mrf.mxu1  ;;  %v2228_v13 = vmax.f32 %v2097_v4, %v2212_v59  ;;  %v1559_v47 = vmax.f32 %v1542_v33, 0.0  ;;  %v2083_v8 = vmax.f32 %v2066_v55, 0.0 }
 0x7ac   : > { %v2585_v58 = vadd.f32 %v2584_v61, %v5150_v39  ;;  %v1444_v46 = vmax.f32 %v1313_v31, %v1428_v3  ;;  %v2214_v25 = vmax.f32 %v2197_v21, 0.0 }
 0x7ad   : > { %v2734_v52 = vmax.f32 %v2711_v34, 0.0  ;;  %v2359_v18 = vmax.f32 %v2228_v13, %v2343_v5  ;;  %v2458_v28 = vpop.f32.mrf.mxu3 }
 0x7ae   : > { %v2605_v34 = vmax.f32 %v2585_v58, 0.0  ;;  %v1575_v20 = vmax.f32 %v1444_v46, %v1559_v47 }
 0x7af   : > { %v2750_v38 = vmax.f32 %v2619_v36, %v2734_v52  ;;  %v2490_v56 = vmax.f32 %v2359_v18, %v2474_v17  ;;  %v1821_v52 = vmax.f32 %v1804_v11, 0.0 }
 0x7b0   : > { %v1706_v61 = vmax.f32 %v1575_v20, %v1690_v14 }
 0x7b1   : > { %2766 = vxpose.xlu0.b32.cont [12/16] %v2750_v38, 128  ;;  %v2621_v23 = vmax.f32 %v2490_v56, %v2605_v34  ;;  %v2475_v38 = vmax.f32 %v2457_v30, 0.0 }
 0x7b2   : > { %v2713_v9 = vpop.f32.mrf.mxu2  ;;  %v1837_v16 = vmax.f32 %v1706_v61, %v1821_v52 }
 0x7b3   : > { %v2714_v43 = vadd.f32 %v2713_v9, %v4060_v48  ;;  %v2587_v0 = vpop.f32.mrf.mxu1  ;;  %v2491_v54 = vmax.f32 %v5472_v45, %v2475_v38  ;;  %v2459_v9 = vadd.f32 %v2458_v28, %v5185_v41 }
 0x7b4   : > { %v2588_v26 = vadd.f32 %v2587_v0, %v4087_v62  ;;  %v1968_v63 = vmax.f32 %v1837_v16, %v1952_v7 }
 0x7b5   : > { %v2735_v42 = vmax.f32 %v2714_v43, 0.0  ;;  %v2476_v33 = vmax.f32 %v2459_v9, 0.0 }
 0x7b6   : > { %v2606_v50 = vmax.f32 %v2588_v26, 0.0  ;;  %v2099_v37 = vmax.f32 %v1968_v63, %v2083_v8 }
 0x7b7   : > { %v2751_v48 = vmax.f32 %v2620_v57, %v2735_v42 }
 0x7b8   : > { %v2622_v43 = vmax.f32 %v2491_v54, %v2606_v50  ;;  %v2230_v60 = vmax.f32 %v2099_v37, %v2214_v25 }
 0x7b9   : > { %2767 = vxpose.xlu0.b32.cont [13/16] %v2751_v48, 128 }
 0x7ba   : > { %v2715_v12 = vpop.f32.mrf.mxu2 }
 0x7bb   : > { %v2716_v36 = vadd.f32 %v2715_v12, %v5150_v39  ;;  %v5471_v39 = vld [vmem:[#allocation37_spill] sm:$0xff]  ;;  %v2589_v10 = vpop.f32.mrf.mxu1 }
 0x7bc   : > { %v2328_v44 = vadd.f32 %v5471_v39, %v5185_v41  ;;  %v2590_v51 = vadd.f32 %v2589_v10, %v5185_v41 }
 0x7bd   : > { %v2736_v1 = vmax.f32 %v2716_v36, 0.0 }
 0x7be   : > { %v2345_v6 = vmax.f32 %v2328_v44, 0.0  ;;  %v2607_v57 = vmax.f32 %v2590_v51, 0.0 }
 0x7bf   : > { %v2752_v24 = vmax.f32 %v2621_v23, %v2736_v1 }
 0x7c0   : > { %v2361_v5 = vmax.f32 %v2230_v60, %v2345_v6 }
 0x7c1   : > { %2768 = vxpose.xlu0.b32.cont [14/16] %v2752_v24, 128 }
 0x7c2   : > { %v2718_v32 = vpop.f32.mrf.mxu2  ;;  %v2492_v42 = vmax.f32 %v2361_v5, %v2476_v33 }
 0x7c3   : > { %v2719_v59 = vadd.f32 %v2718_v32, %v4087_v62 }
 0x7c4   : > { %v2623_v3 = vmax.f32 %v2492_v42, %v2607_v57 }
 0x7c5   : > { %v2737_v35 = vmax.f32 %v2719_v59, 0.0 }
 0x7c7   : > { %v2753_v4 = vmax.f32 %v2622_v43, %v2737_v35 }
 0x7c9   : > { %2769 = vxpose.xlu0.b32.cont [15/16] %v2753_v4, 128 }
 0x7ca   : > { %v2720_v58 = vpop.f32.mrf.mxu2 }
 0x7cb   : > { %v2721_v40 = vadd.f32 %v2720_v58, %v5185_v41 }
 0x7cd   : > { %v2738_v2 = vmax.f32 %v2721_v40, 0.0 }
 0x7cf   : > { %v2754_v62 = vmax.f32 %v2623_v3, %v2738_v2 }
 0x7d1   : > { %2770 = vxpose.xlu0.b32.end [16/16] %v2754_v62, 128 }
 0x7fd   : > { %v2771_v27 = vpop.trf.xlu0 }
 0x7fe   : > { %2787 = vst [vmem:[%s5237_s14] sm:$0xff] %v2771_v27 }
 0x805   : > { %v2772_v29 = vpop.trf.xlu0 }
 0x806   : > { %2788 = vst [vmem:[%s5237_s14 + $0x8] sm:$0xff] %v2772_v29 }
 0x80d   : > { %v2773_v41 = vpop.trf.xlu0 }
 0x80e   : > { %2789 = vst [vmem:[%s5237_s14 + $0x10] sm:$0xff] %v2773_v41 }
 0x815   : > { %v2774_v13 = vpop.trf.xlu0 }
 0x816   : > { %2790 = vst [vmem:[%s5237_s14 + $0x18] sm:$0xff] %v2774_v13 }
 0x81d   : > { %v2775_v17 = vpop.trf.xlu0 }
 0x81e   : > { %2791 = vst [vmem:[%s5237_s14 + $0x20] sm:$0xff] %v2775_v17 }
 0x825   : > { %v2776_v48 = vpop.trf.xlu0 }
 0x826   : > { %2792 = vst [vmem:[%s5237_s14 + $0x28] sm:$0xff] %v2776_v48 }
 0x82d   : > { %v2777_v31 = vpop.trf.xlu0 }
 0x82e   : > { %2793 = vst [vmem:[%s5237_s14 + $0x30] sm:$0xff] %v2777_v31 }
 0x835   : > { %v2778_v47 = vpop.trf.xlu0 }
 0x836   : > { %2794 = vst [vmem:[%s5237_s14 + $0x38] sm:$0xff] %v2778_v47 }
 0x83d   : > { %v2779_v15 = vpop.trf.xlu0 }
 0x83e   : > { %2795 = vst [vmem:[%s5237_s14 + $0x40] sm:$0xff] %v2779_v15 }
 0x845   : > { %v2780_v11 = vpop.trf.xlu0 }
 0x846   : > { %2796 = vst [vmem:[%s5237_s14 + $0x48] sm:$0xff] %v2780_v11 }
 0x84d   : > { %v2781_v0 = vpop.trf.xlu0 }
 0x84e   : > { %2797 = vst [vmem:[%s5237_s14 + $0x50] sm:$0xff] %v2781_v0 }
 0x855   : > { %v2782_v18 = vpop.trf.xlu0 }
 0x856   : > { %2798 = vst [vmem:[%s5237_s14 + $0x58] sm:$0xff] %v2782_v18 }
 0x85d   : > { %v2783_v34 = vpop.trf.xlu0 }
 0x85e   : > { %2799 = vst [vmem:[%s5237_s14 + $0x60] sm:$0xff] %v2783_v34 }
 0x865   : > { %v2784_v46 = vpop.trf.xlu0 }
 0x866   : > { %2800 = vst [vmem:[%s5237_s14 + $0x68] sm:$0xff] %v2784_v46 }
 0x86d   : > { %v2785_v14 = vpop.trf.xlu0 }
 0x86e   : > { %2801 = vst [vmem:[%s5237_s14 + $0x70] sm:$0xff] %v2785_v14 }
 0x875   : > { %v2786_v22 = vpop.trf.xlu0 }
 0x876   : > { %2802 = vst [vmem:[%s5237_s14 + $0x78] sm:$0xff] %v2786_v22 }
 0x877   : > { %3411 = shalt.err (!%p3408_p7)
}
 0x878   : > { %s3481_s14 = smov 128   ;;  %s3482_s27 = smov 8  }
 0x879   : > { %3283 = dma.vmem_to_hbm [thread:$0]  (%p3573_p8), %s2819_s30, 2048, %s2821_s6, %s2804_s21, %s3481_s14, %s3481_s14, %s3482_s27  }
 0x87a PF: > { %p3289_p10 = scmp.ge.s32.totalorder %s3478_s25, 2  ;;  %s2835_s16 = sand.u32 1, %s3450_s18  }
 0x87b   : > { %s2836_s9 = scalar_lea.sflag [#allocation4], %s2835_s16 }
 0x87c   : > { %p3286_p11 = pnand %p3289_p10, %p3577_p9 }
 0x87e   : > { %p3287_p12 = pneg %p3286_p11 }
 0x880   : > { %3445 = dma.done.wait (%p3287_p12), %s2836_s9, 2048  }
 0x881   : > { %3447 = vsyncadd (%p3287_p12), %s2836_s9, 4294965248  ;;  %s18_s25 = sadd.s32 1, %s3478_s25   ;;  %s5474_s18 = smov %s3454_s19 }
 0x882   : > { %p15_p13 = scmp.ge.s32.totalorder %s18_s25, 6   ;;  %s5475_s19 = smov %s3458_s20 }
 0x883   : > { %s5476_s20 = smov %s3585_s12  ;;  %s5477_s21 = smov %s3470_s23 }
 0x884   : > { %s5478_s22 = smov %s3474_s24  ;;  %s5479_s23 = smov %s5482_s28 }
 0x885   : > { %s5480_s24 = smov %s5486_s29  ;;  %17 = sbr.rel (!%p15_p13) target bundleno = 5 (0x5), region = 136 }
 0x88a   :  { %2842 = vsyncpa [#allocation4], 1 }
 0x88b   :  { %2844 = vsyncpa [#allocation4 + $0x1], 1 }

</bundles_post_ra>
